<compile_context>
chip_gen: v6e
topology: v6e:2x2x1
jax: 0.10.0
libtpu: 0.0.40
codegen_flags: <defaults>
</compile_context>

<pallas_src>
import jax
import jax.numpy as jnp
import numpy as np
from jax.experimental import pallas as pl
from jax.experimental.pallas import tpu as pltpu

NLE_TERM_CO = 80
D_IN = NLE_TERM_CO * 2          # 160
K1, S1 = 8, 4                   # conv1 kernel / stride
K2, S2 = 4, 1                   # conv2 kernel / stride
L1 = 1 + (D_IN - K1) // S1      # 39  (after conv1)
L2 = 1 + (L1 - K2) // S2        # 36  (after conv2)
C1, C2 = 32, 64
HID = 128

PACK = 2                        # conv2 output positions packed per patch row
NSP = L2 // PACK                # 18 row-groups per batch element
LANE_IN = 2 * PACK * K2 * K1    # 128 = chars/digits x pos-in-pair x conv2-tap x conv1-tap
LANE_CAT = PACK * K2 * C1       # 256 = pos-in-pair x conv2-tap x conv1-out-channel
LANE_H2 = PACK * C2             # 128 = pos-in-pair x conv2-out-channel
assert L2 % PACK == 0


def _elu(x):
    # ELU(alpha=1); clamp the exp argument so the untaken branch never overflows.
    return jnp.where(x > 0, x, jnp.exp(jnp.minimum(x, 0.0)) - 1.0)


def _round_up(x, m):
    return (x + m - 1) // m * m


def _build_src_idx():
    # SRC[sp, lane] indexes the per-row [chars(160) | digits(160)] vector.
    #   lane = c*64 + j*32 + k*8 + m   ->   value index = c*160 + 4*(2*sp + j + k) + m
    sp = np.arange(NSP).reshape(NSP, 1, 1, 1, 1)
    c = np.arange(2).reshape(1, 2, 1, 1, 1)
    j = np.arange(PACK).reshape(1, 1, PACK, 1, 1)
    k = np.arange(K2).reshape(1, 1, 1, K2, 1)
    m = np.arange(K1).reshape(1, 1, 1, 1, K1)
    pos = c * D_IN + S1 * (PACK * sp + j + k) + m
    return pos.reshape(NSP, LANE_IN).astype(np.int32)


SRC_IDX = _build_src_idx()       # (18, 128) constant gather index


# ---------------------------------------------------------------------------
# Fused kernel: one batch tile (TB rows) per grid step.
#   patch_ref : (1, NSP*TB, 128)  dense super-im2col, row = sp*TB + b
#   out_ref   : (TB, 128)
# Weights use constant index maps -> resident in VMEM across grid steps.
# ---------------------------------------------------------------------------
def _encoder_kernel(patch_ref, w1_ref, b1_ref, w2_ref, b2_ref,
                    w3_ref, b3_ref, w4_ref, b4_ref, out_ref):
    TB = out_ref.shape[0]

    # conv1 (incl. the 4-tap / 2-position replication conv2 needs) as ONE lane-dense
    # matmul: (NSP*TB, 128) @ (128, 256).  Bias tiled x8, ELU on dense 256 lanes.
    p = patch_ref[0]
    cat = _elu(jnp.dot(p, w1_ref[...], preferred_element_type=jnp.float32)
               + b1_ref[...])                                   # (NSP*TB, 256)

    # conv2 as ONE matmul against the 2-way block-diagonal weight: (NSP*TB,256)@(256,128).
    h2 = _elu(jnp.dot(cat, w2_ref[...], preferred_element_type=jnp.float32)
              + b2_ref[...])                                    # (NSP*TB, 128)

    # fc1: f32-accumulate over the NSP sublane-aligned row groups -- no (TB,2304) flat
    # buffer, no lane concatenates.  Each slice is a cheap static sublane view.
    acc = jnp.dot(h2[0:TB, :], w3_ref[0], preferred_element_type=jnp.float32)
    for sp in range(1, NSP):
        acc = acc + jnp.dot(h2[sp * TB:(sp + 1) * TB, :], w3_ref[sp],
                            preferred_element_type=jnp.float32)
    h3 = _elu(acc + b3_ref[...])                                # (TB, 128)

    out_ref[...] = _elu(jnp.dot(h3, w4_ref[...], preferred_element_type=jnp.float32)
                        + b4_ref[...])                          # (TB, 128) lane-dense store


# ---------------------------------------------------------------------------
# One-time parameter re-layout (hoisted out of the forward path).
# ---------------------------------------------------------------------------
def prepare_params(params):
    w1 = params["conv1_w"]                 # (C1, 2, K1)
    w2 = params["conv2_w"]                 # (C2, C1, K2)

    # conv1 as a block-structured (128, 256) matrix:
    #   in lane  c*64 + j*32 + k*8 + m, out lane j*128 + k*32 + co
    w1bd = jnp.zeros((LANE_IN, LANE_CAT), jnp.float32)
    for c in range(2):
        for j in range(PACK):
            for k in range(K2):
                r0 = c * (PACK * K2 * K1) + j * (K2 * K1) + k * K1
                c0 = j * (K2 * C1) + k * C1
                w1bd = w1bd.at[r0:r0 + K1, c0:c0 + C1].set(w1[:, c, :].T)
    b1bd = jnp.tile(params["conv1_b"], PACK * K2).reshape(1, LANE_CAT)

    # conv2 as a 2-way block-diagonal (256, 128): rows j*128 + k*32 + ci, cols j*64 + co.
    w2r = jnp.transpose(w2, (2, 1, 0)).reshape(K2 * C1, C2)      # (128, 64), row = k*32+ci
    w2bd = jnp.zeros((LANE_CAT, LANE_H2), jnp.float32)
    for j in range(PACK):
        w2bd = w2bd.at[j * (K2 * C1):(j + 1) * (K2 * C1),
                       j * C2:(j + 1) * C2].set(w2r)
    b2bd = jnp.tile(params["conv2_b"], PACK).reshape(1, LANE_H2)

    # fc1 with PyTorch's channel-major flatten (c*36+s) folded into the
    # (position-pair, j*64+c, out) layout that matches h2's lanes.
    w3 = (params["fc1_w"].T.reshape(C2, L2, HID)   # (c, s, o)
          .transpose(1, 0, 2)                      # (s, c, o)
          .reshape(NSP, PACK * C2, HID))           # (sp, j*64+c, o)
    b3 = params["fc1_b"].reshape(1, HID)
    w4 = params["fc2_w"].T
    b4 = params["fc2_b"].reshape(1, HID)
    return {"w1": w1bd, "b1": b1bd, "w2": w2bd, "b2": b2bd,
            "w3": w3, "b3": b3, "w4": w4, "b4": b4}


def _pick_tiles(B, block_b):
    TB = _round_up(min(block_b, _round_up(B, 8)), 8)
    B_pad = _round_up(B, TB)
    n_tiles = B_pad // TB
    # v7x has 2 TensorCores: if the whole batch fits in one tile but can be split into
    # two sublane-aligned halves, use two grid steps so the "parallel" axis can be
    # sharded across cores (negligible cost on the single-core v5e/v6e).
    if n_tiles == 1 and B > 8:
        TB = _round_up((B + 1) // 2, 8)
        B_pad = 2 * TB
        n_tiles = 2
    return TB, B_pad, n_tiles


def bottom_lines_encoder(bottom_lines, prep, block_b=128):
    """block_b=128 is a safe default for v5e/v7x; on v6e block_b=256 is worth trying."""
    x = bottom_lines.astype(jnp.float32)                          # (B, 160)
    B = x.shape[0]
    TB, B_pad, n_tiles = _pick_tiles(B, block_b)

    # Host prework (one small XLA fusion): normalisation + the lane-dense super-im2col
    # gather.  Only the major-dim (batch <-> position-group) permutation remains; the
    # 128-lane minor dim stays contiguous so it is a cheap, fusable copy.
    chars = (x - 32.0) / 96.0
    mask = jnp.logical_and(x > 44, x < 58).astype(jnp.float32)
    digits = mask * (x - 47.0) / 10.0
    cd = jnp.concatenate([chars, digits], axis=1)                 # (B, 320)
    if B_pad != B:
        cd = jnp.pad(cd, ((0, B_pad - B), (0, 0)))
    g = jnp.take(cd, SRC_IDX, axis=1)                             # (B_pad, NSP, 128)
    patch = (g.reshape(n_tiles, TB, NSP, LANE_IN)
             .transpose(0, 2, 1, 3)
             .reshape(n_tiles, NSP * TB, LANE_IN))                # row = sp*TB + b

    const2 = lambda i: (0, 0)
    const3 = lambda i: (0, 0, 0)
    out = pl.pallas_call(
        _encoder_kernel,
        out_shape=jax.ShapeDtypeStruct((B_pad, HID), jnp.float32),
        grid=(n_tiles,),
        in_specs=[
            pl.BlockSpec((1, NSP * TB, LANE_IN), lambda i: (i, 0, 0)),
            pl.BlockSpec((LANE_IN, LANE_CAT), const2),
            pl.BlockSpec((1, LANE_CAT), const2),
            pl.BlockSpec((LANE_CAT, LANE_H2), const2),
            pl.BlockSpec((1, LANE_H2), const2),
            pl.BlockSpec((NSP, LANE_H2, HID), const3),
            pl.BlockSpec((1, HID), const2),
            pl.BlockSpec((HID, HID), const2),
            pl.BlockSpec((1, HID), const2),
        ],
        out_specs=pl.BlockSpec((TB, HID), lambda i: (i, 0)),
        compiler_params=pltpu.CompilerParams(
            dimension_semantics=("parallel",),
            vmem_limit_bytes=48 * 1024 * 1024),
    )(patch, prep["w1"], prep["b1"], prep["w2"], prep["b2"],
      prep["w3"], prep["b3"], prep["w4"], prep["b4"])
    return out[:B]


# ---------------------------------------------------------------------------
# Deterministic parameter init (PyTorch-convention shapes) and pure-JAX reference
# ---------------------------------------------------------------------------
def init_params(key):
    ks = jax.random.split(key, 8)
    s = 0.05
    return {
        "conv1_w": s * jax.random.normal(ks[0], (C1, 2, K1), jnp.float32),
        "conv1_b": s * jax.random.normal(ks[1], (C1,), jnp.float32),
        "conv2_w": s * jax.random.normal(ks[2], (C2, C1, K2), jnp.float32),
        "conv2_b": s * jax.random.normal(ks[3], (C2,), jnp.float32),
        "fc1_w":  s * jax.random.normal(ks[4], (HID, L2 * C2), jnp.float32),
        "fc1_b":  s * jax.random.normal(ks[5], (HID,), jnp.float32),
        "fc2_w":  s * jax.random.normal(ks[6], (HID, HID), jnp.float32),
        "fc2_b":  s * jax.random.normal(ks[7], (HID,), jnp.float32),
    }


def reference(bottom_lines, params):
    x = bottom_lines.astype(jnp.float32)
    B = x.shape[0]
    hp = jax.lax.Precision.HIGHEST
    chars = (x - 32.0) / 96.0
    mask = jnp.logical_and(x > 44, x < 58).astype(jnp.float32)
    digits = mask * (x - 47.0) / 10.0
    inp = jnp.stack([chars, digits], axis=1)                 # (B, 2, 160) NCW
    h = jax.lax.conv_general_dilated(inp, params["conv1_w"], (S1,), "VALID",
                                     dimension_numbers=("NCH", "OIH", "NCH"),
                                     precision=hp)
    h = jax.nn.elu(h + params["conv1_b"][None, :, None])
    h = jax.lax.conv_general_dilated(h, params["conv2_w"], (S2,), "VALID",
                                     dimension_numbers=("NCH", "OIH", "NCH"),
                                     precision=hp)
    h = jax.nn.elu(h + params["conv2_b"][None, :, None])
    flat = h.reshape(B, -1)
    h3 = jax.nn.elu(jnp.dot(flat, params["fc1_w"].T, precision=hp) + params["fc1_b"])
    h4 = jax.nn.elu(jnp.dot(h3, params["fc2_w"].T, precision=hp) + params["fc2_b"])
    return h4


if __name__ == "__main__":
    key = jax.random.PRNGKey(0)
    k_in, k_p = jax.random.split(key)
    B = 4
    # bottom_lines: printable terminal char codes, shape (B, NLE_TERM_CO * 2) = (4, 160)
    bottom_lines = jax.random.randint(k_in, (B, D_IN), 32, 128, dtype=jnp.int32)
    params = init_params(k_p)
    prep = prepare_params(params)        # one-time weight re-layout (hoisted)

    fwd = jax.jit(bottom_lines_encoder)
    out = jax.block_until_ready(fwd(bottom_lines, prep))
    assert out.shape == (B, HID) and out.dtype == jnp.float32

    ref = jax.block_until_ready(reference(bottom_lines, params))
    np.testing.assert_allclose(np.asarray(out), np.asarray(ref), rtol=2e-3, atol=2e-3)

    print("KERNEL_OK")
</pallas_src>

<mosaic_0001>
module attributes {stable_mosaic.version = 11 : i64} {
  func.func @_encoder_kernel(%arg0: i32, %arg1: memref<1x144x128xf32, #tpu.memory_space<vmem>>, %arg2: memref<128x256xf32, #tpu.memory_space<vmem>>, %arg3: memref<1x256xf32, #tpu.memory_space<vmem>>, %arg4: memref<256x128xf32, #tpu.memory_space<vmem>>, %arg5: memref<1x128xf32, #tpu.memory_space<vmem>>, %arg6: memref<18x128x128xf32, #tpu.memory_space<vmem>>, %arg7: memref<1x128xf32, #tpu.memory_space<vmem>>, %arg8: memref<128x128xf32, #tpu.memory_space<vmem>>, %arg9: memref<1x128xf32, #tpu.memory_space<vmem>>, %arg10: memref<8x128xf32, #tpu.memory_space<vmem>>) attributes {dimension_semantics = [#tpu.dimension_semantics<parallel>], iteration_bounds = array<i64: 1>, scalar_prefetch = 0 : i64, scratch_operands = 0 : i64, tpu.core_type = #tpu.core_type<tc>, window_params = [{transform_indices = @transform_0, window_bounds = array<i64: 1, 144, 128>}, {pipeline_mode = #tpu.pipeline_mode<synchronous>, transform_indices = @transform_1, window_bounds = array<i64: 128, 256>}, {pipeline_mode = #tpu.pipeline_mode<synchronous>, transform_indices = @transform_2, window_bounds = array<i64: 1, 256>}, {pipeline_mode = #tpu.pipeline_mode<synchronous>, transform_indices = @transform_3, window_bounds = array<i64: 256, 128>}, {pipeline_mode = #tpu.pipeline_mode<synchronous>, transform_indices = @transform_4, window_bounds = array<i64: 1, 128>}, {pipeline_mode = #tpu.pipeline_mode<synchronous>, transform_indices = @transform_5, window_bounds = array<i64: 18, 128, 128>}, {pipeline_mode = #tpu.pipeline_mode<synchronous>, transform_indices = @transform_6, window_bounds = array<i64: 1, 128>}, {pipeline_mode = #tpu.pipeline_mode<synchronous>, transform_indices = @transform_7, window_bounds = array<i64: 128, 128>}, {pipeline_mode = #tpu.pipeline_mode<synchronous>, transform_indices = @transform_8, window_bounds = array<i64: 1, 128>}, {transform_indices = @transform_9, window_bounds = array<i64: 8, 128>}]} {
    %c0 = arith.constant 0 : index
    %c0_0 = arith.constant 0 : index
    %c0_1 = arith.constant 0 : index
    %0 = vector.load %arg1[%c0, %c0_0, %c0_1] : memref<1x144x128xf32, #tpu.memory_space<vmem>>, vector<1x144x128xf32>
    %1 = vector.shape_cast %0 : vector<1x144x128xf32> to vector<144x128xf32>
    %c0_2 = arith.constant 0 : index
    %c0_3 = arith.constant 0 : index
    %2 = vector.load %arg2[%c0_2, %c0_3] : memref<128x256xf32, #tpu.memory_space<vmem>>, vector<128x256xf32>
    %cst = arith.constant dense<0.000000e+00> : vector<144x256xf32>
    %3 = tpu.matmul %1, %2, %cst {dimension_numbers = #tpu.dot_dimension_numbers<[1], [0], [0], [1], [0, 0, 1, 1], [], []>} : vector<144x128xf32>, vector<128x256xf32>, vector<144x256xf32> -> vector<144x256xf32>
    %c0_4 = arith.constant 0 : index
    %c0_5 = arith.constant 0 : index
    %4 = vector.load %arg3[%c0_4, %c0_5] : memref<1x256xf32, #tpu.memory_space<vmem>>, vector<1x256xf32>
    %5 = vector.broadcast %4 : vector<1x256xf32> to vector<144x256xf32>
    %6 = arith.addf %3, %5 : vector<144x256xf32>
    %cst_6 = arith.constant 0.000000e+00 : f32
    %7 = vector.broadcast %cst_6 : f32 to vector<144x256xf32>
    %8 = arith.cmpf ogt, %6, %7 : vector<144x256xf32>
    %cst_7 = arith.constant 0.000000e+00 : f32
    %9 = vector.broadcast %cst_7 : f32 to vector<144x256xf32>
    %10 = arith.minimumf %6, %9 : vector<144x256xf32>
    %11 = math.exp %10 : vector<144x256xf32>
    %cst_8 = arith.constant 1.000000e+00 : f32
    %12 = vector.broadcast %cst_8 : f32 to vector<144x256xf32>
    %13 = arith.subf %11, %12 : vector<144x256xf32>
    %14 = arith.select %8, %6, %13 : vector<144x256xi1>, vector<144x256xf32>
    %c0_9 = arith.constant 0 : index
    %c0_10 = arith.constant 0 : index
    %15 = vector.load %arg4[%c0_9, %c0_10] : memref<256x128xf32, #tpu.memory_space<vmem>>, vector<256x128xf32>
    %cst_11 = arith.constant dense<0.000000e+00> : vector<144x128xf32>
    %16 = tpu.matmul %14, %15, %cst_11 {dimension_numbers = #tpu.dot_dimension_numbers<[1], [0], [0], [1], [0, 0, 1, 1], [], []>} : vector<144x256xf32>, vector<256x128xf32>, vector<144x128xf32> -> vector<144x128xf32>
    %c0_12 = arith.constant 0 : index
    %c0_13 = arith.constant 0 : index
    %17 = vector.load %arg5[%c0_12, %c0_13] : memref<1x128xf32, #tpu.memory_space<vmem>>, vector<1x128xf32>
    %18 = vector.broadcast %17 : vector<1x128xf32> to vector<144x128xf32>
    %19 = arith.addf %16, %18 : vector<144x128xf32>
    %cst_14 = arith.constant 0.000000e+00 : f32
    %20 = vector.broadcast %cst_14 : f32 to vector<144x128xf32>
    %21 = arith.cmpf ogt, %19, %20 : vector<144x128xf32>
    %cst_15 = arith.constant 0.000000e+00 : f32
    %22 = vector.broadcast %cst_15 : f32 to vector<144x128xf32>
    %23 = arith.minimumf %19, %22 : vector<144x128xf32>
    %24 = math.exp %23 : vector<144x128xf32>
    %cst_16 = arith.constant 1.000000e+00 : f32
    %25 = vector.broadcast %cst_16 : f32 to vector<144x128xf32>
    %26 = arith.subf %24, %25 : vector<144x128xf32>
    %27 = arith.select %21, %19, %26 : vector<144x128xi1>, vector<144x128xf32>
    %28 = vector.extract_strided_slice %27 {offsets = [0, 0], sizes = [8, 128], strides = [1, 1]} : vector<144x128xf32> to vector<8x128xf32>
    %c0_17 = arith.constant 0 : index
    %c0_18 = arith.constant 0 : index
    %c0_19 = arith.constant 0 : index
    %29 = vector.load %arg6[%c0_17, %c0_18, %c0_19] : memref<18x128x128xf32, #tpu.memory_space<vmem>>, vector<1x128x128xf32>
    %30 = vector.shape_cast %29 : vector<1x128x128xf32> to vector<128x128xf32>
    %cst_20 = arith.constant dense<0.000000e+00> : vector<8x128xf32>
    %31 = tpu.matmul %28, %30, %cst_20 {dimension_numbers = #tpu.dot_dimension_numbers<[1], [0], [0], [1], [0, 0, 1, 1], [], []>} : vector<8x128xf32>, vector<128x128xf32>, vector<8x128xf32> -> vector<8x128xf32>
    %32 = vector.extract_strided_slice %27 {offsets = [8, 0], sizes = [8, 128], strides = [1, 1]} : vector<144x128xf32> to vector<8x128xf32>
    %c1 = arith.constant 1 : index
    %c0_21 = arith.constant 0 : index
    %c0_22 = arith.constant 0 : index
    %33 = vector.load %arg6[%c1, %c0_21, %c0_22] : memref<18x128x128xf32, #tpu.memory_space<vmem>>, vector<1x128x128xf32>
    %34 = vector.shape_cast %33 : vector<1x128x128xf32> to vector<128x128xf32>
    %cst_23 = arith.constant dense<0.000000e+00> : vector<8x128xf32>
    %35 = tpu.matmul %32, %34, %cst_23 {dimension_numbers = #tpu.dot_dimension_numbers<[1], [0], [0], [1], [0, 0, 1, 1], [], []>} : vector<8x128xf32>, vector<128x128xf32>, vector<8x128xf32> -> vector<8x128xf32>
    %36 = arith.addf %31, %35 : vector<8x128xf32>
    %37 = vector.extract_strided_slice %27 {offsets = [16, 0], sizes = [8, 128], strides = [1, 1]} : vector<144x128xf32> to vector<8x128xf32>
    %c2 = arith.constant 2 : index
    %c0_24 = arith.constant 0 : index
    %c0_25 = arith.constant 0 : index
    %38 = vector.load %arg6[%c2, %c0_24, %c0_25] : memref<18x128x128xf32, #tpu.memory_space<vmem>>, vector<1x128x128xf32>
    %39 = vector.shape_cast %38 : vector<1x128x128xf32> to vector<128x128xf32>
    %cst_26 = arith.constant dense<0.000000e+00> : vector<8x128xf32>
    %40 = tpu.matmul %37, %39, %cst_26 {dimension_numbers = #tpu.dot_dimension_numbers<[1], [0], [0], [1], [0, 0, 1, 1], [], []>} : vector<8x128xf32>, vector<128x128xf32>, vector<8x128xf32> -> vector<8x128xf32>
    %41 = arith.addf %36, %40 : vector<8x128xf32>
    %42 = vector.extract_strided_slice %27 {offsets = [24, 0], sizes = [8, 128], strides = [1, 1]} : vector<144x128xf32> to vector<8x128xf32>
    %c3 = arith.constant 3 : index
    %c0_27 = arith.constant 0 : index
    %c0_28 = arith.constant 0 : index
    %43 = vector.load %arg6[%c3, %c0_27, %c0_28] : memref<18x128x128xf32, #tpu.memory_space<vmem>>, vector<1x128x128xf32>
    %44 = vector.shape_cast %43 : vector<1x128x128xf32> to vector<128x128xf32>
    %cst_29 = arith.constant dense<0.000000e+00> : vector<8x128xf32>
    %45 = tpu.matmul %42, %44, %cst_29 {dimension_numbers = #tpu.dot_dimension_numbers<[1], [0], [0], [1], [0, 0, 1, 1], [], []>} : vector<8x128xf32>, vector<128x128xf32>, vector<8x128xf32> -> vector<8x128xf32>
    %46 = arith.addf %41, %45 : vector<8x128xf32>
    %47 = vector.extract_strided_slice %27 {offsets = [32, 0], sizes = [8, 128], strides = [1, 1]} : vector<144x128xf32> to vector<8x128xf32>
    %c4 = arith.constant 4 : index
    %c0_30 = arith.constant 0 : index
    %c0_31 = arith.constant 0 : index
    %48 = vector.load %arg6[%c4, %c0_30, %c0_31] : memref<18x128x128xf32, #tpu.memory_space<vmem>>, vector<1x128x128xf32>
    %49 = vector.shape_cast %48 : vector<1x128x128xf32> to vector<128x128xf32>
    %cst_32 = arith.constant dense<0.000000e+00> : vector<8x128xf32>
    %50 = tpu.matmul %47, %49, %cst_32 {dimension_numbers = #tpu.dot_dimension_numbers<[1], [0], [0], [1], [0, 0, 1, 1], [], []>} : vector<8x128xf32>, vector<128x128xf32>, vector<8x128xf32> -> vector<8x128xf32>
    %51 = arith.addf %46, %50 : vector<8x128xf32>
    %52 = vector.extract_strided_slice %27 {offsets = [40, 0], sizes = [8, 128], strides = [1, 1]} : vector<144x128xf32> to vector<8x128xf32>
    %c5 = arith.constant 5 : index
    %c0_33 = arith.constant 0 : index
    %c0_34 = arith.constant 0 : index
    %53 = vector.load %arg6[%c5, %c0_33, %c0_34] : memref<18x128x128xf32, #tpu.memory_space<vmem>>, vector<1x128x128xf32>
    %54 = vector.shape_cast %53 : vector<1x128x128xf32> to vector<128x128xf32>
    %cst_35 = arith.constant dense<0.000000e+00> : vector<8x128xf32>
    %55 = tpu.matmul %52, %54, %cst_35 {dimension_numbers = #tpu.dot_dimension_numbers<[1], [0], [0], [1], [0, 0, 1, 1], [], []>} : vector<8x128xf32>, vector<128x128xf32>, vector<8x128xf32> -> vector<8x128xf32>
    %56 = arith.addf %51, %55 : vector<8x128xf32>
    %57 = vector.extract_strided_slice %27 {offsets = [48, 0], sizes = [8, 128], strides = [1, 1]} : vector<144x128xf32> to vector<8x128xf32>
    %c6 = arith.constant 6 : index
    %c0_36 = arith.constant 0 : index
    %c0_37 = arith.constant 0 : index
    %58 = vector.load %arg6[%c6, %c0_36, %c0_37] : memref<18x128x128xf32, #tpu.memory_space<vmem>>, vector<1x128x128xf32>
    %59 = vector.shape_cast %58 : vector<1x128x128xf32> to vector<128x128xf32>
    %cst_38 = arith.constant dense<0.000000e+00> : vector<8x128xf32>
    %60 = tpu.matmul %57, %59, %cst_38 {dimension_numbers = #tpu.dot_dimension_numbers<[1], [0], [0], [1], [0, 0, 1, 1], [], []>} : vector<8x128xf32>, vector<128x128xf32>, vector<8x128xf32> -> vector<8x128xf32>
    %61 = arith.addf %56, %60 : vector<8x128xf32>
    %62 = vector.extract_strided_slice %27 {offsets = [56, 0], sizes = [8, 128], strides = [1, 1]} : vector<144x128xf32> to vector<8x128xf32>
    %c7 = arith.constant 7 : index
    %c0_39 = arith.constant 0 : index
    %c0_40 = arith.constant 0 : index
    %63 = vector.load %arg6[%c7, %c0_39, %c0_40] : memref<18x128x128xf32, #tpu.memory_space<vmem>>, vector<1x128x128xf32>
    %64 = vector.shape_cast %63 : vector<1x128x128xf32> to vector<128x128xf32>
    %cst_41 = arith.constant dense<0.000000e+00> : vector<8x128xf32>
    %65 = tpu.matmul %62, %64, %cst_41 {dimension_numbers = #tpu.dot_dimension_numbers<[1], [0], [0], [1], [0, 0, 1, 1], [], []>} : vector<8x128xf32>, vector<128x128xf32>, vector<8x128xf32> -> vector<8x128xf32>
    %66 = arith.addf %61, %65 : vector<8x128xf32>
    %67 = vector.extract_strided_slice %27 {offsets = [64, 0], sizes = [8, 128], strides = [1, 1]} : vector<144x128xf32> to vector<8x128xf32>
    %c8 = arith.constant 8 : index
    %c0_42 = arith.constant 0 : index
    %c0_43 = arith.constant 0 : index
    %68 = vector.load %arg6[%c8, %c0_42, %c0_43] : memref<18x128x128xf32, #tpu.memory_space<vmem>>, vector<1x128x128xf32>
    %69 = vector.shape_cast %68 : vector<1x128x128xf32> to vector<128x128xf32>
    %cst_44 = arith.constant dense<0.000000e+00> : vector<8x128xf32>
    %70 = tpu.matmul %67, %69, %cst_44 {dimension_numbers = #tpu.dot_dimension_numbers<[1], [0], [0], [1], [0, 0, 1, 1], [], []>} : vector<8x128xf32>, vector<128x128xf32>, vector<8x128xf32> -> vector<8x128xf32>
    %71 = arith.addf %66, %70 : vector<8x128xf32>
    %72 = vector.extract_strided_slice %27 {offsets = [72, 0], sizes = [8, 128], strides = [1, 1]} : vector<144x128xf32> to vector<8x128xf32>
    %c9 = arith.constant 9 : index
    %c0_45 = arith.constant 0 : index
    %c0_46 = arith.constant 0 : index
    %73 = vector.load %arg6[%c9, %c0_45, %c0_46] : memref<18x128x128xf32, #tpu.memory_space<vmem>>, vector<1x128x128xf32>
    %74 = vector.shape_cast %73 : vector<1x128x128xf32> to vector<128x128xf32>
    %cst_47 = arith.constant dense<0.000000e+00> : vector<8x128xf32>
    %75 = tpu.matmul %72, %74, %cst_47 {dimension_numbers = #tpu.dot_dimension_numbers<[1], [0], [0], [1], [0, 0, 1, 1], [], []>} : vector<8x128xf32>, vector<128x128xf32>, vector<8x128xf32> -> vector<8x128xf32>
    %76 = arith.addf %71, %75 : vector<8x128xf32>
    %77 = vector.extract_strided_slice %27 {offsets = [80, 0], sizes = [8, 128], strides = [1, 1]} : vector<144x128xf32> to vector<8x128xf32>
    %c10 = arith.constant 10 : index
    %c0_48 = arith.constant 0 : index
    %c0_49 = arith.constant 0 : index
    %78 = vector.load %arg6[%c10, %c0_48, %c0_49] : memref<18x128x128xf32, #tpu.memory_space<vmem>>, vector<1x128x128xf32>
    %79 = vector.shape_cast %78 : vector<1x128x128xf32> to vector<128x128xf32>
    %cst_50 = arith.constant dense<0.000000e+00> : vector<8x128xf32>
    %80 = tpu.matmul %77, %79, %cst_50 {dimension_numbers = #tpu.dot_dimension_numbers<[1], [0], [0], [1], [0, 0, 1, 1], [], []>} : vector<8x128xf32>, vector<128x128xf32>, vector<8x128xf32> -> vector<8x128xf32>
    %81 = arith.addf %76, %80 : vector<8x128xf32>
    %82 = vector.extract_strided_slice %27 {offsets = [88, 0], sizes = [8, 128], strides = [1, 1]} : vector<144x128xf32> to vector<8x128xf32>
    %c11 = arith.constant 11 : index
    %c0_51 = arith.constant 0 : index
    %c0_52 = arith.constant 0 : index
    %83 = vector.load %arg6[%c11, %c0_51, %c0_52] : memref<18x128x128xf32, #tpu.memory_space<vmem>>, vector<1x128x128xf32>
    %84 = vector.shape_cast %83 : vector<1x128x128xf32> to vector<128x128xf32>
    %cst_53 = arith.constant dense<0.000000e+00> : vector<8x128xf32>
    %85 = tpu.matmul %82, %84, %cst_53 {dimension_numbers = #tpu.dot_dimension_numbers<[1], [0], [0], [1], [0, 0, 1, 1], [], []>} : vector<8x128xf32>, vector<128x128xf32>, vector<8x128xf32> -> vector<8x128xf32>
    %86 = arith.addf %81, %85 : vector<8x128xf32>
    %87 = vector.extract_strided_slice %27 {offsets = [96, 0], sizes = [8, 128], strides = [1, 1]} : vector<144x128xf32> to vector<8x128xf32>
    %c12 = arith.constant 12 : index
    %c0_54 = arith.constant 0 : index
    %c0_55 = arith.constant 0 : index
    %88 = vector.load %arg6[%c12, %c0_54, %c0_55] : memref<18x128x128xf32, #tpu.memory_space<vmem>>, vector<1x128x128xf32>
    %89 = vector.shape_cast %88 : vector<1x128x128xf32> to vector<128x128xf32>
    %cst_56 = arith.constant dense<0.000000e+00> : vector<8x128xf32>
    %90 = tpu.matmul %87, %89, %cst_56 {dimension_numbers = #tpu.dot_dimension_numbers<[1], [0], [0], [1], [0, 0, 1, 1], [], []>} : vector<8x128xf32>, vector<128x128xf32>, vector<8x128xf32> -> vector<8x128xf32>
    %91 = arith.addf %86, %90 : vector<8x128xf32>
    %92 = vector.extract_strided_slice %27 {offsets = [104, 0], sizes = [8, 128], strides = [1, 1]} : vector<144x128xf32> to vector<8x128xf32>
    %c13 = arith.constant 13 : index
    %c0_57 = arith.constant 0 : index
    %c0_58 = arith.constant 0 : index
    %93 = vector.load %arg6[%c13, %c0_57, %c0_58] : memref<18x128x128xf32, #tpu.memory_space<vmem>>, vector<1x128x128xf32>
    %94 = vector.shape_cast %93 : vector<1x128x128xf32> to vector<128x128xf32>
    %cst_59 = arith.constant dense<0.000000e+00> : vector<8x128xf32>
    %95 = tpu.matmul %92, %94, %cst_59 {dimension_numbers = #tpu.dot_dimension_numbers<[1], [0], [0], [1], [0, 0, 1, 1], [], []>} : vector<8x128xf32>, vector<128x128xf32>, vector<8x128xf32> -> vector<8x128xf32>
    %96 = arith.addf %91, %95 : vector<8x128xf32>
    %97 = vector.extract_strided_slice %27 {offsets = [112, 0], sizes = [8, 128], strides = [1, 1]} : vector<144x128xf32> to vector<8x128xf32>
    %c14 = arith.constant 14 : index
    %c0_60 = arith.constant 0 : index
    %c0_61 = arith.constant 0 : index
    %98 = vector.load %arg6[%c14, %c0_60, %c0_61] : memref<18x128x128xf32, #tpu.memory_space<vmem>>, vector<1x128x128xf32>
    %99 = vector.shape_cast %98 : vector<1x128x128xf32> to vector<128x128xf32>
    %cst_62 = arith.constant dense<0.000000e+00> : vector<8x128xf32>
    %100 = tpu.matmul %97, %99, %cst_62 {dimension_numbers = #tpu.dot_dimension_numbers<[1], [0], [0], [1], [0, 0, 1, 1], [], []>} : vector<8x128xf32>, vector<128x128xf32>, vector<8x128xf32> -> vector<8x128xf32>
    %101 = arith.addf %96, %100 : vector<8x128xf32>
    %102 = vector.extract_strided_slice %27 {offsets = [120, 0], sizes = [8, 128], strides = [1, 1]} : vector<144x128xf32> to vector<8x128xf32>
    %c15 = arith.constant 15 : index
    %c0_63 = arith.constant 0 : index
    %c0_64 = arith.constant 0 : index
    %103 = vector.load %arg6[%c15, %c0_63, %c0_64] : memref<18x128x128xf32, #tpu.memory_space<vmem>>, vector<1x128x128xf32>
    %104 = vector.shape_cast %103 : vector<1x128x128xf32> to vector<128x128xf32>
    %cst_65 = arith.constant dense<0.000000e+00> : vector<8x128xf32>
    %105 = tpu.matmul %102, %104, %cst_65 {dimension_numbers = #tpu.dot_dimension_numbers<[1], [0], [0], [1], [0, 0, 1, 1], [], []>} : vector<8x128xf32>, vector<128x128xf32>, vector<8x128xf32> -> vector<8x128xf32>
    %106 = arith.addf %101, %105 : vector<8x128xf32>
    %107 = vector.extract_strided_slice %27 {offsets = [128, 0], sizes = [8, 128], strides = [1, 1]} : vector<144x128xf32> to vector<8x128xf32>
    %c16 = arith.constant 16 : index
    %c0_66 = arith.constant 0 : index
    %c0_67 = arith.constant 0 : index
    %108 = vector.load %arg6[%c16, %c0_66, %c0_67] : memref<18x128x128xf32, #tpu.memory_space<vmem>>, vector<1x128x128xf32>
    %109 = vector.shape_cast %108 : vector<1x128x128xf32> to vector<128x128xf32>
    %cst_68 = arith.constant dense<0.000000e+00> : vector<8x128xf32>
    %110 = tpu.matmul %107, %109, %cst_68 {dimension_numbers = #tpu.dot_dimension_numbers<[1], [0], [0], [1], [0, 0, 1, 1], [], []>} : vector<8x128xf32>, vector<128x128xf32>, vector<8x128xf32> -> vector<8x128xf32>
    %111 = arith.addf %106, %110 : vector<8x128xf32>
    %112 = vector.extract_strided_slice %27 {offsets = [136, 0], sizes = [8, 128], strides = [1, 1]} : vector<144x128xf32> to vector<8x128xf32>
    %c17 = arith.constant 17 : index
    %c0_69 = arith.constant 0 : index
    %c0_70 = arith.constant 0 : index
    %113 = vector.load %arg6[%c17, %c0_69, %c0_70] : memref<18x128x128xf32, #tpu.memory_space<vmem>>, vector<1x128x128xf32>
    %114 = vector.shape_cast %113 : vector<1x128x128xf32> to vector<128x128xf32>
    %cst_71 = arith.constant dense<0.000000e+00> : vector<8x128xf32>
    %115 = tpu.matmul %112, %114, %cst_71 {dimension_numbers = #tpu.dot_dimension_numbers<[1], [0], [0], [1], [0, 0, 1, 1], [], []>} : vector<8x128xf32>, vector<128x128xf32>, vector<8x128xf32> -> vector<8x128xf32>
    %116 = arith.addf %111, %115 : vector<8x128xf32>
    %c0_72 = arith.constant 0 : index
    %c0_73 = arith.constant 0 : index
    %117 = vector.load %arg7[%c0_72, %c0_73] : memref<1x128xf32, #tpu.memory_space<vmem>>, vector<1x128xf32>
    %118 = vector.broadcast %117 : vector<1x128xf32> to vector<8x128xf32>
    %119 = arith.addf %116, %118 : vector<8x128xf32>
    %cst_74 = arith.constant 0.000000e+00 : f32
    %120 = vector.broadcast %cst_74 : f32 to vector<8x128xf32>
    %121 = arith.cmpf ogt, %119, %120 : vector<8x128xf32>
    %cst_75 = arith.constant 0.000000e+00 : f32
    %122 = vector.broadcast %cst_75 : f32 to vector<8x128xf32>
    %123 = arith.minimumf %119, %122 : vector<8x128xf32>
    %124 = math.exp %123 : vector<8x128xf32>
    %cst_76 = arith.constant 1.000000e+00 : f32
    %125 = vector.broadcast %cst_76 : f32 to vector<8x128xf32>
    %126 = arith.subf %124, %125 : vector<8x128xf32>
    %127 = arith.select %121, %119, %126 : vector<8x128xi1>, vector<8x128xf32>
    %c0_77 = arith.constant 0 : index
    %c0_78 = arith.constant 0 : index
    %128 = vector.load %arg8[%c0_77, %c0_78] : memref<128x128xf32, #tpu.memory_space<vmem>>, vector<128x128xf32>
    %cst_79 = arith.constant dense<0.000000e+00> : vector<8x128xf32>
    %129 = tpu.matmul %127, %128, %cst_79 {dimension_numbers = #tpu.dot_dimension_numbers<[1], [0], [0], [1], [0, 0, 1, 1], [], []>} : vector<8x128xf32>, vector<128x128xf32>, vector<8x128xf32> -> vector<8x128xf32>
    %c0_80 = arith.constant 0 : index
    %c0_81 = arith.constant 0 : index
    %130 = vector.load %arg9[%c0_80, %c0_81] : memref<1x128xf32, #tpu.memory_space<vmem>>, vector<1x128xf32>
    %131 = vector.broadcast %130 : vector<1x128xf32> to vector<8x128xf32>
    %132 = arith.addf %129, %131 : vector<8x128xf32>
    %cst_82 = arith.constant 0.000000e+00 : f32
    %133 = vector.broadcast %cst_82 : f32 to vector<8x128xf32>
    %134 = arith.cmpf ogt, %132, %133 : vector<8x128xf32>
    %cst_83 = arith.constant 0.000000e+00 : f32
    %135 = vector.broadcast %cst_83 : f32 to vector<8x128xf32>
    %136 = arith.minimumf %132, %135 : vector<8x128xf32>
    %137 = math.exp %136 : vector<8x128xf32>
    %cst_84 = arith.constant 1.000000e+00 : f32
    %138 = vector.broadcast %cst_84 : f32 to vector<8x128xf32>
    %139 = arith.subf %137, %138 : vector<8x128xf32>
    %140 = arith.select %134, %132, %139 : vector<8x128xi1>, vector<8x128xf32>
    %c0_85 = arith.constant 0 : index
    %c0_86 = arith.constant 0 : index
    %141 = vector.load %arg10[%c0_85, %c0_86] : memref<8x128xf32, #tpu.memory_space<vmem>>, vector<8x128xf32>
    tpu.vector_store %arg10[%c0_85, %c0_86], %140 {strides = array<i32>} : memref<8x128xf32, #tpu.memory_space<vmem>>, vector<8x128xf32>,
    return
  }
  func.func @transform_0(%arg0: i32) -> (i32, i32, i32) {
    %c0_i32 = arith.constant 0 : i32
    %c0_i32_0 = arith.constant 0 : i32
    %c0_i32_1 = arith.constant 0 : i32
    return %arg0, %c0_i32, %c0_i32_0 : i32, i32, i32
  }
  func.func @transform_1(%arg0: i32) -> (i32, i32) {
    %c0_i32 = arith.constant 0 : i32
    %c0_i32_0 = arith.constant 0 : i32
    %c0_i32_1 = arith.constant 0 : i32
    return %c0_i32, %c0_i32_0 : i32, i32
  }
  func.func @transform_2(%arg0: i32) -> (i32, i32) {
    %c0_i32 = arith.constant 0 : i32
    %c0_i32_0 = arith.constant 0 : i32
    %c0_i32_1 = arith.constant 0 : i32
    return %c0_i32, %c0_i32_0 : i32, i32
  }
  func.func @transform_3(%arg0: i32) -> (i32, i32) {
    %c0_i32 = arith.constant 0 : i32
    %c0_i32_0 = arith.constant 0 : i32
    %c0_i32_1 = arith.constant 0 : i32
    return %c0_i32, %c0_i32_0 : i32, i32
  }
  func.func @transform_4(%arg0: i32) -> (i32, i32) {
    %c0_i32 = arith.constant 0 : i32
    %c0_i32_0 = arith.constant 0 : i32
    %c0_i32_1 = arith.constant 0 : i32
    return %c0_i32, %c0_i32_0 : i32, i32
  }
  func.func @transform_5(%arg0: i32) -> (i32, i32, i32) {
    %c0_i32 = arith.constant 0 : i32
    %c0_i32_0 = arith.constant 0 : i32
    %c0_i32_1 = arith.constant 0 : i32
    %c0_i32_2 = arith.constant 0 : i32
    return %c0_i32, %c0_i32_0, %c0_i32_1 : i32, i32, i32
  }
  func.func @transform_6(%arg0: i32) -> (i32, i32) {
    %c0_i32 = arith.constant 0 : i32
    %c0_i32_0 = arith.constant 0 : i32
    %c0_i32_1 = arith.constant 0 : i32
    return %c0_i32, %c0_i32_0 : i32, i32
  }
  func.func @transform_7(%arg0: i32) -> (i32, i32) {
    %c0_i32 = arith.constant 0 : i32
    %c0_i32_0 = arith.constant 0 : i32
    %c0_i32_1 = arith.constant 0 : i32
    return %c0_i32, %c0_i32_0 : i32, i32
  }
  func.func @transform_8(%arg0: i32) -> (i32, i32) {
    %c0_i32 = arith.constant 0 : i32
    %c0_i32_0 = arith.constant 0 : i32
    %c0_i32_1 = arith.constant 0 : i32
    return %c0_i32, %c0_i32_0 : i32, i32
  }
  func.func @transform_9(%arg0: i32) -> (i32, i32) {
    %c0_i32 = arith.constant 0 : i32
    %c0_i32_0 = arith.constant 0 : i32
    return %arg0, %c0_i32 : i32, i32
  }
}

</mosaic_0001>

<bundles_post_ra>
// kernel: bottom_lines_encoder.1
= control target key start
LH: loop header
LB: loop body
LE: loop exit
PB: predicated region body
PF: predicated region fallthrough
CT: control target
= control target key end

     0   :  { %v3918_v3 = vmov 0.0   ;;  %s5912_s1 = inlined_call_operand.vmem [shape: f32[128,256], index: 1, kind: input, shape index: {}]   ;;  %s5913_s3 = inlined_call_operand.vmem [shape: f32[256,128], index: 3, kind: input, shape index: {}]   ;;  %s5914_s0 = inlined_call_operand.vmem [shape: f32[1,144,128], index: 0, kind: input, shape index: {}]   ;;  %s5915_s5 = inlined_call_operand.vmem [shape: f32[18,128,128], index: 5, kind: input, shape index: {}]   ;;  %s5916_s2 = inlined_call_operand.vmem [shape: f32[1,256], index: 2, kind: input, shape index: {}]   ;;  %s5917_s4 = inlined_call_operand.vmem [shape: f32[1,128], index: 4, kind: input, shape index: {}]   ;;  %s5918_s7 = inlined_call_operand.vmem [shape: f32[128,128], index: 7, kind: input, shape index: {}]   ;;  %s5919_s6 = inlined_call_operand.vmem [shape: f32[1,128], index: 6, kind: input, shape index: {}]   ;;  %s5920_s8 = inlined_call_operand.vmem [shape: f32[1,128], index: 8, kind: input, shape index: {}]   ;;  %s5921_s9 = inlined_call_operand.vmem [shape: f32[8,128], index: 9, kind: output, shape index: {}]  }
   0x1   :  { %v81_v0 = vld [vmem:[%s5912_s1 + $0xf8] sm:$0xff]  ;;  %v80_v1 = vld [vmem:[%s5912_s1 + $0xf0] sm:$0xff]  ;;  %v79_v2 = vld [vmem:[%s5912_s1 + $0xe8] sm:$0xff]  ;;  %158 = vmatprep.mubr.f32.mxu0 %v3918_v3  ;;  %522 = vmatprep.subr.mxu1 %v3918_v3 }
   0x2   :  { %94 = vmatprep.subr.mxu0 %v81_v0  ;;  %v78_v4 = vld [vmem:[%s5912_s1 + $0xe0] sm:$0xff]  ;;  %v77_v5 = vld [vmem:[%s5912_s1 + $0xd8] sm:$0xff]  ;;  %v76_v6 = vld [vmem:[%s5912_s1 + $0xd0] sm:$0xff] }
   0x3   :  { %95 = vmatpush1.msra.mxu0 %v80_v1  ;;  %v75_v7 = vld [vmem:[%s5912_s1 + $0xc8] sm:$0xff]  ;;  %v74_v8 = vld [vmem:[%s5912_s1 + $0xc0] sm:$0xff]  ;;  %v73_v9 = vld [vmem:[%s5912_s1 + $0xb8] sm:$0xff] }
   0x4   :  { %96 = vmatprep.subr.mxu0 %v79_v2  ;;  %v72_v10 = vld [vmem:[%s5912_s1 + $0xb0] sm:$0xff]  ;;  %v71_v11 = vld [vmem:[%s5912_s1 + $0xa8] sm:$0xff]  ;;  %v70_v12 = vld [vmem:[%s5912_s1 + $0xa0] sm:$0xff] }
   0x5   :  { %97 = vmatpush1.msra.mxu0 %v78_v4  ;;  %v69_v13 = vld [vmem:[%s5912_s1 + $0x98] sm:$0xff]  ;;  %v68_v14 = vld [vmem:[%s5912_s1 + $0x90] sm:$0xff]  ;;  %v67_v15 = vld [vmem:[%s5912_s1 + $0x88] sm:$0xff] }
   0x6   :  { %98 = vmatprep.subr.mxu0 %v77_v5  ;;  %v66_v16 = vld [vmem:[%s5912_s1 + $0x80] sm:$0xff]  ;;  %v65_v17 = vld [vmem:[%s5912_s1 + $0x78] sm:$0xff]  ;;  %v64_v19 = vld [vmem:[%s5912_s1 + $0x70] sm:$0xff] }
   0x7   :  { %99 = vmatpush1.msra.mxu0 %v76_v6  ;;  %v498_v18 = vld [vmem:[%s5913_s3 + $0x78] sm:$0xff]  ;;  %v497_v20 = vld [vmem:[%s5913_s3 + $0x70] sm:$0xff]  ;;  %v63_v21 = vld [vmem:[%s5912_s1 + $0x68] sm:$0xff] }
   0x8   :  { %100 = vmatprep.subr.mxu0 %v75_v7  ;;  %523 = vmatpush1.msra.mxu1 %v498_v18  ;;  %v496_v22 = vld [vmem:[%s5913_s3 + $0x68] sm:$0xff]  ;;  %v62_v23 = vld [vmem:[%s5912_s1 + $0x60] sm:$0xff]  ;;  %v61_v24 = vld [vmem:[%s5912_s1 + $0x58] sm:$0xff] }
   0x9   :  { %101 = vmatpush1.msra.mxu0 %v74_v8  ;;  %524 = vmatprep.subr.mxu1 %v3918_v3  ;;  %v495_v25 = vld [vmem:[%s5913_s3 + $0x60] sm:$0xff]  ;;  %v60_v26 = vld [vmem:[%s5912_s1 + $0x50] sm:$0xff]  ;;  %v59_v27 = vld [vmem:[%s5912_s1 + $0x48] sm:$0xff] }
   0xa   :  { %102 = vmatprep.subr.mxu0 %v73_v9  ;;  %525 = vmatpush1.msra.mxu1 %v497_v20  ;;  %v494_v28 = vld [vmem:[%s5913_s3 + $0x58] sm:$0xff]  ;;  %v58_v29 = vld [vmem:[%s5912_s1 + $0x40] sm:$0xff]  ;;  %v493_v31 = vld [vmem:[%s5913_s3 + $0x50] sm:$0xff] }
   0xb   :  { %103 = vmatpush1.msra.mxu0 %v72_v10  ;;  %526 = vmatprep.subr.mxu1 %v3918_v3  ;;  %v57_v30 = vld [vmem:[%s5912_s1 + $0x38] sm:$0xff]  ;;  %v56_v32 = vld [vmem:[%s5912_s1 + $0x30] sm:$0xff]  ;;  %v55_v33 = vld [vmem:[%s5912_s1 + $0x28] sm:$0xff] }
   0xc   :  { %104 = vmatprep.subr.mxu0 %v71_v11  ;;  %527 = vmatpush1.msra.mxu1 %v496_v22  ;;  %v492_v34 = vld [vmem:[%s5913_s3 + $0x48] sm:$0xff]  ;;  %v54_v35 = vld [vmem:[%s5912_s1 + $0x20] sm:$0xff]  ;;  %v53_v36 = vld [vmem:[%s5912_s1 + $0x18] sm:$0xff] }
   0xd   :  { %105 = vmatpush1.msra.mxu0 %v70_v12  ;;  %528 = vmatprep.subr.mxu1 %v3918_v3  ;;  %v491_v37 = vld [vmem:[%s5913_s3 + $0x40] sm:$0xff]  ;;  %v52_v38 = vld [vmem:[%s5912_s1 + $0x10] sm:$0xff]  ;;  %v51_v39 = vld [vmem:[%s5912_s1 + $0x8] sm:$0xff] }
   0xe   :  { %106 = vmatprep.subr.mxu0 %v69_v13  ;;  %529 = vmatpush1.msra.mxu1 %v495_v25  ;;  %v490_v40 = vld [vmem:[%s5913_s3 + $0x38] sm:$0xff]  ;;  %v50_v41 = vld [vmem:[%s5912_s1] sm:$0xff]  ;;  %v489_v43 = vld [vmem:[%s5913_s3 + $0x30] sm:$0xff] }
   0xf   :  { %107 = vmatpush1.msra.mxu0 %v68_v14  ;;  %530 = vmatprep.subr.mxu1 %v3918_v3  ;;  %v32_v42 = vld [vmem:[%s5914_s0] sm:$0xff]  ;;  %v488_v44 = vld [vmem:[%s5913_s3 + $0x28] sm:$0xff]  ;;  %v486_v47 = vld [vmem:[%s5913_s3 + $0x18] sm:$0xff] }
  0x10   :  { %108 = vmatprep.subr.mxu0 %v67_v15  ;;  %531 = vmatpush1.msra.mxu1 %v494_v28  ;;  %v33_v45 = vld [vmem:[%s5914_s0 + $0x8] sm:$0xff]  ;;  %v487_v46 = vld [vmem:[%s5913_s3 + $0x20] sm:$0xff]  ;;  %v34_v48 = vld [vmem:[%s5914_s0 + $0x10] sm:$0xff] }
  0x11   :  { %109 = vmatpush1.msra.mxu0 %v66_v16  ;;  %532 = vmatprep.subr.mxu1 %v3918_v3  ;;  %v485_v49 = vld [vmem:[%s5913_s3 + $0x10] sm:$0xff]  ;;  %v484_v50 = vld [vmem:[%s5913_s3 + $0x8] sm:$0xff]  ;;  %v35_v51 = vld [vmem:[%s5914_s0 + $0x18] sm:$0xff] }
  0x12   :  { %110 = vmatprep.subr.mxu0 %v65_v17  ;;  %533 = vmatpush1.msra.mxu1 %v493_v31  ;;  %v483_v52 = vld [vmem:[%s5913_s3] sm:$0xff]  ;;  %v514_v53 = vld [vmem:[%s5913_s3 + $0xf8] sm:$0xff]  ;;  %v513_v55 = vld [vmem:[%s5913_s3 + $0xf0] sm:$0xff] }
  0x13   :  { %111 = vmatpush1.msra.mxu0 %v64_v19  ;;  %534 = vmatprep.subr.mxu1 %v3918_v3  ;;  %v36_v54 = vld [vmem:[%s5914_s0 + $0x20] sm:$0xff]  ;;  %v37_v56 = vld [vmem:[%s5914_s0 + $0x28] sm:$0xff]  ;;  %v38_v57 = vld [vmem:[%s5914_s0 + $0x30] sm:$0xff] }
  0x14   :  { %112 = vmatprep.subr.mxu0 %v63_v21  ;;  %535 = vmatpush1.msra.mxu1 %v492_v34  ;;  %v39_v58 = vld [vmem:[%s5914_s0 + $0x38] sm:$0xff]  ;;  %v40_v59 = vld [vmem:[%s5914_s0 + $0x40] sm:$0xff]  ;;  %v41_v60 = vld [vmem:[%s5914_s0 + $0x48] sm:$0xff] }
  0x15   :  { %113 = vmatpush1.msra.mxu0 %v62_v23  ;;  %536 = vmatprep.subr.mxu1 %v3918_v3  ;;  %v42_v61 = vld [vmem:[%s5914_s0 + $0x50] sm:$0xff]  ;;  %v43_v62 = vld [vmem:[%s5914_s0 + $0x58] sm:$0xff]  ;;  %v44_v63 = vld [vmem:[%s5914_s0 + $0x60] sm:$0xff] }
  0x16   :  { %114 = vmatprep.subr.mxu0 %v61_v24  ;;  %537 = vmatpush1.msra.mxu1 %v491_v37  ;;  %v45_v0 = vld [vmem:[%s5914_s0 + $0x68] sm:$0xff]  ;;  %v511_v2 = vld [vmem:[%s5913_s3 + $0xe0] sm:$0xff]  ;;  %v510_v4 = vld [vmem:[%s5913_s3 + $0xd8] sm:$0xff] }
  0x17   :  { %115 = vmatpush1.msra.mxu0 %v60_v26  ;;  %538 = vmatprep.subr.mxu1 %v3918_v3  ;;  %v512_v1 = vld [vmem:[%s5913_s3 + $0xe8] sm:$0xff]  ;;  %v509_v5 = vld [vmem:[%s5913_s3 + $0xd0] sm:$0xff]  ;;  %v507_v8 = vld [vmem:[%s5913_s3 + $0xc0] sm:$0xff] }
  0x18   :  { %116 = vmatprep.subr.mxu0 %v59_v27  ;;  %539 = vmatpush1.msra.mxu1 %v490_v40  ;;  %v46_v6 = vld [vmem:[%s5914_s0 + $0x70] sm:$0xff]  ;;  %v508_v7 = vld [vmem:[%s5913_s3 + $0xc8] sm:$0xff]  ;;  %v506_v9 = vld [vmem:[%s5913_s3 + $0xb8] sm:$0xff] }
  0x19   :  { %117 = vmatpush1.msra.mxu0 %v58_v29  ;;  %540 = vmatprep.subr.mxu1 %v3918_v3  ;;  %v505_v10 = vld [vmem:[%s5913_s3 + $0xb0] sm:$0xff]  ;;  %v504_v11 = vld [vmem:[%s5913_s3 + $0xa8] sm:$0xff]  ;;  %v503_v12 = vld [vmem:[%s5913_s3 + $0xa0] sm:$0xff] }
  0x1a   :  { %118 = vmatprep.subr.mxu0 %v57_v30  ;;  %541 = vmatpush1.msra.mxu1 %v489_v43  ;;  %v47_v13 = vld [vmem:[%s5914_s0 + $0x78] sm:$0xff]  ;;  %v501_v15 = vld [vmem:[%s5913_s3 + $0x90] sm:$0xff]  ;;  %v48_v16 = vld [vmem:[%s5914_s0 + $0x80] sm:$0xff]  ;;  %v84_v30 = vlaneseq }
  0x1b   :  { %119 = vmatpush1.msra.mxu0 %v56_v32  ;;  %542 = vmatprep.subr.mxu1 %v3918_v3  ;;  %v502_v14 = vld [vmem:[%s5913_s3 + $0x98] sm:$0xff]  ;;  %v500_v17 = vld [vmem:[%s5913_s3 + $0x88] sm:$0xff]  ;;  %v499_v18 = vld [vmem:[%s5913_s3 + $0x80] sm:$0xff] }
  0x1c   :  { %120 = vmatprep.subr.mxu0 %v55_v33  ;;  %543 = vmatpush1.msra.mxu1 %v488_v44  ;;  %v49_v19 = vld [vmem:[%s5914_s0 + $0x88] sm:$0xff]  ;;  %v2554_v20 = vld [vmem:[%s5915_s5 + $0xf8] sm:$0xff]  ;;  %v2553_v21 = vld [vmem:[%s5915_s5 + $0xf0] sm:$0xff]  ;;  %v85_v31 = vshrl.u32 %v84_v30, 7 }
  0x1d   :  { %121 = vmatpush1.msra.mxu0 %v54_v35  ;;  %544 = vmatprep.subr.mxu1 %v3918_v3  ;;  %v2552_v22 = vld [vmem:[%s5915_s5 + $0xe8] sm:$0xff]  ;;  %v2551_v23 = vld [vmem:[%s5915_s5 + $0xe0] sm:$0xff]  ;;  %v2550_v24 = vld [vmem:[%s5915_s5 + $0xd8] sm:$0xff] }
  0x1e   :  { %122 = vmatprep.subr.mxu0 %v53_v36  ;;  %545 = vmatpush1.msra.mxu1 %v487_v46  ;;  %v2549_v25 = vld [vmem:[%s5915_s5 + $0xd0] sm:$0xff]  ;;  %v2548_v26 = vld [vmem:[%s5915_s5 + $0xc8] sm:$0xff]  ;;  %v2547_v27 = vld [vmem:[%s5915_s5 + $0xc0] sm:$0xff]  ;;  %v86_v32 = vsub.s32 0, %v85_v31  ;;  %v90_v34 = vsub.s32 1, %v85_v31 }
  0x1f   :  { %123 = vmatpush1.msra.mxu0 %v52_v38  ;;  %546 = vmatprep.subr.mxu1 %v3918_v3  ;;  %v2546_v28 = vld [vmem:[%s5915_s5 + $0xb8] sm:$0xff]  ;;  %v2545_v29 = vld [vmem:[%s5915_s5 + $0xb0] sm:$0xff]  ;;  %v82_v33 = vld [vmem:[%s5916_s2] sm:$0x3] }
  0x20   :  { %124 = vmatprep.subr.mxu0 %v51_v39  ;;  %547 = vmatpush1.msra.mxu1 %v486_v47  ;;  %v4311_v35 = vrot.slane %v82_v33, %v86_v32  ;;  %v4313_v36 = vrot.slane %v82_v33, %v90_v34 }
  0x21   :  { %125 = vmatpush1.msra.mxu0 %v50_v41  ;;  %548 = vmatprep.subr.mxu1 %v3918_v3 }
  0x22   :  { %159 = vmatmul.mubr.f32.vlgmr.msra.gmra.mxu0 %v32_v42  ;;  %3138 = vmatprep.subr.mxu0 %v3918_v3 }
  0x23   :  { %164 = vmatprep.mubr.f32.mxu0 %v3918_v3  ;;  %549 = vmatpush1.msra.mxu1 %v485_v49 }
  0x24   :  { %550 = vmatprep.subr.mxu1 %v3918_v3  ;;  %3139 = vmatpush3.msra.mxu0 %v2554_v20 }
  0x25   :  { %551 = vmatpush1.msra.mxu1 %v484_v50  ;;  %3140 = vmatprep.subr.mxu0 %v3918_v3 }
  0x26   :  { %165 = vmatmul.mubr.f32.gmra.mxu0 %v33_v45  ;;  %552 = vmatprep.subr.mxu1 %v3918_v3 }
  0x27   :  { %170 = vmatprep.mubr.f32.mxu0 %v3918_v3  ;;  %553 = vmatpush1.msra.mxu1 %v483_v52 }
  0x28   :  { %554 = vmatprep.subr.mxu1 %v3918_v3  ;;  %3141 = vmatpush3.msra.mxu0 %v2553_v21 }
  0x29   :  { %555 = vmatpush2.msra.mxu1 %v514_v53  ;;  %3142 = vmatprep.subr.mxu0 %v3918_v3 }
  0x2a   :  { %171 = vmatmul.mubr.f32.gmra.mxu0 %v34_v48  ;;  %556 = vmatprep.subr.mxu1 %v3918_v3 }
  0x2b   :  { %176 = vmatprep.mubr.f32.mxu0 %v3918_v3  ;;  %557 = vmatpush2.msra.mxu1 %v513_v55 }
  0x2c   :  { %558 = vmatprep.subr.mxu1 %v3918_v3  ;;  %3143 = vmatpush3.msra.mxu0 %v2552_v22 }
  0x2d   :  { %559 = vmatpush2.msra.mxu1 %v512_v1  ;;  %3144 = vmatprep.subr.mxu0 %v3918_v3 }
  0x2e   :  { %177 = vmatmul.mubr.f32.gmra.mxu0 %v35_v51  ;;  %560 = vmatprep.subr.mxu1 %v3918_v3 }
  0x2f   :  { %182 = vmatprep.mubr.f32.mxu0 %v3918_v3  ;;  %561 = vmatpush2.msra.mxu1 %v511_v2 }
  0x30   :  { %562 = vmatprep.subr.mxu1 %v3918_v3  ;;  %3145 = vmatpush3.msra.mxu0 %v2551_v23 }
  0x31   :  { %563 = vmatpush2.msra.mxu1 %v510_v4  ;;  %3146 = vmatprep.subr.mxu0 %v3918_v3 }
  0x32   :  { %183 = vmatmul.mubr.f32.gmra.mxu0 %v36_v54  ;;  %564 = vmatprep.subr.mxu1 %v3918_v3 }
  0x33   :  { %188 = vmatprep.mubr.f32.mxu0 %v3918_v3  ;;  %565 = vmatpush2.msra.mxu1 %v509_v5 }
  0x34   :  { %566 = vmatprep.subr.mxu1 %v3918_v3  ;;  %3147 = vmatpush3.msra.mxu0 %v2550_v24 }
  0x35   :  { %567 = vmatpush2.msra.mxu1 %v508_v7  ;;  %3148 = vmatprep.subr.mxu0 %v3918_v3 }
  0x36   :  { %189 = vmatmul.mubr.f32.gmra.mxu0 %v37_v56  ;;  %568 = vmatprep.subr.mxu1 %v3918_v3 }
  0x37   :  { %194 = vmatprep.mubr.f32.mxu0 %v3918_v3  ;;  %569 = vmatpush2.msra.mxu1 %v507_v8 }
  0x38   :  { %570 = vmatprep.subr.mxu1 %v3918_v3  ;;  %3149 = vmatpush3.msra.mxu0 %v2549_v25 }
  0x39   :  { %571 = vmatpush2.msra.mxu1 %v506_v9  ;;  %3150 = vmatprep.subr.mxu0 %v3918_v3 }
  0x3a   :  { %195 = vmatmul.mubr.f32.gmra.mxu0 %v38_v57  ;;  %572 = vmatprep.subr.mxu1 %v3918_v3 }
  0x3b   :  { %200 = vmatprep.mubr.f32.mxu0 %v3918_v3  ;;  %573 = vmatpush2.msra.mxu1 %v505_v10 }
  0x3c   :  { %574 = vmatprep.subr.mxu1 %v3918_v3  ;;  %3151 = vmatpush3.msra.mxu0 %v2548_v26 }
  0x3d   :  { %575 = vmatpush2.msra.mxu1 %v504_v11  ;;  %3152 = vmatprep.subr.mxu0 %v3918_v3 }
  0x3e   :  { %201 = vmatmul.mubr.f32.gmra.mxu0 %v39_v58  ;;  %576 = vmatprep.subr.mxu1 %v3918_v3 }
  0x3f   :  { %206 = vmatprep.mubr.f32.mxu0 %v3918_v3  ;;  %577 = vmatpush2.msra.mxu1 %v503_v12 }
  0x40   :  { %578 = vmatprep.subr.mxu1 %v3918_v3  ;;  %3153 = vmatpush3.msra.mxu0 %v2547_v27 }
  0x41   :  { %579 = vmatpush2.msra.mxu1 %v502_v14  ;;  %3154 = vmatprep.subr.mxu0 %v3918_v3 }
  0x42   :  { %207 = vmatmul.mubr.f32.gmra.mxu0 %v40_v59  ;;  %580 = vmatprep.subr.mxu1 %v3918_v3 }
  0x43   :  { %212 = vmatprep.mubr.f32.mxu0 %v3918_v3  ;;  %581 = vmatpush2.msra.mxu1 %v501_v15 }
  0x44   :  { %582 = vmatprep.subr.mxu1 %v3918_v3  ;;  %3155 = vmatpush3.msra.mxu0 %v2546_v28 }
  0x45   :  { %583 = vmatpush2.msra.mxu1 %v500_v17  ;;  %3156 = vmatprep.subr.mxu0 %v3918_v3 }
  0x46   :  { %213 = vmatmul.mubr.f32.gmra.mxu0 %v41_v60  ;;  %584 = vmatprep.subr.mxu1 %v3918_v3 }
  0x47   :  { %218 = vmatprep.mubr.f32.mxu0 %v3918_v3  ;;  %585 = vmatpush2.msra.mxu1 %v499_v18 }
  0x48   :  { %3208 = vmatprep.subr.mxu1 %v3918_v3  ;;  %3157 = vmatpush3.msra.mxu0 %v2545_v29 }
  0x49   :  { %3158 = vmatprep.subr.mxu0 %v3918_v3 }
  0x4a   :  { %219 = vmatmul.mubr.f32.gmra.mxu0 %v42_v61 }
  0x4b   :  { %224 = vmatprep.mubr.f32.mxu0 %v3918_v3 }
  0x4e   :  { %225 = vmatmul.mubr.f32.gmra.mxu0 %v43_v62 }
  0x4f   :  { %230 = vmatprep.mubr.f32.mxu0 %v3918_v3 }
  0x52   :  { %231 = vmatmul.mubr.f32.gmra.mxu0 %v44_v63 }
  0x53   :  { %236 = vmatprep.mubr.f32.mxu0 %v3918_v3 }
  0x56   :  { %237 = vmatmul.mubr.f32.gmra.mxu0 %v45_v0 }
  0x57   :  { %242 = vmatprep.mubr.f32.mxu0 %v3918_v3 }
  0x5a   :  { %243 = vmatmul.mubr.f32.gmra.mxu0 %v46_v6 }
  0x5b   :  { %248 = vmatprep.mubr.f32.mxu0 %v3918_v3 }
  0x5e   :  { %249 = vmatmul.mubr.f32.gmra.mxu0 %v47_v13 }
  0x5f   :  { %254 = vmatprep.mubr.f32.mxu0 %v3918_v3 }
  0x62   :  { %255 = vmatmul.mubr.f32.gmra.mxu0 %v48_v16 }
  0x63   :  { %260 = vmatprep.mubr.f32.mxu0 %v3918_v3 }
  0x66   :  { %261 = vmatmul.mubr.f32.gmra.mxu0 %v49_v19 }
  0xe2   :  { %v160_v37 = vpop.f32.mrf.mxu0 }
  0xe3   :  { %v4316_v38 = vadd.f32 %v160_v37, %v4311_v35 }
  0xe4   :  { %v162_v39 = vpop.f32.mrf.mxu0 }
  0xe5   :  { %v303_v40 = vmin.f32 %v4316_v38, 0.0  ;;  %v163_v41 = vadd.f32 %v162_v39, %v4313_v36  ;;  %vm267_vm1 = vcmp.gt.f32.partialorder %v4316_v38, 0.0 }
  0xe6   :  { %v166_v42 = vpop.f32.mrf.mxu0 }
  0xe7   :  { %v339_v43 = vmul.f32 1.442695, %v303_v40  ;;  %v304_v44 = vmin.f32 %v163_v41, 0.0  ;;  %v4321_v45 = vadd.f32 %v166_v42, %v4311_v35  ;;  %vm268_vm0 = vcmp.gt.f32.partialorder %v163_v41, 0.0 }
  0xe8   :  { %v168_v46 = vpop.f32.mrf.mxu0 }
  0xe9   :  { %3805 = vpow2.f32 %v339_v43  ;;  %v341_v47 = vmul.f32 1.442695, %v304_v44  ;;  %v305_v48 = vmin.f32 %v4321_v45, 0.0  ;;  %v4325_v49 = vadd.f32 %v168_v46, %v4313_v36 }
  0xea   :  { %v172_v50 = vpop.f32.mrf.mxu0  ;;  %vm269_vm2 = vcmp.gt.f32.partialorder %v4321_v45, 0.0 }
  0xeb   :  { %3807 = vpow2.f32 %v341_v47  ;;  %v343_v51 = vmul.f32 1.442695, %v305_v48  ;;  %v306_v52 = vmin.f32 %v4325_v49, 0.0  ;;  %v4329_v53 = vadd.f32 %v172_v50, %v4311_v35 }
  0xec   :  { %v174_v54 = vpop.f32.mrf.mxu0  ;;  %vm270_vm3 = vcmp.gt.f32.partialorder %v4325_v49, 0.0 }
  0xed   :  { %3809 = vpow2.f32 %v343_v51  ;;  %v345_v55 = vmul.f32 1.442695, %v306_v52  ;;  %v307_v56 = vmin.f32 %v4329_v53, 0.0  ;;  %v4333_v57 = vadd.f32 %v174_v54, %v4313_v36 }
  0xee   :  { %v178_v58 = vpop.f32.mrf.mxu0  ;;  %vm271_vm4 = vcmp.gt.f32.partialorder %v4329_v53, 0.0 }
  0xef   :  { %3811 = vpow2.f32 %v345_v55  ;;  %v347_v59 = vmul.f32 1.442695, %v307_v56  ;;  %v308_v60 = vmin.f32 %v4333_v57, 0.0  ;;  %v4337_v61 = vadd.f32 %v178_v58, %v4311_v35 }
  0xf0   :  { %v180_v62 = vpop.f32.mrf.mxu0  ;;  %vm272_vm5 = vcmp.gt.f32.partialorder %v4333_v57, 0.0 }
  0xf1   :  { %3813 = vpow2.f32 %v347_v59  ;;  %v349_v63 = vmul.f32 1.442695, %v308_v60  ;;  %v309_v0 = vmin.f32 %v4337_v61, 0.0  ;;  %v4341_v1 = vadd.f32 %v180_v62, %v4313_v36 }
  0xf2   :  { %v184_v2 = vpop.f32.mrf.mxu0  ;;  %vm273_vm6 = vcmp.gt.f32.partialorder %v4337_v61, 0.0 }
  0xf3   :  { %3815 = vpow2.f32 %v349_v63  ;;  %v351_v4 = vmul.f32 1.442695, %v309_v0  ;;  %v310_v5 = vmin.f32 %v4341_v1, 0.0  ;;  %v4345_v6 = vadd.f32 %v184_v2, %v4311_v35 }
  0xf4   :  { %v186_v7 = vpop.f32.mrf.mxu0  ;;  %vm274_vm7 = vcmp.gt.f32.partialorder %v4341_v1, 0.0 }
  0xf5   :  { %3817 = vpow2.f32 %v351_v4  ;;  %v353_v8 = vmul.f32 1.442695, %v310_v5  ;;  %v311_v9 = vmin.f32 %v4345_v6, 0.0  ;;  %v4349_v10 = vadd.f32 %v186_v7, %v4313_v36 }
  0xf6   :  { %v3806_v11 = vpop.eup %3805  ;;  %v190_v12 = vpop.f32.mrf.mxu0  ;;  %vm275_vm8 = vcmp.gt.f32.partialorder %v4345_v6, 0.0 }
  0xf7   :  { %3819 = vpow2.f32 %v353_v8  ;;  %v355_v13 = vmul.f32 1.442695, %v311_v9  ;;  %v312_v14 = vmin.f32 %v4349_v10, 0.0  ;;  %v2484_v16 = vadd.f32 -1.0, %v3806_v11 }
  0xf8   :  { %v3808_v15 = vpop.eup %3807  ;;  %v4353_v17 = vadd.f32 %v190_v12, %v4311_v35  ;;  %v192_v18 = vpop.f32.mrf.mxu0  ;;  %vm276_vm9 = vcmp.gt.f32.partialorder %v4349_v10, 0.0 }
  0xf9   :  { %v2485_v19 = vadd.f32 -1.0, %v3808_v15  ;;  %3821 = vpow2.f32 %v355_v13  ;;  %v357_v20 = vmul.f32 1.442695, %v312_v14  ;;  %v4357_v23 = vadd.f32 %v192_v18, %v4313_v36 }
  0xfa   :  { %v3810_v21 = vpop.eup %3809  ;;  %v313_v22 = vmin.f32 %v4353_v17, 0.0  ;;  %v196_v24 = vpop.f32.mrf.mxu0  ;;  %v447_v28 = vsel %vm267_vm1, %v4316_v38, %v2484_v16  ;;  %vm277_vm10 = vcmp.gt.f32.partialorder %v4353_v17, 0.0 }
  0xfb   :  { %v448_v25 = vsel %vm268_vm0, %v163_v41, %v2485_v19  ;;  %3823 = vpow2.f32 %v357_v20  ;;  %v4361_v26 = vadd.f32 %v196_v24, %v4311_v35  ;;  %v2486_v29 = vadd.f32 -1.0, %v3810_v21 }
  0xfc   :  { %v3812_v27 = vpop.eup %3811  ;;  %586 = vmatprep.mubr.f32.mxu1 %v448_v25  ;;  %v359_v30 = vmul.f32 1.442695, %v313_v22  ;;  %v314_v31 = vmin.f32 %v4357_v23, 0.0  ;;  %v198_v32 = vpop.f32.mrf.mxu0  ;;  %vm278_vm11 = vcmp.gt.f32.partialorder %v4357_v23, 0.0 }
  0xfd   :  { %587 = vmatmul.mubr.f32.vlgmr.msra.gmra.mxu1 %v447_v28  ;;  %v2487_v33 = vadd.f32 -1.0, %v3812_v27  ;;  %v315_v34 = vmin.f32 %v4361_v26, 0.0  ;;  %v4368_v37 = vadd.f32 %v198_v32, %v4313_v36  ;;  %v449_v47 = vsel %vm269_vm2, %v4321_v45, %v2486_v29 }
  0xfe   :  { %v3814_v39 = vpop.eup %3813  ;;  %3825 = vpow2.f32 %v359_v30  ;;  %v361_v38 = vmul.f32 1.442695, %v314_v31  ;;  %v202_v40 = vpop.f32.mrf.mxu0  ;;  %vm279_vm13 = vcmp.gt.f32.partialorder %v4361_v26, 0.0 }
  0xff   :  { %v450_v41 = vsel %vm270_vm3, %v4325_v49, %v2487_v33  ;;  %v2488_v42 = vadd.f32 -1.0, %v3814_v39  ;;  %v363_v43 = vmul.f32 1.442695, %v315_v34  ;;  %v316_v44 = vmin.f32 %v4368_v37, 0.0 }
 0x100   :  { %v3816_v46 = vpop.eup %3815  ;;  %591 = vmatprep.mubr.f32.mxu1 %v450_v41  ;;  %3827 = vpow2.f32 %v361_v38  ;;  %v4377_v48 = vadd.f32 %v202_v40, %v4311_v35  ;;  %v204_v50 = vpop.f32.mrf.mxu0  ;;  %vm280_vm12 = vcmp.gt.f32.partialorder %v4368_v37, 0.0 }
 0x101   :  { %592 = vmatmul.mubr.f32.gmra.mxu1 %v449_v47  ;;  %v2489_v51 = vadd.f32 -1.0, %v3816_v46  ;;  %3829 = vpow2.f32 %v363_v43  ;;  %v365_v52 = vmul.f32 1.442695, %v316_v44  ;;  %v451_v54 = vsel %vm271_vm4, %v4329_v53, %v2488_v42 }
 0x102   :  { %v3818_v49 = vpop.eup %3817  ;;  %v317_v45 = vmin.f32 %v4377_v48, 0.0  ;;  %v4385_v55 = vadd.f32 %v204_v50, %v4313_v36  ;;  %v208_v56 = vpop.f32.mrf.mxu0  ;;  %vm281_vm14 = vcmp.gt.f32.partialorder %v4377_v48, 0.0 }
 0x103   :  { %v452_v58 = vsel %vm272_vm5, %v4333_v57, %v2489_v51  ;;  %v2490_v59 = vadd.f32 -1.0, %v3818_v49  ;;  %3831 = vpow2.f32 %v365_v52  ;;  %v4389_v60 = vadd.f32 %v208_v56, %v4311_v35 }
 0x104   :  { %v3820_v62 = vpop.eup %3819  ;;  %596 = vmatprep.mubr.f32.mxu1 %v452_v58  ;;  %v367_v53 = vmul.f32 1.442695, %v317_v45  ;;  %v318_v63 = vmin.f32 %v4385_v55, 0.0  ;;  %v210_v0 = vpop.f32.mrf.mxu0  ;;  %vm282_vm15 = vcmp.gt.f32.partialorder %v4385_v55, 0.0 }
 0x105   :  { %597 = vmatmul.mubr.f32.gmra.mxu1 %v451_v54  ;;  %v2491_v2 = vadd.f32 -1.0, %v3820_v62  ;;  %v319_v4 = vmin.f32 %v4389_v60, 0.0  ;;  %v4395_v5 = vadd.f32 %v210_v0, %v4313_v36  ;;  %v453_v7 = vsel %vm273_vm6, %v4337_v61, %v2490_v59 }
 0x106   :  { %v3822_v57 = vpop.eup %3821  ;;  %3833 = vpow2.f32 %v367_v53  ;;  %v369_v8 = vmul.f32 1.442695, %v318_v63  ;;  %v214_v9 = vpop.f32.mrf.mxu0  ;;  %vm283_vm1 = vcmp.gt.f32.partialorder %v4389_v60, 0.0 }
 0x107   :  { %v454_v11 = vsel %vm274_vm7, %v4341_v1, %v2491_v2  ;;  %v2492_v12 = vadd.f32 -1.0, %v3822_v57  ;;  %v371_v13 = vmul.f32 1.442695, %v319_v4  ;;  %v320_v14 = vmin.f32 %v4395_v5, 0.0 }
 0x108   :  { %v3824_v15 = vpop.eup %3823  ;;  %601 = vmatprep.mubr.f32.mxu1 %v454_v11  ;;  %3835 = vpow2.f32 %v369_v8  ;;  %v4405_v16 = vadd.f32 %v214_v9, %v4311_v35  ;;  %v216_v61 = vpop.f32.mrf.mxu0  ;;  %vm284_vm0 = vcmp.gt.f32.partialorder %v4395_v5, 0.0 }
 0x109   :  { %602 = vmatmul.mubr.f32.gmra.mxu1 %v453_v7  ;;  %v2493_v18 = vadd.f32 -1.0, %v3824_v15  ;;  %3837 = vpow2.f32 %v371_v13  ;;  %v373_v19 = vmul.f32 1.442695, %v320_v14  ;;  %v455_v1 = vsel %vm275_vm8, %v4345_v6, %v2492_v12 }
 0x10a   :  { %v321_v20 = vmin.f32 %v4405_v16, 0.0  ;;  %v4412_v21 = vadd.f32 %v216_v61, %v4313_v36  ;;  %v220_v22 = vpop.f32.mrf.mxu0  ;;  %vm285_vm2 = vcmp.gt.f32.partialorder %v4405_v16, 0.0 }
 0x10b   :  { %v3826_v24 = vpop.eup %3825  ;;  %v456_v25 = vsel %vm276_vm9, %v4349_v10, %v2493_v18  ;;  %3839 = vpow2.f32 %v373_v19  ;;  %v4417_v27 = vadd.f32 %v220_v22, %v4311_v35 }
 0x10c   :  { %606 = vmatprep.mubr.f32.mxu1 %v456_v25  ;;  %v2494_v28 = vadd.f32 -1.0, %v3826_v24  ;;  %v375_v29 = vmul.f32 1.442695, %v321_v20  ;;  %v322_v6 = vmin.f32 %v4412_v21, 0.0  ;;  %v222_v30 = vpop.f32.mrf.mxu0  ;;  %vm286_vm3 = vcmp.gt.f32.partialorder %v4412_v21, 0.0 }
 0x10d   :  { %v3828_v31 = vpop.eup %3827  ;;  %607 = vmatmul.mubr.f32.gmra.mxu1 %v455_v1  ;;  %v323_v32 = vmin.f32 %v4417_v27, 0.0  ;;  %v4423_v10 = vadd.f32 %v222_v30, %v4313_v36  ;;  %vm287_vm5 = vcmp.gt.f32.partialorder %v4417_v27, 0.0 }
 0x10e   :  { %v3830_v33 = vpop.eup %3829  ;;  %v2495_v34 = vadd.f32 -1.0, %v3828_v31  ;;  %v457_v39 = vsel %vm277_vm10, %v4353_v17, %v2494_v28  ;;  %3841 = vpow2.f32 %v375_v29  ;;  %v377_v38 = vmul.f32 1.442695, %v322_v6  ;;  %v226_v40 = vpop.f32.mrf.mxu0 }
 0x10f   :  { %v2496_v41 = vadd.f32 -1.0, %v3830_v33  ;;  %v379_v42 = vmul.f32 1.442695, %v323_v32  ;;  %v324_v43 = vmin.f32 %v4423_v10, 0.0  ;;  %v4428_v44 = vadd.f32 %v226_v40, %v4311_v35 }
 0x110   :  { %v3832_v46 = vpop.eup %3831  ;;  %v458_v47 = vsel %vm278_vm11, %v4357_v23, %v2495_v34  ;;  %3843 = vpow2.f32 %v377_v38  ;;  %v228_v50 = vpop.f32.mrf.mxu0  ;;  %vm288_vm4 = vcmp.gt.f32.partialorder %v4423_v10, 0.0 }
 0x111   :  { %611 = vmatprep.mubr.f32.mxu1 %v458_v47  ;;  %v2497_v17 = vadd.f32 -1.0, %v3832_v46  ;;  %3845 = vpow2.f32 %v379_v42  ;;  %v381_v51 = vmul.f32 1.442695, %v324_v43  ;;  %v325_v52 = vmin.f32 %v4428_v44, 0.0 }
 0x112   :  { %612 = vmatmul.mubr.f32.gmra.mxu1 %v457_v39  ;;  %v4436_v49 = vadd.f32 %v228_v50, %v4313_v36  ;;  %v232_v54 = vpop.f32.mrf.mxu0  ;;  %v459_v56 = vsel %vm279_vm13, %v4361_v26, %v2496_v41  ;;  %vm289_vm6 = vcmp.gt.f32.partialorder %v4428_v44, 0.0 }
 0x113   :  { %v3834_v23 = vpop.eup %3833  ;;  %v460_v45 = vsel %vm280_vm12, %v4368_v37, %v2497_v17  ;;  %3847 = vpow2.f32 %v381_v51  ;;  %v4441_v58 = vadd.f32 %v232_v54, %v4311_v35  ;;  %v383_v62 = vmul.f32 1.442695, %v325_v52 }
 0x114   :  { %616 = vmatprep.mubr.f32.mxu1 %v460_v45  ;;  %v2498_v59 = vadd.f32 -1.0, %v3834_v23  ;;  %v326_v53 = vmin.f32 %v4436_v49, 0.0  ;;  %v234_v63 = vpop.f32.mrf.mxu0  ;;  %vm290_vm7 = vcmp.gt.f32.partialorder %v4436_v49, 0.0 }
 0x115   :  { %v3836_v0 = vpop.eup %3835  ;;  %v327_v2 = vmin.f32 %v4441_v58, 0.0  ;;  %v4447_v4 = vadd.f32 %v234_v63, %v4313_v36  ;;  %3849 = vpow2.f32 %v383_v62  ;;  %vm291_vm9 = vcmp.gt.f32.partialorder %v4441_v58, 0.0 }
 0x116   :  { %v3838_v37 = vpop.eup %3837  ;;  %617 = vmatmul.mubr.f32.gmra.mxu1 %v459_v56  ;;  %v2499_v26 = vadd.f32 -1.0, %v3836_v0  ;;  %v461_v57 = vsel %vm281_vm14, %v4377_v48, %v2498_v59  ;;  %v385_v7 = vmul.f32 1.442695, %v326_v53  ;;  %v238_v8 = vpop.f32.mrf.mxu0 }
 0x117   :  { %v2500_v9 = vadd.f32 -1.0, %v3838_v37  ;;  %v387_v11 = vmul.f32 1.442695, %v327_v2  ;;  %v328_v12 = vmin.f32 %v4447_v4, 0.0  ;;  %v4454_v13 = vadd.f32 %v238_v8, %v4311_v35 }
 0x118   :  { %v3840_v14 = vpop.eup %3839  ;;  %v462_v15 = vsel %vm282_vm15, %v4385_v55, %v2499_v26  ;;  %3851 = vpow2.f32 %v385_v7  ;;  %v240_v61 = vpop.f32.mrf.mxu0  ;;  %vm292_vm8 = vcmp.gt.f32.partialorder %v4447_v4, 0.0 }
 0x119   :  { %621 = vmatprep.mubr.f32.mxu1 %v462_v15  ;;  %v2501_v48 = vadd.f32 -1.0, %v3840_v14  ;;  %3853 = vpow2.f32 %v387_v11  ;;  %v389_v18 = vmul.f32 1.442695, %v328_v12  ;;  %v329_v19 = vmin.f32 %v4454_v13, 0.0 }
 0x11a   :  { %622 = vmatmul.mubr.f32.gmra.mxu1 %v461_v57  ;;  %v4461_v1 = vadd.f32 %v240_v61, %v4313_v36  ;;  %v463_v55 = vsel %vm283_vm1, %v4389_v60, %v2500_v9  ;;  %vm293_vm10 = vcmp.gt.f32.partialorder %v4454_v13, 0.0 }
 0x11b   :  { %v3842_v20 = vpop.eup %3841  ;;  %v464_v22 = vsel %vm284_vm0, %v4395_v5, %v2501_v48  ;;  %3855 = vpow2.f32 %v389_v18  ;;  %v391_v25 = vmul.f32 1.442695, %v329_v19  ;;  %v2570_v48 = vld [vmem:[%s5915_s5 + $0x178] sm:$0xff] }
 0x11c   :  { %626 = vmatprep.mubr.f32.mxu1 %v464_v22  ;;  %v2502_v24 = vadd.f32 -1.0, %v3842_v20  ;;  %v330_v28 = vmin.f32 %v4461_v1, 0.0  ;;  %vm294_vm11 = vcmp.gt.f32.partialorder %v4461_v1, 0.0  ;;  %3209 = vmatpush3.msra.mxu1 %v2570_v48  ;;  %v2569_v22 = vld [vmem:[%s5915_s5 + $0x170] sm:$0xff] }
 0x11d   :  { %v3844_v29 = vpop.eup %3843  ;;  %3857 = vpow2.f32 %v391_v25  ;;  %3210 = vmatprep.subr.mxu1 %v3918_v3  ;;  %v2568_v25 = vld [vmem:[%s5915_s5 + $0x168] sm:$0xff] }
 0x11e   :  { %v3846_v6 = vpop.eup %3845  ;;  %627 = vmatmul.mubr.f32.gmra.mxu1 %v463_v55  ;;  %v2503_v30 = vadd.f32 -1.0, %v3844_v29  ;;  %v393_v31 = vmul.f32 1.442695, %v330_v28  ;;  %v465_v5 = vsel %vm285_vm2, %v4405_v16, %v2502_v24 }
 0x11f   :  { %v2504_v32 = vadd.f32 -1.0, %v3846_v6  ;;  %3211 = vmatpush3.msra.mxu1 %v2569_v22 }
 0x120   :  { %v3848_v60 = vpop.eup %3847  ;;  %v466_v33 = vsel %vm286_vm3, %v4412_v21, %v2503_v30  ;;  %3859 = vpow2.f32 %v393_v31  ;;  %3212 = vmatprep.subr.mxu1 %v3918_v3  ;;  %v2567_v30 = vld [vmem:[%s5915_s5 + $0x160] sm:$0xff] }
 0x121   :  { %631 = vmatprep.mubr.f32.mxu1 %v466_v33  ;;  %v2505_v34 = vadd.f32 -1.0, %v3848_v60  ;;  %v467_v40 = vsel %vm287_vm5, %v4417_v27, %v2504_v32  ;;  %3213 = vmatpush3.msra.mxu1 %v2568_v25  ;;  %v2566_v33 = vld [vmem:[%s5915_s5 + $0x158] sm:$0xff] }
 0x122   :  { %632 = vmatmul.mubr.f32.gmra.mxu1 %v465_v5  ;;  %v3850_v39 = vpop.eup %3849  ;;  %3214 = vmatprep.subr.mxu1 %v3918_v3  ;;  %v2544_v5 = vld [vmem:[%s5915_s5 + $0xa8] sm:$0xff] }
 0x123   :  { %v468_v38 = vsel %vm288_vm4, %v4423_v10, %v2505_v34  ;;  %v2506_v16 = vadd.f32 -1.0, %v3850_v39  ;;  %v244_v10 = vpop.f32.mrf.mxu0  ;;  %3215 = vmatpush3.msra.mxu1 %v2567_v30  ;;  %3159 = vmatpush3.msra.mxu0 %v2544_v5  ;;  %vm3919_vm4 = vmmov 0  }
 0x124   :  { %636 = vmatprep.mubr.f32.mxu1 %v468_v38  ;;  %v4483_v54 = vadd.f32 %v244_v10, %v4311_v35  ;;  %3160 = vmatprep.subr.mxu0 %v3918_v3  ;;  %v2565_v38 = vld [vmem:[%s5915_s5 + $0x150] sm:$0xff] }
 0x125   :  { %v3852_v41 = vpop.eup %3851  ;;  %v469_v43 = vsel %vm289_vm6, %v4428_v44, %v2506_v16  ;;  %v246_v44 = vpop.f32.mrf.mxu0  ;;  %3216 = vmatprep.subr.mxu1 %v3918_v3  ;;  %3170 = vmatprep.mubr.msk.f32.mxu0 %vm3919_vm4, %v3918_v3 }
 0x126   :  { %v3854_v21 = vpop.eup %3853  ;;  %637 = vmatmul.mubr.f32.gmra.mxu1 %v467_v40  ;;  %v2507_v42 = vadd.f32 -1.0, %v3852_v41  ;;  %v331_v45 = vmin.f32 %v4483_v54, 0.0  ;;  %v247_v56 = vadd.f32 %v246_v44, %v4313_v36  ;;  %vm295_vm13 = vcmp.gt.f32.partialorder %v4483_v54, 0.0  ;;  %v2564_v40 = vld [vmem:[%s5915_s5 + $0x148] sm:$0xff]  ;;  %v2563_v41 = vld [vmem:[%s5915_s5 + $0x140] sm:$0xff]  ;;  %v2541_v44 = vld [vmem:[%s5915_s5 + $0x90] sm:$0xff] }
 0x127   :  { %v2508_v46 = vadd.f32 -1.0, %v3854_v21  ;;  %v250_v2 = vpop.f32.mrf.mxu0  ;;  %3217 = vmatpush3.msra.mxu1 %v2566_v33 }
 0x128   :  { %v3856_v47 = vpop.eup %3855  ;;  %v470_v50 = vsel %vm290_vm7, %v4436_v49, %v2507_v42  ;;  %v395_v62 = vmul.f32 1.442695, %v331_v45  ;;  %v332_v53 = vmin.f32 %v247_v56, 0.0  ;;  %vm296_vm12 = vcmp.gt.f32.partialorder %v247_v56, 0.0  ;;  %3218 = vmatprep.subr.mxu1 %v3918_v3  ;;  %v2562_v42 = vld [vmem:[%s5915_s5 + $0x138] sm:$0xff] }
 0x129   :  { %641 = vmatprep.mubr.f32.mxu1 %v470_v50  ;;  %v2509_v27 = vadd.f32 -1.0, %v3856_v47  ;;  %v471_v52 = vsel %vm291_vm9, %v4441_v58, %v2508_v46  ;;  %v252_v37 = vpop.f32.mrf.mxu0  ;;  %3219 = vmatpush3.msra.mxu1 %v2565_v38  ;;  %v2543_v47 = vld [vmem:[%s5915_s5 + $0xa0] sm:$0xff]  ;;  %v2561_v50 = vld [vmem:[%s5915_s5 + $0x130] sm:$0xff] }
 0x12a   :  { %642 = vmatmul.mubr.f32.gmra.mxu1 %v469_v43  ;;  %v3858_v17 = vpop.eup %3857  ;;  %v397_v0 = vmul.f32 1.442695, %v332_v53  ;;  %3861 = vpow2.f32 %v395_v62  ;;  %v4496_v57 = vadd.f32 %v252_v37, %v4313_v36  ;;  %3220 = vmatprep.subr.mxu1 %v3918_v3  ;;  %v2559_v62 = vld [vmem:[%s5915_s5 + $0x120] sm:$0xff] }
 0x12b   :  { %v472_v51 = vsel %vm292_vm8, %v4447_v4, %v2509_v27  ;;  %v2510_v49 = vadd.f32 -1.0, %v3858_v17  ;;  %v4492_v4 = vadd.f32 %v250_v2, %v4311_v35  ;;  %v256_v7 = vpop.f32.mrf.mxu0  ;;  %3221 = vmatpush3.msra.mxu1 %v2564_v40  ;;  %3161 = vmatpush3.msra.mxu0 %v2543_v47  ;;  %v2558_v2 = vld [vmem:[%s5915_s5 + $0x118] sm:$0xff]  ;;  %v798_v40 = vld [vmem:[%s5915_s5 + $0x68] sm:$0xff]  ;;  %v2601_v47 = vld [vmem:[%s5915_s5 + $0x270] sm:$0xff] }
 0x12c   :  { %646 = vmatprep.mubr.f32.mxu1 %v472_v51  ;;  %3863 = vpow2.f32 %v397_v0  ;;  %v334_v8 = vmin.f32 %v4496_v57, 0.0  ;;  %v4500_v9 = vadd.f32 %v256_v7, %v4311_v35  ;;  %3222 = vmatprep.subr.mxu1 %v3918_v3  ;;  %vm298_vm14 = vcmp.gt.f32.partialorder %v4496_v57, 0.0  ;;  %v2542_v51 = vld [vmem:[%s5915_s5 + $0x98] sm:$0xff]  ;;  %v2539_v0 = vld [vmem:[%s5915_s5 + $0x80] sm:$0xff]  ;;  %v2556_v7 = vld [vmem:[%s5915_s5 + $0x108] sm:$0xff] }
 0x12d   :  { %v3860_v23 = vpop.eup %3859  ;;  %v473_v58 = vsel %vm293_vm10, %v4454_v13, %v2510_v49  ;;  %v333_v26 = vmin.f32 %v4492_v4, 0.0  ;;  %v258_v11 = vpop.f32.mrf.mxu0  ;;  %3223 = vmatpush3.msra.mxu1 %v2563_v41  ;;  %vm297_vm15 = vcmp.gt.f32.partialorder %v4492_v4, 0.0  ;;  %3162 = vmatprep.subr.mxu0 %v3918_v3  ;;  %v2560_v49 = vld [vmem:[%s5915_s5 + $0x128] sm:$0xff] }
 0x12e   :  { %647 = vmatmul.mubr.f32.gmra.mxu1 %v471_v52  ;;  %v2511_v59 = vadd.f32 -1.0, %v3860_v23  ;;  %v401_v13 = vmul.f32 1.442695, %v334_v8  ;;  %v335_v14 = vmin.f32 %v4500_v9, 0.0  ;;  %v4504_v15 = vadd.f32 %v258_v11, %v4313_v36  ;;  %3224 = vmatprep.subr.mxu1 %v3918_v3  ;;  %v2555_v8 = vld [vmem:[%s5915_s5 + $0x100] sm:$0xff] }
 0x12f   :  { %v399_v12 = vmul.f32 1.442695, %v333_v26  ;;  %v262_v20 = vpop.f32.mrf.mxu0  ;;  %3225 = vmatpush3.msra.mxu1 %v2562_v42  ;;  %3163 = vmatpush3.msra.mxu0 %v2542_v51  ;;  %vm299_vm1 = vcmp.gt.f32.partialorder %v4500_v9, 0.0  ;;  %v2557_v26 = vld [vmem:[%s5915_s5 + $0x110] sm:$0xff] }
 0x130   :  { %v474_v63 = vsel %vm294_vm11, %v4461_v1, %v2511_v59  ;;  %v336_v61 = vmin.f32 %v4504_v15, 0.0  ;;  %3865 = vpow2.f32 %v401_v13  ;;  %v403_v19 = vmul.f32 1.442695, %v335_v14  ;;  %3226 = vmatprep.subr.mxu1 %v3918_v3  ;;  %3164 = vmatprep.subr.mxu0 %v3918_v3  ;;  %v2540_v59 = vld [vmem:[%s5915_s5 + $0x88] sm:$0xff] }
 0x131   :  { %651 = vmatprep.mubr.f32.mxu1 %v474_v63  ;;  %3867 = vpow2.f32 %v399_v12  ;;  %v264_v24 = vpop.f32.mrf.mxu0  ;;  %v4522_v6 = vadd.f32 %v262_v20, %v4311_v35  ;;  %3227 = vmatpush3.msra.mxu1 %v2561_v50  ;;  %vm300_vm0 = vcmp.gt.f32.partialorder %v4504_v15, 0.0  ;;  %v4624_v12 = vld [vmem:[%s5917_s4] ss:$0 sm:$0xff] }
 0x132   :  { %652 = vmatmul.mubr.f32.gmra.mxu1 %v473_v58  ;;  %v405_v1 = vmul.f32 1.442695, %v336_v61  ;;  %v4519_v28 = vadd.f32 %v264_v24, %v4313_v36  ;;  %3165 = vmatpush3.msra.mxu0 %v2541_v44  ;;  %v2599_v44 = vld [vmem:[%s5915_s5 + $0x260] sm:$0xff] }
 0x133   :  { %v337_v35 = vmin.f32 %v4522_v6, 0.0  ;;  %3228 = vmatprep.subr.mxu1 %v3918_v3  ;;  %3166 = vmatprep.subr.mxu0 %v3918_v3  ;;  %vm301_vm3 = vcmp.gt.f32.partialorder %v4522_v6, 0.0 }
 0x134   :  { %3869 = vpow2.f32 %v405_v1  ;;  %v338_v36 = vmin.f32 %v4519_v28, 0.0  ;;  %3167 = vmatpush3.msra.mxu0 %v2540_v59  ;;  %3229 = vmatpush3.msra.mxu1 %v2560_v49  ;;  %vm302_vm2 = vcmp.gt.f32.partialorder %v4519_v28, 0.0 }
 0x135   :  { %3871 = vpow2.f32 %v403_v19  ;;  %v407_v39 = vmul.f32 1.442695, %v337_v35  ;;  %3230 = vmatprep.subr.mxu1 %v3918_v3  ;;  %3168 = vmatprep.subr.mxu0 %v3918_v3 }
 0x136   :  { %v409_v34 = vmul.f32 1.442695, %v338_v36  ;;  %3231 = vmatpush3.msra.mxu1 %v2559_v62  ;;  %3169 = vmatpush3.msra.mxu0 %v2539_v0  ;;  %v800_v36 = vld [vmem:[%s5915_s5 + $0x78] sm:$0xff]  ;;  %v793_v62 = vld [vmem:[%s5915_s5 + $0x40] sm:$0xff]  ;;  %v2596_v0 = vld [vmem:[%s5915_s5 + $0x248] sm:$0xff] }
 0x137   :  { %v3862_v18 = vpop.eup %3861  ;;  %3232 = vmatprep.subr.mxu1 %v3918_v3  ;;  %3173 = vmatprep.subr.mxu0 %v3918_v3 }
 0x138   :  { %v2512_v31 = vadd.f32 -1.0, %v3862_v18  ;;  %3873 = vpow2.f32 %v409_v34  ;;  %3233 = vmatpush3.msra.mxu1 %v2558_v2  ;;  %v799_v34 = vld [vmem:[%s5915_s5 + $0x70] sm:$0xff] }
 0x139   :  { %v3864_v55 = vpop.eup %3863  ;;  %3875 = vpow2.f32 %v407_v39  ;;  %3234 = vmatprep.subr.mxu1 %v3918_v3 }
 0x13a   :  { %v2513_v29 = vadd.f32 -1.0, %v3864_v55  ;;  %v475_v60 = vsel %vm295_vm13, %v4483_v54, %v2512_v31  ;;  %3235 = vmatpush3.msra.mxu1 %v2557_v26 }
 0x13b   :  { %3236 = vmatprep.subr.mxu1 %v3918_v3 }
 0x13c   :  { %v476_v32 = vsel %vm296_vm12, %v247_v56, %v2513_v29  ;;  %3237 = vmatpush3.msra.mxu1 %v2556_v7  ;;  %v2594_v7 = vld [vmem:[%s5915_s5 + $0x238] sm:$0xff] }
 0x13d   :  { %656 = vmatprep.mubr.f32.mxu1 %v476_v32  ;;  %v3866_v16 = vpop.eup %3865  ;;  %3238 = vmatprep.subr.mxu1 %v3918_v3 }
 0x13e   :  { %657 = vmatmul.mubr.f32.gmra.mxu1 %v475_v60  ;;  %v3868_v21 = vpop.eup %3867  ;;  %v2515_v43 = vadd.f32 -1.0, %v3866_v16  ;;  %v2602_v16 = vld [vmem:[%s5915_s5 + $0x278] sm:$0xff] }
 0x13f   :  { %v2514_v27 = vadd.f32 -1.0, %v3868_v21  ;;  %3239 = vmatpush3.msra.mxu1 %v2555_v8 }
 0x140   :  { %v478_v17 = vsel %vm298_vm14, %v4496_v57, %v2515_v43  ;;  %3278 = vmatprep.subr.mxu1 %v3918_v3 }
 0x141   :  { %v3870_v46 = vpop.eup %3869  ;;  %v477_v52 = vsel %vm297_vm15, %v4492_v4, %v2514_v27  ;;  %661 = vmatprep.mubr.f32.mxu1 %v478_v17  ;;  %v796_v27 = vld [vmem:[%s5915_s5 + $0x58] sm:$0xff] }
 0x142   :  { %v3872_v10 = vpop.eup %3871  ;;  %v2517_v54 = vadd.f32 -1.0, %v3870_v46  ;;  %662 = vmatmul.mubr.f32.gmra.mxu1 %v477_v52  ;;  %v797_v46 = vld [vmem:[%s5915_s5 + $0x60] sm:$0xff] }
 0x143   :  { %v2516_v23 = vadd.f32 -1.0, %v3872_v10  ;;  %v2600_v10 = vld [vmem:[%s5915_s5 + $0x268] sm:$0xff] }
 0x144   :  { %v480_v45 = vsel %vm300_vm0, %v4504_v15, %v2517_v54  ;;  %v795_v54 = vld [vmem:[%s5915_s5 + $0x50] sm:$0xff] }
 0x145   :  { %v3874_v56 = vpop.eup %3873  ;;  %v479_v58 = vsel %vm299_vm1, %v4500_v9, %v2516_v23  ;;  %666 = vmatprep.mubr.f32.mxu1 %v480_v45  ;;  %v794_v23 = vld [vmem:[%s5915_s5 + $0x48] sm:$0xff]  ;;  %v2598_v45 = vld [vmem:[%s5915_s5 + $0x258] sm:$0xff] }
 0x146   :  { %v3876_v53 = vpop.eup %3875  ;;  %v2519_v63 = vadd.f32 -1.0, %v3874_v56  ;;  %667 = vmatmul.mubr.f32.gmra.mxu1 %v479_v58 }
 0x147   :  { %v2518_v4 = vadd.f32 -1.0, %v3876_v53  ;;  %v2597_v53 = vld [vmem:[%s5915_s5 + $0x250] sm:$0xff] }
 0x148   :  { %v482_v37 = vsel %vm302_vm2, %v4519_v28, %v2519_v63  ;;  %v792_v63 = vld [vmem:[%s5915_s5 + $0x38] sm:$0xff] }
 0x149   :  { %671 = vmatprep.mubr.f32.mxu1 %v482_v37  ;;  %v481_v57 = vsel %vm301_vm3, %v4522_v6, %v2518_v4  ;;  %v791_v4 = vld [vmem:[%s5915_s5 + $0x30] sm:$0xff]  ;;  %v2595_v37 = vld [vmem:[%s5915_s5 + $0x240] sm:$0xff] }
 0x14a   :  { %672 = vmatmul.mubr.f32.gmra.mxu1 %v481_v57  ;;  %v790_v57 = vld [vmem:[%s5915_s5 + $0x28] sm:$0xff] }
 0x14b   :  { %3240 = vmatprep.mubr.msk.f32.mxu1 %vm3919_vm4, %v3918_v3 }
 0x1bd   :  { %v588_v9 = vpop.f32.mrf.mxu1 }
 0x1be   :  { %v4638_v32 = vadd.f32 %v4624_v12, %v588_v9  ;;  %v789_v9 = vld [vmem:[%s5915_s5 + $0x20] sm:$0xff] }
 0x1bf   :  { %v590_v11 = vpop.f32.mrf.mxu1 }
 0x1c0   :  { %v695_v41 = vmin.f32 %v4638_v32, 0.0  ;;  %v2593_v11 = vld [vmem:[%s5915_s5 + $0x230] sm:$0xff]  ;;  %vm677_vm7 = vcmp.gt.f32.partialorder %v4638_v32, 0.0 }
 0x1c1   :  { %v593_v13 = vpop.f32.mrf.mxu1 }
 0x1c2   :  { %v594_v14 = vadd.f32 %v4624_v12, %v593_v13  ;;  %v713_v17 = vmul.f32 1.442695, %v695_v41 }
 0x1c3   :  { %v595_v15 = vpop.f32.mrf.mxu1 }
 0x1c4   :  { %v696_v61 = vmin.f32 %v594_v14, 0.0  ;;  %vm678_vm5 = vcmp.gt.f32.partialorder %v594_v14, 0.0  ;;  %v2592_v15 = vld [vmem:[%s5915_s5 + $0x228] sm:$0xff] }
 0x1c5   :  { %v598_v48 = vpop.f32.mrf.mxu1 }
 0x1c6   :  { %v715_v18 = vmul.f32 1.442695, %v696_v61  ;;  %v599_v19 = vadd.f32 %v4624_v12, %v598_v48 }
 0x1c7   :  { %v600_v1 = vpop.f32.mrf.mxu1 }
 0x1c8   :  { %3877 = vpow2.f32 %v715_v18  ;;  %v697_v20 = vmin.f32 %v599_v19, 0.0  ;;  %vm679_vm6 = vcmp.gt.f32.partialorder %v599_v19, 0.0  ;;  %v787_v18 = vld [vmem:[%s5915_s5 + $0x10] sm:$0xff]  ;;  %v786_v1 = vld [vmem:[%s5915_s5 + $0x8] sm:$0xff] }
 0x1c9   :  { %v4628_v22 = vpop.f32.mrf.mxu1 }
 0x1ca   :  { %v717_v55 = vmul.f32 1.442695, %v697_v20  ;;  %v2590_v20 = vld [vmem:[%s5915_s5 + $0x218] sm:$0xff] }
 0x1cb   :  { %v605_v24 = vpop.f32.mrf.mxu1 }
 0x1cc   :  { %3879 = vpow2.f32 %v717_v55 }
 0x1cd   :  { %v608_v25 = vpop.f32.mrf.mxu1  ;;  %3881 = vpow2.f32 %v713_v17  ;;  %v2580_v17 = vld [vmem:[%s5915_s5 + $0x1c8] sm:$0xff] }
 0x1ce   :  { %v4656_v42 = vadd.f32 %v4624_v12, %v608_v25  ;;  %v785_v25 = vld [vmem:[%s5915_s5] sm:$0xff] }
 0x1cf   :  { %v610_v28 = vpop.f32.mrf.mxu1 }
 0x1d0   :  { %v699_v51 = vmin.f32 %v4656_v42, 0.0  ;;  %v2589_v28 = vld [vmem:[%s5915_s5 + $0x210] sm:$0xff]  ;;  %vm681_vm8 = vcmp.gt.f32.partialorder %v4656_v42, 0.0 }
 0x1d2   :  { %v4630_v29 = vpop.f32.mrf.mxu1  ;;  %v721_v56 = vmul.f32 1.442695, %v699_v51  ;;  %v2630_v51 = vld [vmem:[%s5915_s5 + $0x358] sm:$0xff] }
 0x1d4   :  { %v615_v6 = vpop.f32.mrf.mxu1  ;;  %3883 = vpow2.f32 %v721_v56  ;;  %v2577_v56 = vld [vmem:[%s5915_s5 + $0x1b0] sm:$0xff] }
 0x1d5   :  { %v3878_v30 = vpop.eup %3877  ;;  %v2586_v6 = vld [vmem:[%s5915_s5 + $0x1f8] sm:$0xff] }
 0x1d6   :  { %v2522_v31 = vadd.f32 -1.0, %v3878_v30  ;;  %v4632_v5 = vpop.f32.mrf.mxu1 }
 0x1d8   :  { %v768_v35 = vsel %vm678_vm5, %v594_v14, %v2522_v31  ;;  %v620_v60 = vpop.f32.mrf.mxu1  ;;  %v788_v14 = vld [vmem:[%s5915_s5 + $0x18] sm:$0xff]  ;;  %v2588_v31 = vld [vmem:[%s5915_s5 + $0x208] sm:$0xff] }
 0x1d9   :  { %v3880_v33 = vpop.eup %3879  ;;  %3171 = vmatmul.mubr.f32.vlgmr.msra.gmra.mxu0 %v768_v35  ;;  %v2585_v35 = vld [vmem:[%s5915_s5 + $0x1f0] sm:$0xff]  ;;  %v4789_v60 = vadd.f32 %v4624_v12, %v4628_v22 }
 0x1da   :  { %v2523_v39 = vadd.f32 -1.0, %v3880_v33  ;;  %3174 = vmatpush3.msra.mxu0 %v800_v36  ;;  %3205 = vmatprep.mubr.msk.f32.mxu0 %vm3919_vm4, %v3918_v3  ;;  %v4645_v38 = vpop.f32.mrf.mxu1  ;;  %v3882_v48 = vpop.eup %3881  ;;  %v2584_v33 = vld [vmem:[%s5915_s5 + $0x1e8] sm:$0xff] }
 0x1db   :  { %3175 = vmatprep.subr.mxu0 %v3918_v3  ;;  %v2521_v55 = vadd.f32 -1.0, %v3882_v48  ;;  %vm680_vm9 = vcmp.gt.f32.partialorder %v4789_v60, 0.0 }
 0x1dc   :  { %v769_v21 = vsel %vm679_vm6, %v599_v19, %v2523_v39  ;;  %3176 = vmatpush3.msra.mxu0 %v799_v34  ;;  %v625_v43 = vpop.f32.mrf.mxu1  ;;  %v2591_v19 = vld [vmem:[%s5915_s5 + $0x220] sm:$0xff]  ;;  %v2634_v34 = vld [vmem:[%s5915_s5 + $0x378] sm:$0xff]  ;;  %v698_v39 = vmin.f32 %v4789_v60, 0.0 }
 0x1dd   :  { %3177 = vmatprep.subr.mxu0 %v3918_v3  ;;  %3241 = vmatmul.mubr.f32.vlgmr.msra.gmra.mxu1 %v769_v21  ;;  %v767_v30 = vsel %vm677_vm7, %v4638_v32, %v2521_v55  ;;  %v2587_v32 = vld [vmem:[%s5915_s5 + $0x200] sm:$0xff]  ;;  %v2633_v21 = vld [vmem:[%s5915_s5 + $0x370] sm:$0xff] }
 0x1de   :  { %3178 = vmatpush3.msra.mxu0 %v798_v40  ;;  %3279 = vmatpush3.msra.mxu1 %v2602_v16  ;;  %v4665_v50 = vpop.f32.mrf.mxu1  ;;  %v2583_v40 = vld [vmem:[%s5915_s5 + $0x1e0] sm:$0xff]  ;;  %v4814_v16 = vadd.f32 %v4624_v12, %v4632_v5  ;;  %v2632_v5 = vld [vmem:[%s5915_s5 + $0x368] sm:$0xff] }
 0x1df   :  { %3179 = vmatprep.subr.mxu0 %v3918_v3  ;;  %3280 = vmatprep.subr.mxu1 %v3918_v3 }
 0x1e0   :  { %3180 = vmatpush3.msra.mxu0 %v797_v46  ;;  %3281 = vmatpush3.msra.mxu1 %v2601_v47  ;;  %v630_v52 = vpop.f32.mrf.mxu1  ;;  %v719_v46 = vmul.f32 1.442695, %v698_v39  ;;  %v2581_v47 = vld [vmem:[%s5915_s5 + $0x1d0] sm:$0xff]  ;;  %vm683_vm10 = vcmp.gt.f32.partialorder %v4814_v16, 0.0 }
 0x1e1   :  { %3181 = vmatprep.subr.mxu0 %v3918_v3  ;;  %3282 = vmatprep.subr.mxu1 %v3918_v3  ;;  %v3884_v24 = vpop.eup %3883  ;;  %v2613_v39 = vld [vmem:[%s5915_s5 + $0x2d0] sm:$0xff] }
 0x1e2   :  { %3182 = vmatpush3.msra.mxu0 %v796_v27  ;;  %3283 = vmatpush3.msra.mxu1 %v2600_v10  ;;  %v4684_v49 = vpop.f32.mrf.mxu1  ;;  %v2525_v36 = vadd.f32 -1.0, %v3884_v24  ;;  %v701_v27 = vmin.f32 %v4814_v16, 0.0  ;;  %v2631_v10 = vld [vmem:[%s5915_s5 + $0x360] sm:$0xff]  ;;  %3885 = vpow2.f32 %v719_v46  ;;  %v2617_v24 = vld [vmem:[%s5915_s5 + $0x2f0] sm:$0xff] }
 0x1e3   :  { %3183 = vmatprep.subr.mxu0 %v3918_v3  ;;  %3284 = vmatprep.subr.mxu1 %v3918_v3  ;;  %v2661_v46 = vld [vmem:[%s5915_s5 + $0x450] sm:$0xff] }
 0x1e4   :  { %3184 = vmatpush3.msra.mxu0 %v795_v54  ;;  %3285 = vmatpush3.msra.mxu1 %v2599_v44  ;;  %v635_v59 = vpop.f32.mrf.mxu1  ;;  %v771_v22 = vsel %vm681_vm8, %v4656_v42, %v2525_v36  ;;  %v2582_v42 = vld [vmem:[%s5915_s5 + $0x1d8] sm:$0xff]  ;;  %v725_v52 = vmul.f32 1.442695, %v701_v27  ;;  %v2579_v54 = vld [vmem:[%s5915_s5 + $0x1c0] sm:$0xff]  ;;  %v2629_v44 = vld [vmem:[%s5915_s5 + $0x350] sm:$0xff] }
 0x1e5   :  { %3185 = vmatprep.subr.mxu0 %v3918_v3  ;;  %3286 = vmatprep.subr.mxu1 %v3918_v3  ;;  %v2627_v59 = vld [vmem:[%s5915_s5 + $0x340] sm:$0xff]  ;;  %v2660_v27 = vld [vmem:[%s5915_s5 + $0x448] sm:$0xff] }
 0x1e6   :  { %3186 = vmatpush3.msra.mxu0 %v794_v23  ;;  %3287 = vmatpush3.msra.mxu1 %v2598_v45  ;;  %v4702_v58 = vpop.f32.mrf.mxu1  ;;  %v2578_v23 = vld [vmem:[%s5915_s5 + $0x1b8] sm:$0xff]  ;;  %v2628_v45 = vld [vmem:[%s5915_s5 + $0x348] sm:$0xff]  ;;  %3887 = vpow2.f32 %v725_v52  ;;  %v2615_v36 = vld [vmem:[%s5915_s5 + $0x2e0] sm:$0xff] }
 0x1e7   :  { %3187 = vmatprep.subr.mxu0 %v3918_v3  ;;  %3288 = vmatprep.subr.mxu1 %v3918_v3  ;;  %v2608_v52 = vld [vmem:[%s5915_s5 + $0x2a8] sm:$0xff] }
 0x1e8   :  { %3188 = vmatpush3.msra.mxu0 %v793_v62  ;;  %3289 = vmatpush3.msra.mxu1 %v2597_v53  ;;  %v640_v2 = vpop.f32.mrf.mxu1  ;;  %v2576_v62 = vld [vmem:[%s5915_s5 + $0x1a8] sm:$0xff]  ;;  %v2626_v53 = vld [vmem:[%s5915_s5 + $0x338] sm:$0xff] }
 0x1e9   :  { %3189 = vmatprep.subr.mxu0 %v3918_v3  ;;  %3290 = vmatprep.subr.mxu1 %v3918_v3 }
 0x1ea   :  { %3190 = vmatpush3.msra.mxu0 %v792_v63  ;;  %3291 = vmatpush3.msra.mxu1 %v2596_v0  ;;  %v4720_v26 = vpop.f32.mrf.mxu1  ;;  %v2575_v63 = vld [vmem:[%s5915_s5 + $0x1a0] sm:$0xff]  ;;  %v2625_v0 = vld [vmem:[%s5915_s5 + $0x330] sm:$0xff] }
 0x1eb   :  { %3191 = vmatprep.subr.mxu0 %v3918_v3  ;;  %3292 = vmatprep.subr.mxu1 %v3918_v3 }
 0x1ec   :  { %3192 = vmatpush3.msra.mxu0 %v791_v4  ;;  %3293 = vmatpush3.msra.mxu1 %v2595_v37  ;;  %v645_v8 = vpop.f32.mrf.mxu1  ;;  %v2574_v4 = vld [vmem:[%s5915_s5 + $0x198] sm:$0xff]  ;;  %v2624_v37 = vld [vmem:[%s5915_s5 + $0x328] sm:$0xff] }
 0x1ed   :  { %3193 = vmatprep.subr.mxu0 %v3918_v3  ;;  %3294 = vmatprep.subr.mxu1 %v3918_v3 }
 0x1ee   :  { %3194 = vmatpush3.msra.mxu0 %v790_v57  ;;  %3295 = vmatpush3.msra.mxu1 %v2594_v7  ;;  %v4738_v13 = vpop.f32.mrf.mxu1  ;;  %v2573_v7 = vld [vmem:[%s5915_s5 + $0x190] sm:$0xff] }
 0x1ef   :  { %3195 = vmatprep.subr.mxu0 %v3918_v3  ;;  %3296 = vmatprep.subr.mxu1 %v3918_v3  ;;  %v3886_v8 = vpop.eup %3885 }
 0x1f0   :  { %3196 = vmatpush3.msra.mxu0 %v789_v9  ;;  %3297 = vmatpush3.msra.mxu1 %v2593_v11  ;;  %v650_v61 = vpop.f32.mrf.mxu1  ;;  %v2623_v9 = vld [vmem:[%s5915_s5 + $0x320] sm:$0xff]  ;;  %v2572_v11 = vld [vmem:[%s5915_s5 + $0x188] sm:$0xff] }
 0x1f1   :  { %3197 = vmatprep.subr.mxu0 %v3918_v3  ;;  %3298 = vmatprep.subr.mxu1 %v3918_v3  ;;  %v2524_v61 = vadd.f32 -1.0, %v3886_v8 }
 0x1f2   :  { %3198 = vmatpush3.msra.mxu0 %v788_v14  ;;  %3299 = vmatpush3.msra.mxu1 %v2592_v15  ;;  %v4816_v41 = vpop.f32.mrf.mxu1  ;;  %v2622_v14 = vld [vmem:[%s5915_s5 + $0x318] sm:$0xff]  ;;  %v2571_v15 = vld [vmem:[%s5915_s5 + $0x180] sm:$0xff] }
 0x1f3   :  { %3199 = vmatprep.subr.mxu0 %v3918_v3  ;;  %3300 = vmatprep.subr.mxu1 %v3918_v3  ;;  %v3888_v48 = vpop.eup %3887 }
 0x1f4   :  { %3200 = vmatpush3.msra.mxu0 %v787_v18  ;;  %3301 = vmatpush3.msra.mxu1 %v2591_v19  ;;  %v655_v43 = vpop.f32.mrf.mxu1  ;;  %v2621_v18 = vld [vmem:[%s5915_s5 + $0x310] sm:$0xff]  ;;  %v2618_v19 = vld [vmem:[%s5915_s5 + $0x2f8] sm:$0xff]  ;;  %v2527_v55 = vadd.f32 -1.0, %v3888_v48 }
 0x1f5   :  { %3201 = vmatprep.subr.mxu0 %v3918_v3  ;;  %3302 = vmatprep.subr.mxu1 %v3918_v3 }
 0x1f6   :  { %3202 = vmatpush3.msra.mxu0 %v786_v1  ;;  %3303 = vmatpush3.msra.mxu1 %v2590_v20  ;;  %v770_v1 = vsel %vm680_vm9, %v4789_v60, %v2524_v61  ;;  %v2620_v20 = vld [vmem:[%s5915_s5 + $0x308] sm:$0xff] }
 0x1f7   :  { %3203 = vmatprep.subr.mxu0 %v3918_v3  ;;  %3304 = vmatprep.subr.mxu1 %v3918_v3  ;;  %v2652_v61 = vld [vmem:[%s5915_s5 + $0x408] sm:$0xff] }
 0x1f8   :  { %3204 = vmatpush3.msra.mxu0 %v785_v25  ;;  %3305 = vmatpush3.msra.mxu1 %v2589_v28  ;;  %v4939_v25 = vadd.f32 %v4624_v12, %v4630_v29  ;;  %v2619_v28 = vld [vmem:[%s5915_s5 + $0x300] sm:$0xff]  ;;  %v773_v29 = vsel %vm683_vm10, %v4814_v16, %v2527_v55  ;;  %v2698_v55 = vld [vmem:[%s5915_s5 + $0x578] sm:$0xff] }
 0x1f9   :  { %3206 = vmatmul.mubr.f32.vlgmr.msra.gmra.mxu0 %v767_v30  ;;  %3243 = vmatprep.subr.mxu0 %v3918_v3  ;;  %v2666_v30 = vld [vmem:[%s5915_s5 + $0x478] sm:$0xff]  ;;  %v2663_v16 = vld [vmem:[%s5915_s5 + $0x460] sm:$0xff] }
 0x1fa   :  { %3306 = vmatprep.subr.mxu1 %v3918_v3  ;;  %3244 = vmatpush3.msra.mxu0 %v2586_v6  ;;  %v2616_v6 = vld [vmem:[%s5915_s5 + $0x2e8] sm:$0xff]  ;;  %vm682_vm11 = vcmp.gt.f32.partialorder %v4939_v25, 0.0 }
 0x1fb   :  { %3307 = vmatpush3.msra.mxu1 %v2588_v31  ;;  %3245 = vmatprep.subr.mxu0 %v3918_v3  ;;  %v700_v31 = vmin.f32 %v4939_v25, 0.0 }
 0x1fc   :  { %3308 = vmatprep.subr.mxu1 %v3918_v3  ;;  %3246 = vmatpush3.msra.mxu0 %v2585_v35  ;;  %v4964_v35 = vadd.f32 %v4624_v12, %v4665_v50  ;;  %v2664_v50 = vld [vmem:[%s5915_s5 + $0x468] sm:$0xff] }
 0x1fd   :  { %3309 = vmatpush3.msra.mxu1 %v2587_v32  ;;  %3247 = vmatprep.subr.mxu0 %v3918_v3  ;;  %v2665_v32 = vld [vmem:[%s5915_s5 + $0x470] sm:$0xff] }
 0x1fe   :  { %3310 = vmatprep.mubr.msk.f32.mxu1 %vm3919_vm4, %v3918_v3  ;;  %3348 = vmatprep.subr.mxu1 %v3918_v3  ;;  %v4886_v2 = vpop.f32.mrf.mxu1  ;;  %vm685_vm12 = vcmp.gt.f32.partialorder %v4964_v35, 0.0 }
 0x1ff   :  { %3248 = vmatpush3.msra.mxu0 %v2584_v33  ;;  %3311 = vmatmul.mubr.f32.vlgmr.msra.gmra.mxu1 %v771_v22  ;;  %v2614_v33 = vld [vmem:[%s5915_s5 + $0x2d8] sm:$0xff] }
 0x200   :  { %3349 = vmatpush3.msra.mxu1 %v2634_v34  ;;  %3249 = vmatprep.subr.mxu0 %v3918_v3  ;;  %v660_v57 = vpop.f32.mrf.mxu1  ;;  %v723_v34 = vmul.f32 1.442695, %v700_v31  ;;  %v2645_v31 = vld [vmem:[%s5915_s5 + $0x3d0] sm:$0xff] }
 0x201   :  { %3350 = vmatprep.subr.mxu1 %v3918_v3  ;;  %3250 = vmatpush3.msra.mxu0 %v2583_v40  ;;  %v703_v40 = vmin.f32 %v4964_v35, 0.0  ;;  %v2654_v57 = vld [vmem:[%s5915_s5 + $0x418] sm:$0xff] }
 0x202   :  { %3351 = vmatpush3.msra.mxu1 %v2633_v21  ;;  %3251 = vmatprep.subr.mxu0 %v3918_v3  ;;  %v4966_v60 = vpop.f32.mrf.mxu1  ;;  %v2612_v21 = vld [vmem:[%s5915_s5 + $0x2c8] sm:$0xff]  ;;  %3889 = vpow2.f32 %v723_v34  ;;  %v2693_v34 = vld [vmem:[%s5915_s5 + $0x550] sm:$0xff] }
 0x203   :  { %3352 = vmatprep.subr.mxu1 %v3918_v3  ;;  %3252 = vmatpush3.msra.mxu0 %v2582_v42  ;;  %v2662_v42 = vld [vmem:[%s5915_s5 + $0x458] sm:$0xff]  ;;  %v729_v43 = vmul.f32 1.442695, %v703_v40  ;;  %v2692_v40 = vld [vmem:[%s5915_s5 + $0x548] sm:$0xff] }
 0x204   :  { %3353 = vmatpush3.msra.mxu1 %v2632_v5  ;;  %3253 = vmatprep.subr.mxu0 %v3918_v3  ;;  %v665_v22 = vpop.f32.mrf.mxu1  ;;  %v2611_v5 = vld [vmem:[%s5915_s5 + $0x2c0] sm:$0xff] }
 0x205   :  { %3354 = vmatprep.subr.mxu1 %v3918_v3  ;;  %3254 = vmatpush3.msra.mxu0 %v2581_v47  ;;  %v2610_v47 = vld [vmem:[%s5915_s5 + $0x2b8] sm:$0xff]  ;;  %3891 = vpow2.f32 %v729_v43 }
 0x206   :  { %3355 = vmatpush3.msra.mxu1 %v2631_v10  ;;  %3255 = vmatprep.subr.mxu0 %v3918_v3  ;;  %v2609_v10 = vld [vmem:[%s5915_s5 + $0x2b0] sm:$0xff]  ;;  %v2690_v43 = vld [vmem:[%s5915_s5 + $0x538] sm:$0xff] }
 0x207   :  { %3356 = vmatprep.subr.mxu1 %v3918_v3  ;;  %3256 = vmatpush3.msra.mxu0 %v2580_v17  ;;  %v5016_v17 = vpop.f32.mrf.mxu1 }
 0x208   :  { %3357 = vmatpush3.msra.mxu1 %v2630_v51  ;;  %3257 = vmatprep.subr.mxu0 %v3918_v3  ;;  %v2659_v51 = vld [vmem:[%s5915_s5 + $0x440] sm:$0xff] }
 0x209   :  { %3358 = vmatprep.subr.mxu1 %v3918_v3  ;;  %3258 = vmatpush3.msra.mxu0 %v2579_v54  ;;  %v670_v54 = vpop.f32.mrf.mxu1 }
 0x20a   :  { %3359 = vmatpush3.msra.mxu1 %v2629_v44  ;;  %3259 = vmatprep.subr.mxu0 %v3918_v3  ;;  %v2658_v44 = vld [vmem:[%s5915_s5 + $0x438] sm:$0xff]  ;;  %v2636_v54 = vld [vmem:[%s5915_s5 + $0x388] sm:$0xff] }
 0x20b   :  { %3360 = vmatprep.subr.mxu1 %v3918_v3  ;;  %3260 = vmatpush3.msra.mxu0 %v2578_v23  ;;  %v2607_v23 = vld [vmem:[%s5915_s5 + $0x2a0] sm:$0xff] }
 0x20c   :  { %3361 = vmatpush3.msra.mxu1 %v2628_v45  ;;  %3261 = vmatprep.subr.mxu0 %v3918_v3  ;;  %v5034_v45 = vpop.f32.mrf.mxu1 }
 0x20d   :  { %3362 = vmatprep.subr.mxu1 %v3918_v3  ;;  %3262 = vmatpush3.msra.mxu0 %v2577_v56  ;;  %v2657_v56 = vld [vmem:[%s5915_s5 + $0x430] sm:$0xff] }
 0x20e   :  { %3363 = vmatpush3.msra.mxu1 %v2627_v59  ;;  %3263 = vmatprep.subr.mxu0 %v3918_v3  ;;  %v2606_v59 = vld [vmem:[%s5915_s5 + $0x298] sm:$0xff] }
 0x20f   :  { %3364 = vmatprep.subr.mxu1 %v3918_v3  ;;  %3264 = vmatpush3.msra.mxu0 %v2576_v62  ;;  %v675_v62 = vpop.f32.mrf.mxu1 }
 0x210   :  { %3365 = vmatpush3.msra.mxu1 %v2626_v53  ;;  %3265 = vmatprep.subr.mxu0 %v3918_v3  ;;  %v2656_v53 = vld [vmem:[%s5915_s5 + $0x428] sm:$0xff]  ;;  %v2685_v62 = vld [vmem:[%s5915_s5 + $0x510] sm:$0xff] }
 0x211   :  { %3366 = vmatprep.subr.mxu1 %v3918_v3  ;;  %3266 = vmatpush3.msra.mxu0 %v2575_v63  ;;  %v2605_v63 = vld [vmem:[%s5915_s5 + $0x290] sm:$0xff] }
 0x212   :  { %3367 = vmatpush3.msra.mxu1 %v2625_v0  ;;  %3267 = vmatprep.subr.mxu0 %v3918_v3  ;;  %v3890_v0 = vpop.eup %3889 }
 0x213   :  { %3368 = vmatprep.subr.mxu1 %v3918_v3  ;;  %3268 = vmatpush3.msra.mxu0 %v2574_v4  ;;  %v2655_v4 = vld [vmem:[%s5915_s5 + $0x420] sm:$0xff]  ;;  %v2526_v8 = vadd.f32 -1.0, %v3890_v0  ;;  %v2684_v0 = vld [vmem:[%s5915_s5 + $0x508] sm:$0xff] }
 0x214   :  { %3369 = vmatpush3.msra.mxu1 %v2624_v37  ;;  %3269 = vmatprep.subr.mxu0 %v3918_v3  ;;  %v2604_v37 = vld [vmem:[%s5915_s5 + $0x288] sm:$0xff] }
 0x215   :  { %3370 = vmatprep.subr.mxu1 %v3918_v3  ;;  %3270 = vmatpush3.msra.mxu0 %v2573_v7  ;;  %v2603_v7 = vld [vmem:[%s5915_s5 + $0x280] sm:$0xff] }
 0x216   :  { %3371 = vmatpush3.msra.mxu1 %v2623_v9  ;;  %3271 = vmatprep.subr.mxu0 %v3918_v3  ;;  %v3892_v9 = vpop.eup %3891 }
 0x217   :  { %3372 = vmatprep.subr.mxu1 %v3918_v3  ;;  %3272 = vmatpush3.msra.mxu0 %v2572_v11  ;;  %v2653_v11 = vld [vmem:[%s5915_s5 + $0x410] sm:$0xff]  ;;  %v2529_v48 = vadd.f32 -1.0, %v3892_v9 }
 0x218   :  { %3373 = vmatpush3.msra.mxu1 %v2622_v14  ;;  %3273 = vmatprep.subr.mxu0 %v3918_v3  ;;  %v2650_v14 = vld [vmem:[%s5915_s5 + $0x3f8] sm:$0xff] }
 0x219   :  { %3374 = vmatprep.subr.mxu1 %v3918_v3  ;;  %3274 = vmatpush3.msra.mxu0 %v2571_v15  ;;  %v772_v15 = vsel %vm682_vm11, %v4939_v25, %v2526_v8  ;;  %v2647_v25 = vld [vmem:[%s5915_s5 + $0x3e0] sm:$0xff]  ;;  %v2680_v8 = vld [vmem:[%s5915_s5 + $0x4e8] sm:$0xff] }
 0x21a   :  { %3275 = vmatprep.mubr.msk.f32.mxu0 %vm3919_vm4, %v3918_v3  ;;  %3375 = vmatpush3.msra.mxu1 %v2621_v18  ;;  %v2649_v18 = vld [vmem:[%s5915_s5 + $0x3f0] sm:$0xff] }
 0x21b   :  { %3276 = vmatmul.mubr.f32.vlgmr.msra.gmra.mxu0 %v770_v1  ;;  %3313 = vmatprep.subr.mxu0 %v3918_v3  ;;  %v2651_v1 = vld [vmem:[%s5915_s5 + $0x400] sm:$0xff] }
 0x21c   :  { %3376 = vmatprep.subr.mxu1 %v3918_v3  ;;  %3314 = vmatpush3.msra.mxu0 %v2618_v19  ;;  %v5091_v19 = vadd.f32 %v4624_v12, %v4645_v38  ;;  %v775_v38 = vsel %vm685_vm12, %v4964_v35, %v2529_v48  ;;  %v2695_v35 = vld [vmem:[%s5915_s5 + $0x560] sm:$0xff]  ;;  %v2678_v48 = vld [vmem:[%s5915_s5 + $0x4d8] sm:$0xff] }
 0x21d   :  { %3377 = vmatpush3.msra.mxu1 %v2620_v20  ;;  %3315 = vmatprep.subr.mxu0 %v3918_v3  ;;  %v2648_v20 = vld [vmem:[%s5915_s5 + $0x3e8] sm:$0xff] }
 0x21e   :  { %3378 = vmatprep.subr.mxu1 %v3918_v3  ;;  %3316 = vmatpush3.msra.mxu0 %v2617_v24  ;;  %v702_v24 = vmin.f32 %v5091_v19, 0.0  ;;  %vm684_vm13 = vcmp.gt.f32.partialorder %v5091_v19, 0.0 }
 0x21f   :  { %3379 = vmatpush3.msra.mxu1 %v2619_v28  ;;  %3317 = vmatprep.subr.mxu0 %v3918_v3  ;;  %v5116_v28 = vadd.f32 %v4624_v12, %v4702_v58  ;;  %v2696_v58 = vld [vmem:[%s5915_s5 + $0x568] sm:$0xff] }
 0x220   :  { %3380 = vmatprep.mubr.msk.f32.mxu1 %vm3919_vm4, %v3918_v3  ;;  %3418 = vmatprep.subr.mxu1 %v3918_v3 }
 0x221   :  { %3318 = vmatpush3.msra.mxu0 %v2616_v6  ;;  %3381 = vmatmul.mubr.f32.vlgmr.msra.gmra.mxu1 %v773_v29  ;;  %v2697_v6 = vld [vmem:[%s5915_s5 + $0x570] sm:$0xff]  ;;  %v2646_v29 = vld [vmem:[%s5915_s5 + $0x3d8] sm:$0xff]  ;;  %vm687_vm14 = vcmp.gt.f32.partialorder %v5116_v28, 0.0 }
 0x222   :  { %3419 = vmatpush3.msra.mxu1 %v2666_v30  ;;  %3319 = vmatprep.subr.mxu0 %v3918_v3  ;;  %v727_v30 = vmul.f32 1.442695, %v702_v24 }
 0x223   :  { %3420 = vmatprep.subr.mxu1 %v3918_v3  ;;  %3320 = vmatpush3.msra.mxu0 %v2615_v36  ;;  %v705_v36 = vmin.f32 %v5116_v28, 0.0 }
 0x224   :  { %3421 = vmatpush3.msra.mxu1 %v2665_v32  ;;  %3321 = vmatprep.subr.mxu0 %v3918_v3  ;;  %v2644_v32 = vld [vmem:[%s5915_s5 + $0x3c8] sm:$0xff]  ;;  %3893 = vpow2.f32 %v727_v30  ;;  %v2723_v30 = vld [vmem:[%s5915_s5 + $0x640] sm:$0xff] }
 0x225   :  { %3422 = vmatprep.subr.mxu1 %v3918_v3  ;;  %3322 = vmatpush3.msra.mxu0 %v2614_v33  ;;  %v2694_v33 = vld [vmem:[%s5915_s5 + $0x558] sm:$0xff]  ;;  %v733_v22 = vmul.f32 1.442695, %v705_v36 }
 0x226   :  { %3423 = vmatpush3.msra.mxu1 %v2664_v50  ;;  %3323 = vmatprep.subr.mxu0 %v3918_v3  ;;  %v2643_v50 = vld [vmem:[%s5915_s5 + $0x3c0] sm:$0xff]  ;;  %v2722_v36 = vld [vmem:[%s5915_s5 + $0x638] sm:$0xff] }
 0x227   :  { %3424 = vmatprep.subr.mxu1 %v3918_v3  ;;  %3324 = vmatpush3.msra.mxu0 %v2613_v39  ;;  %v2642_v39 = vld [vmem:[%s5915_s5 + $0x3b8] sm:$0xff]  ;;  %3895 = vpow2.f32 %v733_v22  ;;  %v2720_v22 = vld [vmem:[%s5915_s5 + $0x628] sm:$0xff] }
 0x228   :  { %3425 = vmatpush3.msra.mxu1 %v2663_v16  ;;  %3325 = vmatprep.subr.mxu0 %v3918_v3  ;;  %v2641_v16 = vld [vmem:[%s5915_s5 + $0x3b0] sm:$0xff] }
 0x229   :  { %3426 = vmatprep.subr.mxu1 %v3918_v3  ;;  %3326 = vmatpush3.msra.mxu0 %v2612_v21  ;;  %v2691_v21 = vld [vmem:[%s5915_s5 + $0x540] sm:$0xff] }
 0x22a   :  { %3427 = vmatpush3.msra.mxu1 %v2662_v42  ;;  %3327 = vmatprep.subr.mxu0 %v3918_v3  ;;  %v2640_v42 = vld [vmem:[%s5915_s5 + $0x3a8] sm:$0xff] }
 0x22b   :  { %3428 = vmatprep.subr.mxu1 %v3918_v3  ;;  %3328 = vmatpush3.msra.mxu0 %v2611_v5  ;;  %v2639_v5 = vld [vmem:[%s5915_s5 + $0x3a0] sm:$0xff] }
 0x22c   :  { %3429 = vmatpush3.msra.mxu1 %v2661_v46  ;;  %3329 = vmatprep.subr.mxu0 %v3918_v3  ;;  %v2689_v46 = vld [vmem:[%s5915_s5 + $0x530] sm:$0xff] }
 0x22d   :  { %3430 = vmatprep.subr.mxu1 %v3918_v3  ;;  %3330 = vmatpush3.msra.mxu0 %v2610_v47  ;;  %v2638_v47 = vld [vmem:[%s5915_s5 + $0x398] sm:$0xff] }
 0x22e   :  { %3431 = vmatpush3.msra.mxu1 %v2660_v27  ;;  %3331 = vmatprep.subr.mxu0 %v3918_v3  ;;  %v2688_v27 = vld [vmem:[%s5915_s5 + $0x528] sm:$0xff] }
 0x22f   :  { %3432 = vmatprep.subr.mxu1 %v3918_v3  ;;  %3332 = vmatpush3.msra.mxu0 %v2609_v10  ;;  %v2637_v10 = vld [vmem:[%s5915_s5 + $0x390] sm:$0xff] }
 0x230   :  { %3433 = vmatpush3.msra.mxu1 %v2659_v51  ;;  %3333 = vmatprep.subr.mxu0 %v3918_v3 }
 0x231   :  { %3434 = vmatprep.subr.mxu1 %v3918_v3  ;;  %3334 = vmatpush3.msra.mxu0 %v2608_v52  ;;  %v3894_v51 = vpop.eup %3893  ;;  %v2687_v52 = vld [vmem:[%s5915_s5 + $0x520] sm:$0xff] }
 0x232   :  { %3435 = vmatpush3.msra.mxu1 %v2658_v44  ;;  %3335 = vmatprep.subr.mxu0 %v3918_v3  ;;  %v2686_v44 = vld [vmem:[%s5915_s5 + $0x518] sm:$0xff] }
 0x233   :  { %3436 = vmatprep.subr.mxu1 %v3918_v3  ;;  %3336 = vmatpush3.msra.mxu0 %v2607_v23  ;;  %v2635_v23 = vld [vmem:[%s5915_s5 + $0x380] sm:$0xff] }
 0x234   :  { %3437 = vmatpush3.msra.mxu1 %v2657_v56  ;;  %3337 = vmatprep.subr.mxu0 %v3918_v3  ;;  %v2528_v56 = vadd.f32 -1.0, %v3894_v51  ;;  %v2713_v51 = vld [vmem:[%s5915_s5 + $0x5f0] sm:$0xff] }
 0x235   :  { %3438 = vmatprep.subr.mxu1 %v3918_v3  ;;  %3338 = vmatpush3.msra.mxu0 %v2606_v59  ;;  %v3896_v59 = vpop.eup %3895 }
 0x236   :  { %3439 = vmatpush3.msra.mxu1 %v2656_v53  ;;  %3339 = vmatprep.subr.mxu0 %v3918_v3  ;;  %v2682_v53 = vld [vmem:[%s5915_s5 + $0x4f8] sm:$0xff] }
 0x237   :  { %3440 = vmatprep.subr.mxu1 %v3918_v3  ;;  %3340 = vmatpush3.msra.mxu0 %v2605_v63  ;;  %v774_v63 = vsel %vm684_vm13, %v5091_v19, %v2528_v56  ;;  %v2677_v19 = vld [vmem:[%s5915_s5 + $0x4d0] sm:$0xff] }
 0x238   :  { %3441 = vmatpush3.msra.mxu1 %v2655_v4  ;;  %3341 = vmatprep.subr.mxu0 %v3918_v3  ;;  %v2531_v4 = vadd.f32 -1.0, %v3896_v59  ;;  %v2711_v59 = vld [vmem:[%s5915_s5 + $0x5e0] sm:$0xff] }
 0x239   :  { %3442 = vmatprep.subr.mxu1 %v3918_v3  ;;  %3342 = vmatpush3.msra.mxu0 %v2604_v37  ;;  %v2681_v37 = vld [vmem:[%s5915_s5 + $0x4f0] sm:$0xff] }
 0x23a   :  { %3443 = vmatpush3.msra.mxu1 %v2654_v57  ;;  %3343 = vmatprep.subr.mxu0 %v3918_v3  ;;  %v5237_v57 = vadd.f32 %v4624_v12, %v4684_v49  ;;  %v777_v12 = vsel %vm687_vm14, %v5116_v28, %v2531_v4  ;;  %v2730_v49 = vld [vmem:[%s5915_s5 + $0x678] sm:$0xff]  ;;  %v2725_v28 = vld [vmem:[%s5915_s5 + $0x650] sm:$0xff] }
 0x23b   :  { %3444 = vmatprep.subr.mxu1 %v3918_v3  ;;  %3344 = vmatpush3.msra.mxu0 %v2603_v7  ;;  %v2683_v7 = vld [vmem:[%s5915_s5 + $0x500] sm:$0xff]  ;;  %v2709_v4 = vld [vmem:[%s5915_s5 + $0x5d0] sm:$0xff] }
 0x23c   :  { %3345 = vmatprep.mubr.msk.f32.mxu0 %vm3919_vm4, %v3918_v3  ;;  %3445 = vmatpush3.msra.mxu1 %v2653_v11  ;;  %v704_v9 = vmin.f32 %v5237_v57, 0.0  ;;  %v2679_v11 = vld [vmem:[%s5915_s5 + $0x4e0] sm:$0xff]  ;;  %vm686_vm15 = vcmp.gt.f32.partialorder %v5237_v57, 0.0 }
 0x23d   :  { %3346 = vmatmul.mubr.f32.vlgmr.msra.gmra.mxu0 %v772_v15  ;;  %3383 = vmatprep.subr.mxu0 %v3918_v3 }
 0x23e   :  { %3446 = vmatprep.subr.mxu1 %v3918_v3  ;;  %3384 = vmatpush3.msra.mxu0 %v2650_v14  ;;  %v5263_v14 = vld [vmem:[%s5917_s4] ss:$0 sm:$0xff] }
 0x23f   :  { %3447 = vmatpush3.msra.mxu1 %v2652_v61  ;;  %3385 = vmatprep.subr.mxu0 %v3918_v3  ;;  %v5267_v15 = vadd.f32 %v5263_v14, %v4738_v13  ;;  %v2729_v61 = vld [vmem:[%s5915_s5 + $0x670] sm:$0xff]  ;;  %v2728_v13 = vld [vmem:[%s5915_s5 + $0x668] sm:$0xff] }
 0x240   :  { %3448 = vmatprep.subr.mxu1 %v3918_v3  ;;  %3386 = vmatpush3.msra.mxu0 %v2649_v18  ;;  %v731_v18 = vmul.f32 1.442695, %v704_v9  ;;  %v2757_v9 = vld [vmem:[%s5915_s5 + $0x750] sm:$0xff] }
 0x241   :  { %3449 = vmatpush3.msra.mxu1 %v2651_v1  ;;  %3387 = vmatprep.subr.mxu0 %v3918_v3  ;;  %v707_v1 = vmin.f32 %v5267_v15, 0.0  ;;  %vm689_vm0 = vcmp.gt.f32.partialorder %v5267_v15, 0.0 }
 0x242   :  { %3450 = vmatprep.mubr.msk.f32.mxu1 %vm3919_vm4, %v3918_v3  ;;  %3488 = vmatprep.subr.mxu1 %v3918_v3  ;;  %3897 = vpow2.f32 %v731_v18  ;;  %v2754_v18 = vld [vmem:[%s5915_s5 + $0x738] sm:$0xff] }
 0x243   :  { %3388 = vmatpush3.msra.mxu0 %v2648_v20  ;;  %3451 = vmatmul.mubr.f32.vlgmr.msra.gmra.mxu1 %v775_v38  ;;  %v2727_v20 = vld [vmem:[%s5915_s5 + $0x660] sm:$0xff]  ;;  %v2676_v38 = vld [vmem:[%s5915_s5 + $0x4c8] sm:$0xff]  ;;  %v737_v24 = vmul.f32 1.442695, %v707_v1  ;;  %v2753_v1 = vld [vmem:[%s5915_s5 + $0x730] sm:$0xff] }
 0x244   :  { %3489 = vmatpush3.msra.mxu1 %v2698_v55  ;;  %3389 = vmatprep.subr.mxu0 %v3918_v3  ;;  %v2726_v55 = vld [vmem:[%s5915_s5 + $0x658] sm:$0xff] }
 0x245   :  { %3490 = vmatprep.subr.mxu1 %v3918_v3  ;;  %3390 = vmatpush3.msra.mxu0 %v2647_v25  ;;  %v2675_v25 = vld [vmem:[%s5915_s5 + $0x4c0] sm:$0xff]  ;;  %3899 = vpow2.f32 %v737_v24  ;;  %v2701_v24 = vld [vmem:[%s5915_s5 + $0x590] sm:$0xff] }
 0x246   :  { %3491 = vmatpush3.msra.mxu1 %v2697_v6  ;;  %3391 = vmatprep.subr.mxu0 %v3918_v3  ;;  %v2674_v6 = vld [vmem:[%s5915_s5 + $0x4b8] sm:$0xff] }
 0x247   :  { %3492 = vmatprep.subr.mxu1 %v3918_v3  ;;  %3392 = vmatpush3.msra.mxu0 %v2646_v29  ;;  %v2724_v29 = vld [vmem:[%s5915_s5 + $0x648] sm:$0xff] }
 0x248   :  { %3493 = vmatpush3.msra.mxu1 %v2696_v58  ;;  %3393 = vmatprep.subr.mxu0 %v3918_v3  ;;  %v2673_v58 = vld [vmem:[%s5915_s5 + $0x4b0] sm:$0xff] }
 0x249   :  { %3494 = vmatprep.subr.mxu1 %v3918_v3  ;;  %3394 = vmatpush3.msra.mxu0 %v2645_v31  ;;  %v2672_v31 = vld [vmem:[%s5915_s5 + $0x4a8] sm:$0xff] }
 0x24a   :  { %3495 = vmatpush3.msra.mxu1 %v2695_v35  ;;  %3395 = vmatprep.subr.mxu0 %v3918_v3  ;;  %v2671_v35 = vld [vmem:[%s5915_s5 + $0x4a0] sm:$0xff] }
 0x24b   :  { %3496 = vmatprep.subr.mxu1 %v3918_v3  ;;  %3396 = vmatpush3.msra.mxu0 %v2644_v32  ;;  %v2721_v32 = vld [vmem:[%s5915_s5 + $0x630] sm:$0xff] }
 0x24c   :  { %3497 = vmatpush3.msra.mxu1 %v2694_v33  ;;  %3397 = vmatprep.subr.mxu0 %v3918_v3  ;;  %v2670_v33 = vld [vmem:[%s5915_s5 + $0x498] sm:$0xff] }
 0x24d   :  { %3498 = vmatprep.subr.mxu1 %v3918_v3  ;;  %3398 = vmatpush3.msra.mxu0 %v2643_v50  ;;  %v2669_v50 = vld [vmem:[%s5915_s5 + $0x490] sm:$0xff] }
 0x24e   :  { %3499 = vmatpush3.msra.mxu1 %v2693_v34  ;;  %3399 = vmatprep.subr.mxu0 %v3918_v3 }
 0x24f   :  { %3500 = vmatprep.subr.mxu1 %v3918_v3  ;;  %3400 = vmatpush3.msra.mxu0 %v2642_v39  ;;  %v3898_v34 = vpop.eup %3897  ;;  %v2719_v39 = vld [vmem:[%s5915_s5 + $0x620] sm:$0xff] }
 0x250   :  { %3501 = vmatpush3.msra.mxu1 %v2692_v40  ;;  %3401 = vmatprep.subr.mxu0 %v3918_v3  ;;  %v2668_v40 = vld [vmem:[%s5915_s5 + $0x488] sm:$0xff] }
 0x251   :  { %3502 = vmatprep.subr.mxu1 %v3918_v3  ;;  %3402 = vmatpush3.msra.mxu0 %v2641_v16  ;;  %v2718_v16 = vld [vmem:[%s5915_s5 + $0x618] sm:$0xff] }
 0x252   :  { %3503 = vmatpush3.msra.mxu1 %v2691_v21  ;;  %3403 = vmatprep.subr.mxu0 %v3918_v3  ;;  %v2667_v21 = vld [vmem:[%s5915_s5 + $0x480] sm:$0xff] }
 0x253   :  { %3504 = vmatprep.subr.mxu1 %v3918_v3  ;;  %3404 = vmatpush3.msra.mxu0 %v2640_v42  ;;  %v2530_v42 = vadd.f32 -1.0, %v3898_v34  ;;  %v2748_v34 = vld [vmem:[%s5915_s5 + $0x708] sm:$0xff] }
 0x254   :  { %3505 = vmatpush3.msra.mxu1 %v2690_v43  ;;  %3405 = vmatprep.subr.mxu0 %v3918_v3  ;;  %v3900_v43 = vpop.eup %3899 }
 0x255   :  { %3506 = vmatprep.subr.mxu1 %v3918_v3  ;;  %3406 = vmatpush3.msra.mxu0 %v2639_v5  ;;  %v2717_v5 = vld [vmem:[%s5915_s5 + $0x610] sm:$0xff] }
 0x256   :  { %3507 = vmatpush3.msra.mxu1 %v2689_v46  ;;  %3407 = vmatprep.subr.mxu0 %v3918_v3  ;;  %v2714_v46 = vld [vmem:[%s5915_s5 + $0x5f8] sm:$0xff] }
 0x257   :  { %3508 = vmatprep.subr.mxu1 %v3918_v3  ;;  %3408 = vmatpush3.msra.mxu0 %v2638_v47  ;;  %v776_v47 = vsel %vm686_vm15, %v5237_v57, %v2530_v42  ;;  %v2759_v57 = vld [vmem:[%s5915_s5 + $0x760] sm:$0xff]  ;;  %v2744_v42 = vld [vmem:[%s5915_s5 + $0x6e8] sm:$0xff] }
 0x258   :  { %3509 = vmatpush3.msra.mxu1 %v2688_v27  ;;  %3409 = vmatprep.subr.mxu0 %v3918_v3  ;;  %v2716_v27 = vld [vmem:[%s5915_s5 + $0x608] sm:$0xff] }
 0x259   :  { %3510 = vmatprep.subr.mxu1 %v3918_v3  ;;  %3410 = vmatpush3.msra.mxu0 %v2637_v10  ;;  %v2533_v10 = vadd.f32 -1.0, %v3900_v43  ;;  %v2794_v43 = vld [vmem:[%s5915_s5 + $0x878] sm:$0xff] }
 0x25a   :  { %3511 = vmatpush3.msra.mxu1 %v2687_v52  ;;  %3411 = vmatprep.subr.mxu0 %v3918_v3  ;;  %v5388_v52 = vadd.f32 %v5263_v14, %v4720_v26 }
 0x25b   :  { %3512 = vmatprep.subr.mxu1 %v3918_v3  ;;  %3412 = vmatpush3.msra.mxu0 %v2636_v54  ;;  %v2715_v54 = vld [vmem:[%s5915_s5 + $0x600] sm:$0xff]  ;;  %v779_v26 = vsel %vm689_vm0, %v5267_v15, %v2533_v10  ;;  %v2756_v15 = vld [vmem:[%s5915_s5 + $0x748] sm:$0xff] }
 0x25c   :  { %3513 = vmatpush3.msra.mxu1 %v2686_v44  ;;  %3413 = vmatprep.subr.mxu0 %v3918_v3  ;;  %v2712_v44 = vld [vmem:[%s5915_s5 + $0x5e8] sm:$0xff]  ;;  %v706_v56 = vmin.f32 %v5388_v52, 0.0  ;;  %vm688_vm1 = vcmp.gt.f32.partialorder %v5388_v52, 0.0 }
 0x25d   :  { %3514 = vmatprep.subr.mxu1 %v3918_v3  ;;  %3414 = vmatpush3.msra.mxu0 %v2635_v23  ;;  %v2762_v23 = vld [vmem:[%s5915_s5 + $0x778] sm:$0xff] }
 0x25e   :  { %3415 = vmatprep.mubr.msk.f32.mxu0 %vm3919_vm4, %v3918_v3  ;;  %3515 = vmatpush3.msra.mxu1 %v2685_v62  ;;  %v5413_v62 = vadd.f32 %v5263_v14, %v4886_v2  ;;  %v2760_v2 = vld [vmem:[%s5915_s5 + $0x768] sm:$0xff] }
 0x25f   :  { %3416 = vmatmul.mubr.f32.vlgmr.msra.gmra.mxu0 %v774_v63  ;;  %3453 = vmatprep.subr.mxu0 %v3918_v3  ;;  %v2710_v63 = vld [vmem:[%s5915_s5 + $0x5d8] sm:$0xff] }
 0x260   :  { %3516 = vmatprep.subr.mxu1 %v3918_v3  ;;  %3454 = vmatpush3.msra.mxu0 %v2682_v53  ;;  %v2761_v53 = vld [vmem:[%s5915_s5 + $0x770] sm:$0xff]  ;;  %vm691_vm2 = vcmp.gt.f32.partialorder %v5413_v62, 0.0 }
 0x261   :  { %3517 = vmatpush3.msra.mxu1 %v2684_v0  ;;  %3455 = vmatprep.subr.mxu0 %v3918_v3  ;;  %v735_v0 = vmul.f32 1.442695, %v706_v56  ;;  %v2790_v56 = vld [vmem:[%s5915_s5 + $0x858] sm:$0xff] }
 0x262   :  { %3518 = vmatprep.subr.mxu1 %v3918_v3  ;;  %3456 = vmatpush3.msra.mxu0 %v2681_v37  ;;  %v709_v37 = vmin.f32 %v5413_v62, 0.0 }
 0x263   :  { %3519 = vmatpush3.msra.mxu1 %v2683_v7  ;;  %3457 = vmatprep.subr.mxu0 %v3918_v3  ;;  %v2708_v7 = vld [vmem:[%s5915_s5 + $0x5c8] sm:$0xff]  ;;  %3901 = vpow2.f32 %v735_v0  ;;  %v2787_v0 = vld [vmem:[%s5915_s5 + $0x840] sm:$0xff] }
 0x264   :  { %3520 = vmatprep.mubr.msk.f32.mxu1 %vm3919_vm4, %v3918_v3  ;;  %3558 = vmatprep.subr.mxu1 %v3918_v3 }
 0x265   :  { %3458 = vmatpush3.msra.mxu0 %v2680_v8  ;;  %3521 = vmatmul.mubr.f32.vlgmr.msra.gmra.mxu1 %v777_v12  ;;  %v2758_v8 = vld [vmem:[%s5915_s5 + $0x758] sm:$0xff]  ;;  %v741_v12 = vmul.f32 1.442695, %v709_v37 }
 0x266   :  { %3559 = vmatpush3.msra.mxu1 %v2730_v49  ;;  %3459 = vmatprep.subr.mxu0 %v3918_v3  ;;  %v2707_v49 = vld [vmem:[%s5915_s5 + $0x5c0] sm:$0xff]  ;;  %v2786_v37 = vld [vmem:[%s5915_s5 + $0x838] sm:$0xff] }
 0x267   :  { %3560 = vmatprep.subr.mxu1 %v3918_v3  ;;  %3460 = vmatpush3.msra.mxu0 %v2679_v11  ;;  %v2706_v11 = vld [vmem:[%s5915_s5 + $0x5b8] sm:$0xff]  ;;  %3903 = vpow2.f32 %v741_v12 }
 0x268   :  { %3561 = vmatpush3.msra.mxu1 %v2729_v61  ;;  %3461 = vmatprep.subr.mxu0 %v3918_v3  ;;  %v2705_v61 = vld [vmem:[%s5915_s5 + $0x5b0] sm:$0xff]  ;;  %v2734_v12 = vld [vmem:[%s5915_s5 + $0x698] sm:$0xff] }
 0x269   :  { %3562 = vmatprep.subr.mxu1 %v3918_v3  ;;  %3462 = vmatpush3.msra.mxu0 %v2678_v48  ;;  %v2755_v48 = vld [vmem:[%s5915_s5 + $0x740] sm:$0xff] }
 0x26a   :  { %3563 = vmatpush3.msra.mxu1 %v2728_v13  ;;  %3463 = vmatprep.subr.mxu0 %v3918_v3  ;;  %v2704_v13 = vld [vmem:[%s5915_s5 + $0x5a8] sm:$0xff] }
 0x26b   :  { %3564 = vmatprep.subr.mxu1 %v3918_v3  ;;  %3464 = vmatpush3.msra.mxu0 %v2677_v19  ;;  %v2703_v19 = vld [vmem:[%s5915_s5 + $0x5a0] sm:$0xff] }
 0x26c   :  { %3565 = vmatpush3.msra.mxu1 %v2727_v20  ;;  %3465 = vmatprep.subr.mxu0 %v3918_v3  ;;  %v2702_v20 = vld [vmem:[%s5915_s5 + $0x598] sm:$0xff] }
 0x26d   :  { %3566 = vmatprep.subr.mxu1 %v3918_v3  ;;  %3466 = vmatpush3.msra.mxu0 %v2676_v38  ;;  %v2752_v38 = vld [vmem:[%s5915_s5 + $0x728] sm:$0xff] }
 0x26e   :  { %3567 = vmatpush3.msra.mxu1 %v2726_v55  ;;  %3467 = vmatprep.subr.mxu0 %v3918_v3 }
 0x26f   :  { %3568 = vmatprep.subr.mxu1 %v3918_v3  ;;  %3468 = vmatpush3.msra.mxu0 %v2675_v25 }
 0x270   :  { %3569 = vmatpush3.msra.mxu1 %v2725_v28  ;;  %3469 = vmatprep.subr.mxu0 %v3918_v3  ;;  %v3902_v25 = vpop.eup %3901  ;;  %v2751_v28 = vld [vmem:[%s5915_s5 + $0x720] sm:$0xff] }
 0x271   :  { %3570 = vmatprep.subr.mxu1 %v3918_v3  ;;  %3470 = vmatpush3.msra.mxu0 %v2674_v6 }
 0x272   :  { %3571 = vmatpush3.msra.mxu1 %v2724_v29  ;;  %3471 = vmatprep.subr.mxu0 %v3918_v3  ;;  %v2700_v29 = vld [vmem:[%s5915_s5 + $0x588] sm:$0xff] }
 0x273   :  { %3572 = vmatprep.subr.mxu1 %v3918_v3  ;;  %3472 = vmatpush3.msra.mxu0 %v2673_v58  ;;  %v2750_v58 = vld [vmem:[%s5915_s5 + $0x718] sm:$0xff] }
 0x274   :  { %3573 = vmatpush3.msra.mxu1 %v2723_v30  ;;  %3473 = vmatprep.subr.mxu0 %v3918_v3 }
 0x275   :  { %3574 = vmatprep.subr.mxu1 %v3918_v3  ;;  %3474 = vmatpush3.msra.mxu0 %v2672_v31  ;;  %v2699_v31 = vld [vmem:[%s5915_s5 + $0x580] sm:$0xff] }
 0x276   :  { %3575 = vmatpush3.msra.mxu1 %v2722_v36  ;;  %3475 = vmatprep.subr.mxu0 %v3918_v3  ;;  %v2532_v36 = vadd.f32 -1.0, %v3902_v25 }
 0x277   :  { %3576 = vmatprep.subr.mxu1 %v3918_v3  ;;  %3476 = vmatpush3.msra.mxu0 %v2671_v35  ;;  %v3904_v35 = vpop.eup %3903 }
 0x278   :  { %3577 = vmatpush3.msra.mxu1 %v2721_v32  ;;  %3477 = vmatprep.subr.mxu0 %v3918_v3  ;;  %v2749_v32 = vld [vmem:[%s5915_s5 + $0x710] sm:$0xff] }
 0x279   :  { %3578 = vmatprep.subr.mxu1 %v3918_v3  ;;  %3478 = vmatpush3.msra.mxu0 %v2670_v33 }
 0x27a   :  { %3579 = vmatpush3.msra.mxu1 %v2720_v22  ;;  %3479 = vmatprep.subr.mxu0 %v3918_v3  ;;  %v2746_v22 = vld [vmem:[%s5915_s5 + $0x6f8] sm:$0xff] }
 0x27b   :  { %3580 = vmatprep.subr.mxu1 %v3918_v3  ;;  %3480 = vmatpush3.msra.mxu0 %v2669_v50  ;;  %v778_v50 = vsel %vm688_vm1, %v5388_v52, %v2532_v36  ;;  %v2779_v36 = vld [vmem:[%s5915_s5 + $0x800] sm:$0xff] }
 0x27c   :  { %3581 = vmatpush3.msra.mxu1 %v2719_v39  ;;  %3481 = vmatprep.subr.mxu0 %v3918_v3  ;;  %v2535_v39 = vadd.f32 -1.0, %v3904_v35  ;;  %v2776_v35 = vld [vmem:[%s5915_s5 + $0x7e8] sm:$0xff] }
 0x27d   :  { %3582 = vmatprep.subr.mxu1 %v3918_v3  ;;  %3482 = vmatpush3.msra.mxu0 %v2668_v40  ;;  %v2745_v40 = vld [vmem:[%s5915_s5 + $0x6f0] sm:$0xff] }
 0x27e   :  { %3583 = vmatpush3.msra.mxu1 %v2718_v16  ;;  %3483 = vmatprep.subr.mxu0 %v3918_v3  ;;  %v5538_v16 = vadd.f32 %v5263_v14, %v4816_v41  ;;  %v781_v41 = vsel %vm691_vm2, %v5413_v62, %v2535_v39  ;;  %v2789_v62 = vld [vmem:[%s5915_s5 + $0x850] sm:$0xff]  ;;  %v2772_v39 = vld [vmem:[%s5915_s5 + $0x7c8] sm:$0xff] }
 0x27f   :  { %3584 = vmatprep.subr.mxu1 %v3918_v3  ;;  %3484 = vmatpush3.msra.mxu0 %v2667_v21  ;;  %v2747_v21 = vld [vmem:[%s5915_s5 + $0x700] sm:$0xff] }
 0x280   :  { %3485 = vmatprep.mubr.msk.f32.mxu0 %vm3919_vm4, %v3918_v3  ;;  %3585 = vmatpush3.msra.mxu1 %v2717_v5  ;;  %v5556_v5 = vadd.f32 %v5263_v14, %v5016_v17  ;;  %v2742_v17 = vld [vmem:[%s5915_s5 + $0x6d8] sm:$0xff]  ;;  %vm690_vm3 = vcmp.gt.f32.partialorder %v5538_v16, 0.0 }
 0x281   :  { %3486 = vmatmul.mubr.f32.vlgmr.msra.gmra.mxu0 %v776_v47  ;;  %3523 = vmatprep.subr.mxu0 %v3918_v3  ;;  %v2743_v47 = vld [vmem:[%s5915_s5 + $0x6e0] sm:$0xff] }
 0x282   :  { %3586 = vmatprep.subr.mxu1 %v3918_v3  ;;  %3524 = vmatpush3.msra.mxu0 %v2714_v46  ;;  %v708_v46 = vmin.f32 %v5538_v16, 0.0  ;;  %v711_v10 = vmin.f32 %v5556_v5, 0.0  ;;  %vm693_vm5 = vcmp.gt.f32.partialorder %v5556_v5, 0.0 }
 0x283   :  { %3587 = vmatpush3.msra.mxu1 %v2716_v27  ;;  %3525 = vmatprep.subr.mxu0 %v3918_v3  ;;  %v2793_v27 = vld [vmem:[%s5915_s5 + $0x870] sm:$0xff] }
 0x284   :  { %3588 = vmatprep.subr.mxu1 %v3918_v3  ;;  %3526 = vmatpush3.msra.mxu0 %v2713_v51  ;;  %v2792_v51 = vld [vmem:[%s5915_s5 + $0x868] sm:$0xff]  ;;  %v739_v52 = vmul.f32 1.442695, %v708_v46 }
 0x285   :  { %3589 = vmatpush3.msra.mxu1 %v2715_v54  ;;  %3527 = vmatprep.subr.mxu0 %v3918_v3  ;;  %v2741_v54 = vld [vmem:[%s5915_s5 + $0x6d0] sm:$0xff] }
 0x286   :  { %3590 = vmatprep.mubr.msk.f32.mxu1 %vm3919_vm4, %v3918_v3  ;;  %3628 = vmatprep.subr.mxu1 %v3918_v3  ;;  %3905 = vpow2.f32 %v739_v52 }
 0x287   :  { %3528 = vmatpush3.msra.mxu0 %v2712_v44  ;;  %3591 = vmatmul.mubr.f32.vlgmr.msra.gmra.mxu1 %v779_v26  ;;  %v2791_v44 = vld [vmem:[%s5915_s5 + $0x860] sm:$0xff]  ;;  %v2740_v26 = vld [vmem:[%s5915_s5 + $0x6c8] sm:$0xff] }
 0x288   :  { %3629 = vmatpush3.msra.mxu1 %v2762_v23  ;;  %3529 = vmatprep.subr.mxu0 %v3918_v3  ;;  %v745_v23 = vmul.f32 1.442695, %v711_v10 }
 0x289   :  { %3630 = vmatprep.subr.mxu1 %v3918_v3  ;;  %3530 = vmatpush3.msra.mxu0 %v2711_v59  ;;  %v2739_v59 = vld [vmem:[%s5915_s5 + $0x6c0] sm:$0xff] }
 0x28a   :  { %3631 = vmatpush3.msra.mxu1 %v2761_v53  ;;  %3531 = vmatprep.subr.mxu0 %v3918_v3  ;;  %v2738_v53 = vld [vmem:[%s5915_s5 + $0x6b8] sm:$0xff]  ;;  %3907 = vpow2.f32 %v745_v23 }
 0x28b   :  { %3632 = vmatprep.subr.mxu1 %v3918_v3  ;;  %3532 = vmatpush3.msra.mxu0 %v2710_v63  ;;  %v2788_v63 = vld [vmem:[%s5915_s5 + $0x848] sm:$0xff]  ;;  %v2810_v23 = vld [vmem:[%s5915_s5 + $0x8f8] sm:$0xff] }
 0x28c   :  { %3633 = vmatpush3.msra.mxu1 %v2760_v2  ;;  %3533 = vmatprep.subr.mxu0 %v3918_v3  ;;  %v2737_v2 = vld [vmem:[%s5915_s5 + $0x6b0] sm:$0xff] }
 0x28d   :  { %3634 = vmatprep.subr.mxu1 %v3918_v3  ;;  %3534 = vmatpush3.msra.mxu0 %v2709_v4  ;;  %v2736_v4 = vld [vmem:[%s5915_s5 + $0x6a8] sm:$0xff] }
 0x28e   :  { %3635 = vmatpush3.msra.mxu1 %v2759_v57  ;;  %3535 = vmatprep.subr.mxu0 %v3918_v3  ;;  %v2735_v57 = vld [vmem:[%s5915_s5 + $0x6a0] sm:$0xff] }
 0x28f   :  { %3636 = vmatprep.subr.mxu1 %v3918_v3  ;;  %3536 = vmatpush3.msra.mxu0 %v2708_v7  ;;  %v2785_v7 = vld [vmem:[%s5915_s5 + $0x830] sm:$0xff] }
 0x290   :  { %3637 = vmatpush3.msra.mxu1 %v2758_v8  ;;  %3537 = vmatprep.subr.mxu0 %v3918_v3 }
 0x291   :  { %3638 = vmatprep.subr.mxu1 %v3918_v3  ;;  %3538 = vmatpush3.msra.mxu0 %v2707_v49 }
 0x292   :  { %3639 = vmatpush3.msra.mxu1 %v2757_v9  ;;  %3539 = vmatprep.subr.mxu0 %v3918_v3  ;;  %v2784_v9 = vld [vmem:[%s5915_s5 + $0x828] sm:$0xff] }
 0x293   :  { %3640 = vmatprep.subr.mxu1 %v3918_v3  ;;  %3540 = vmatpush3.msra.mxu0 %v2706_v11 }
 0x294   :  { %3641 = vmatpush3.msra.mxu1 %v2756_v15  ;;  %3541 = vmatprep.subr.mxu0 %v3918_v3  ;;  %v2733_v15 = vld [vmem:[%s5915_s5 + $0x690] sm:$0xff] }
 0x295   :  { %3642 = vmatprep.subr.mxu1 %v3918_v3  ;;  %3542 = vmatpush3.msra.mxu0 %v2705_v61 }
 0x296   :  { %3643 = vmatpush3.msra.mxu1 %v2755_v48  ;;  %3543 = vmatprep.subr.mxu0 %v3918_v3  ;;  %v3906_v48 = vpop.eup %3905 }
 0x297   :  { %3644 = vmatprep.subr.mxu1 %v3918_v3  ;;  %3544 = vmatpush3.msra.mxu0 %v2704_v13  ;;  %v2783_v13 = vld [vmem:[%s5915_s5 + $0x820] sm:$0xff] }
 0x298   :  { %3645 = vmatpush3.msra.mxu1 %v2754_v18  ;;  %3545 = vmatprep.subr.mxu0 %v3918_v3  ;;  %v2732_v18 = vld [vmem:[%s5915_s5 + $0x688] sm:$0xff] }
 0x299   :  { %3646 = vmatprep.subr.mxu1 %v3918_v3  ;;  %3546 = vmatpush3.msra.mxu0 %v2703_v19  ;;  %v5491_v55 = vpop.f32.mrf.mxu0  ;;  %v2782_v19 = vld [vmem:[%s5915_s5 + $0x818] sm:$0xff] }
 0x29a   :  { %3647 = vmatpush3.msra.mxu1 %v2753_v1  ;;  %3547 = vmatprep.subr.mxu0 %v3918_v3 }
 0x29b   :  { %3648 = vmatprep.subr.mxu1 %v3918_v3  ;;  %3548 = vmatpush3.msra.mxu0 %v2702_v20  ;;  %v3172_v6 = vpop.f32.mrf.mxu0  ;;  %v3908_v20 = vpop.eup %3907 }
 0x29c   :  { %3649 = vmatpush3.msra.mxu1 %v2752_v38  ;;  %3549 = vmatprep.subr.mxu0 %v3918_v3  ;;  %v2731_v38 = vld [vmem:[%s5915_s5 + $0x680] sm:$0xff]  ;;  %v2537_v6 = vadd.f32 -1.0, %v3908_v20 }
 0x29d   :  { %3650 = vmatprep.subr.mxu1 %v3918_v3  ;;  %3550 = vmatpush3.msra.mxu0 %v2701_v24  ;;  %v5509_v30 = vpop.f32.mrf.mxu1  ;;  %v2781_v24 = vld [vmem:[%s5915_s5 + $0x810] sm:$0xff] }
 0x29e   :  { %3651 = vmatpush3.msra.mxu1 %v2751_v28  ;;  %3551 = vmatprep.subr.mxu0 %v3918_v3  ;;  %v2778_v28 = vld [vmem:[%s5915_s5 + $0x7f8] sm:$0xff] }
 0x29f   :  { %3652 = vmatprep.subr.mxu1 %v3918_v3  ;;  %3552 = vmatpush3.msra.mxu0 %v2700_v29  ;;  %v3242_v33 = vpop.f32.mrf.mxu1 }
 0x2a0   :  { %3653 = vmatpush3.msra.mxu1 %v2750_v58  ;;  %3553 = vmatprep.subr.mxu0 %v3918_v3  ;;  %v2780_v58 = vld [vmem:[%s5915_s5 + $0x808] sm:$0xff]  ;;  %v2775_v33 = vld [vmem:[%s5915_s5 + $0x7e0] sm:$0xff] }
 0x2a1   :  { %3654 = vmatprep.subr.mxu1 %v3918_v3  ;;  %3554 = vmatpush3.msra.mxu0 %v2699_v31  ;;  %v2777_v31 = vld [vmem:[%s5915_s5 + $0x7f0] sm:$0xff] }
 0x2a2   :  { %3555 = vmatprep.mubr.msk.f32.mxu0 %vm3919_vm4, %v3918_v3  ;;  %3655 = vmatpush3.msra.mxu1 %v2749_v32 }
 0x2a3   :  { %3556 = vmatmul.mubr.f32.vlgmr.msra.gmra.mxu0 %v778_v50  ;;  %3593 = vmatprep.subr.mxu0 %v3918_v3 }
 0x2a4   :  { %3656 = vmatprep.subr.mxu1 %v3918_v3  ;;  %3594 = vmatpush3.msra.mxu0 %v2746_v22  ;;  %v2774_v22 = vld [vmem:[%s5915_s5 + $0x7d8] sm:$0xff] }
 0x2a5   :  { %3657 = vmatpush3.msra.mxu1 %v2748_v34  ;;  %3595 = vmatprep.subr.mxu0 %v3918_v3  ;;  %v2773_v34 = vld [vmem:[%s5915_s5 + $0x7d0] sm:$0xff] }
 0x2a6   :  { %3658 = vmatprep.subr.mxu1 %v3918_v3  ;;  %3596 = vmatpush3.msra.mxu0 %v2745_v40  ;;  %v2771_v40 = vld [vmem:[%s5915_s5 + $0x7c0] sm:$0xff] }
 0x2a7   :  { %3659 = vmatpush3.msra.mxu1 %v2747_v21  ;;  %3597 = vmatprep.subr.mxu0 %v3918_v3  ;;  %v2769_v21 = vld [vmem:[%s5915_s5 + $0x7b0] sm:$0xff] }
 0x2a8   :  { %3660 = vmatprep.mubr.msk.f32.mxu1 %vm3919_vm4, %v3918_v3  ;;  %3698 = vmatprep.subr.mxu1 %v3918_v3 }
 0x2a9   :  { %3598 = vmatpush3.msra.mxu0 %v2744_v42  ;;  %3661 = vmatmul.mubr.f32.vlgmr.msra.gmra.mxu1 %v781_v41  ;;  %v2768_v42 = vld [vmem:[%s5915_s5 + $0x7a8] sm:$0xff]  ;;  %v2767_v41 = vld [vmem:[%s5915_s5 + $0x7a0] sm:$0xff] }
 0x2aa   :  { %3699 = vmatpush3.msra.mxu1 %v2794_v43  ;;  %3599 = vmatprep.subr.mxu0 %v3918_v3 }
 0x2ab   :  { %3700 = vmatprep.subr.mxu1 %v3918_v3  ;;  %3600 = vmatpush3.msra.mxu0 %v2743_v47 }
 0x2ac   :  { %3701 = vmatpush3.msra.mxu1 %v2793_v27  ;;  %3601 = vmatprep.subr.mxu0 %v3918_v3 }
 0x2ad   :  { %3702 = vmatprep.subr.mxu1 %v3918_v3  ;;  %3602 = vmatpush3.msra.mxu0 %v2742_v17  ;;  %v2765_v17 = vld [vmem:[%s5915_s5 + $0x790] sm:$0xff] }
 0x2ae   :  { %3703 = vmatpush3.msra.mxu1 %v2792_v51  ;;  %3603 = vmatprep.subr.mxu0 %v3918_v3  ;;  %v2764_v51 = vld [vmem:[%s5915_s5 + $0x788] sm:$0xff] }
 0x2af   :  { %3704 = vmatprep.subr.mxu1 %v3918_v3  ;;  %3604 = vmatpush3.msra.mxu0 %v2741_v54 }
 0x2b0   :  { %3705 = vmatpush3.msra.mxu1 %v2791_v44  ;;  %3605 = vmatprep.subr.mxu0 %v3918_v3  ;;  %v2763_v44 = vld [vmem:[%s5915_s5 + $0x780] sm:$0xff] }
 0x2b1   :  { %3706 = vmatprep.subr.mxu1 %v3918_v3  ;;  %3606 = vmatpush3.msra.mxu0 %v2740_v26 }
 0x2b2   :  { %3707 = vmatpush3.msra.mxu1 %v2790_v56  ;;  %3607 = vmatprep.subr.mxu0 %v3918_v3  ;;  %v5771_v56 = vadd.f32 %v5263_v14, %v5034_v45  ;;  %v2808_v45 = vld [vmem:[%s5915_s5 + $0x8e8] sm:$0xff] }
 0x2b3   :  { %3708 = vmatprep.subr.mxu1 %v3918_v3  ;;  %3608 = vmatpush3.msra.mxu0 %v2739_v59 }
 0x2b4   :  { %3709 = vmatpush3.msra.mxu1 %v2789_v62  ;;  %3609 = vmatprep.subr.mxu0 %v3918_v3  ;;  %v2809_v62 = vld [vmem:[%s5915_s5 + $0x8f0] sm:$0xff] }
 0x2b5   :  { %3710 = vmatprep.subr.mxu1 %v3918_v3  ;;  %3610 = vmatpush3.msra.mxu0 %v2738_v53  ;;  %v2807_v53 = vld [vmem:[%s5915_s5 + $0x8e0] sm:$0xff] }
 0x2b6   :  { %3711 = vmatpush3.msra.mxu1 %v2788_v63  ;;  %3611 = vmatprep.subr.mxu0 %v3918_v3  ;;  %v2806_v63 = vld [vmem:[%s5915_s5 + $0x8d8] sm:$0xff] }
 0x2b7   :  { %3712 = vmatprep.subr.mxu1 %v3918_v3  ;;  %3612 = vmatpush3.msra.mxu0 %v2737_v2 }
 0x2b8   :  { %3713 = vmatpush3.msra.mxu1 %v2787_v0  ;;  %3613 = vmatprep.subr.mxu0 %v3918_v3  ;;  %v2805_v0 = vld [vmem:[%s5915_s5 + $0x8d0] sm:$0xff] }
 0x2b9   :  { %3714 = vmatprep.subr.mxu1 %v3918_v3  ;;  %3614 = vmatpush3.msra.mxu0 %v2736_v4  ;;  %v954_v8 = vpop.f32.mrf.mxu0  ;;  %v2804_v4 = vld [vmem:[%s5915_s5 + $0x8c8] sm:$0xff] }
 0x2ba   :  { %3715 = vmatpush3.msra.mxu1 %v2786_v37  ;;  %3615 = vmatprep.subr.mxu0 %v3918_v3  ;;  %v955_v49 = vadd.f32 %v954_v8, %v5491_v55  ;;  %v2534_v55 = vadd.f32 -1.0, %v3906_v48  ;;  %v2803_v37 = vld [vmem:[%s5915_s5 + $0x8c0] sm:$0xff]  ;;  %v2800_v8 = vld [vmem:[%s5915_s5 + $0x8a8] sm:$0xff] }
 0x2bb   :  { %3716 = vmatprep.subr.mxu1 %v3918_v3  ;;  %3616 = vmatpush3.msra.mxu0 %v2735_v57  ;;  %v3207_v11 = vpop.f32.mrf.mxu0  ;;  %v2802_v57 = vld [vmem:[%s5915_s5 + $0x8b8] sm:$0xff] }
 0x2bc   :  { %3717 = vmatpush3.msra.mxu1 %v2785_v7  ;;  %3617 = vmatprep.subr.mxu0 %v3918_v3  ;;  %v5647_v61 = vadd.f32 %v5509_v30, %v955_v49  ;;  %v780_v29 = vsel %vm690_vm3, %v5538_v16, %v2534_v55  ;;  %v5686_v30 = vadd.f32 %v5263_v14, %v4966_v60  ;;  %v2770_v16 = vld [vmem:[%s5915_s5 + $0x7b8] sm:$0xff]  ;;  %v712_v14 = vmin.f32 %v5771_v56, 0.0  ;;  %v2801_v7 = vld [vmem:[%s5915_s5 + $0x8b0] sm:$0xff] }
 0x2bd   :  { %3718 = vmatprep.subr.mxu1 %v3918_v3  ;;  %3618 = vmatpush3.msra.mxu0 %v2734_v12  ;;  %v783_v60 = vsel %vm693_vm5, %v5556_v5, %v2537_v6  ;;  %v2766_v5 = vld [vmem:[%s5915_s5 + $0x798] sm:$0xff]  ;;  %v2799_v12 = vld [vmem:[%s5915_s5 + $0x8a0] sm:$0xff] }
 0x2be   :  { %3719 = vmatpush3.msra.mxu1 %v2784_v9  ;;  %3619 = vmatprep.subr.mxu0 %v3918_v3  ;;  %v710_v32 = vmin.f32 %v5686_v30, 0.0  ;;  %vm692_vm6 = vcmp.gt.f32.partialorder %v5686_v30, 0.0  ;;  %v747_v2 = vmul.f32 1.442695, %v712_v14  ;;  %v2798_v49 = vld [vmem:[%s5915_s5 + $0x898] sm:$0xff] }
 0x2bf   :  { %3720 = vmatprep.subr.mxu1 %v3918_v3  ;;  %3620 = vmatpush3.msra.mxu0 %v2733_v15  ;;  %v5661_v1 = vpop.f32.mrf.mxu1  ;;  %v2797_v15 = vld [vmem:[%s5915_s5 + $0x890] sm:$0xff] }
 0x2c0   :  { %3721 = vmatpush3.msra.mxu1 %v2783_v13  ;;  %3621 = vmatprep.subr.mxu0 %v3918_v3  ;;  %v743_v50 = vmul.f32 1.442695, %v710_v32  ;;  %v2796_v13 = vld [vmem:[%s5915_s5 + $0x888] sm:$0xff] }
 0x2c1   :  { %3722 = vmatprep.subr.mxu1 %v3918_v3  ;;  %3622 = vmatpush3.msra.mxu0 %v2732_v18  ;;  %v3312_v25 = vpop.f32.mrf.mxu1 }
 0x2c2   :  { %3723 = vmatpush3.msra.mxu1 %v2782_v19  ;;  %3623 = vmatprep.subr.mxu0 %v3918_v3  ;;  %3909 = vpow2.f32 %v743_v50 }
 0x2c3   :  { %3724 = vmatprep.subr.mxu1 %v3918_v3  ;;  %3624 = vmatpush3.msra.mxu0 %v2731_v38  ;;  %3911 = vpow2.f32 %v747_v2 }
 0x2c4   :  { %3625 = vmatprep.mubr.msk.f32.mxu0 %vm3919_vm4, %v3918_v3  ;;  %3725 = vmatpush3.msra.mxu1 %v2781_v24 }
 0x2c5   :  { %3626 = vmatmul.mubr.f32.vlgmr.msra.gmra.mxu0 %v780_v29  ;;  %3663 = vmatprep.subr.mxu0 %v3918_v3 }
 0x2c6   :  { %3726 = vmatprep.subr.mxu1 %v3918_v3  ;;  %3664 = vmatpush3.msra.mxu0 %v2778_v28 }
 0x2c7   :  { %3727 = vmatpush3.msra.mxu1 %v2780_v58  ;;  %3665 = vmatprep.subr.mxu0 %v3918_v3 }
 0x2c8   :  { %3728 = vmatprep.subr.mxu1 %v3918_v3  ;;  %3666 = vmatpush3.msra.mxu0 %v2777_v31  ;;  %v2394_v31 = vld [vmem:[%s5918_s7 + $0x70] sm:$0xff] }
 0x2c9   :  { %3729 = vmatpush3.msra.mxu1 %v2779_v36  ;;  %3730 = vmatprep.mubr.msk.f32.mxu1 %vm3919_vm4, %v3918_v3  ;;  %v2393_v36 = vld [vmem:[%s5918_s7 + $0x68] sm:$0xff] }
 0x2ca   :  { %3667 = vmatprep.subr.mxu0 %v3918_v3  ;;  %3731 = vmatmul.mubr.f32.vlgmr.msra.gmra.mxu1 %v783_v60 }
 0x2cb   :  { %3668 = vmatpush3.msra.mxu0 %v2776_v35  ;;  %3695 = vmatprep.mubr.msk.f32.mxu0 %vm3919_vm4, %v3918_v3 }
 0x2cc   :  { %3669 = vmatprep.subr.mxu0 %v3918_v3  ;;  %3768 = vmatprep.subr.mxu1 %v3918_v3 }
 0x2cd   :  { %3670 = vmatpush3.msra.mxu0 %v2775_v33  ;;  %3800 = vmatprep.mubr.msk.f32.mxu1 %vm3919_vm4, %v3918_v3 }
 0x2ce   :  { %3671 = vmatprep.subr.mxu0 %v3918_v3 }
 0x2cf   :  { %3672 = vmatpush3.msra.mxu0 %v2774_v22  ;;  %v3910_v27 = vpop.eup %3909  ;;  %v2392_v22 = vld [vmem:[%s5918_s7 + $0x60] sm:$0xff] }
 0x2d0   :  { %3673 = vmatprep.subr.mxu0 %v3918_v3  ;;  %v2536_v52 = vadd.f32 -1.0, %v3910_v27  ;;  %v3912_v11 = vpop.eup %3911  ;;  %v2381_v27 = vld [vmem:[%s5918_s7 + $0x8] sm:$0xff] }
 0x2d1   :  { %3674 = vmatpush3.msra.mxu0 %v2773_v34  ;;  %v2538_v19 = vadd.f32 -1.0, %v3912_v11  ;;  %v2391_v34 = vld [vmem:[%s5918_s7 + $0x58] sm:$0xff] }
 0x2d2   :  { %3675 = vmatprep.subr.mxu0 %v3918_v3  ;;  %v782_v59 = vsel %vm692_vm6, %v5686_v30, %v2536_v52  ;;  %v2395_v30 = vld [vmem:[%s5918_s7 + $0x78] sm:$0xff] }
 0x2d3   :  { %3676 = vmatpush3.msra.mxu0 %v2772_v39  ;;  %3769 = vmatpush3.msra.mxu1 %v2395_v30 }
 0x2d4   :  { %3677 = vmatprep.subr.mxu0 %v3918_v3  ;;  %3770 = vmatprep.subr.mxu1 %v3918_v3 }
 0x2d5   :  { %3678 = vmatpush3.msra.mxu0 %v2771_v40  ;;  %3771 = vmatpush3.msra.mxu1 %v2394_v31  ;;  %v2390_v40 = vld [vmem:[%s5918_s7 + $0x50] sm:$0xff] }
 0x2d6   :  { %3679 = vmatprep.subr.mxu0 %v3918_v3  ;;  %3772 = vmatprep.subr.mxu1 %v3918_v3 }
 0x2d7   :  { %3680 = vmatpush3.msra.mxu0 %v2770_v16  ;;  %3773 = vmatpush3.msra.mxu1 %v2393_v36  ;;  %v2389_v16 = vld [vmem:[%s5918_s7 + $0x48] sm:$0xff] }
 0x2d8   :  { %3681 = vmatprep.subr.mxu0 %v3918_v3  ;;  %3774 = vmatprep.subr.mxu1 %v3918_v3 }
 0x2d9   :  { %3682 = vmatpush3.msra.mxu0 %v2769_v21  ;;  %3775 = vmatpush3.msra.mxu1 %v2392_v22  ;;  %v2388_v21 = vld [vmem:[%s5918_s7 + $0x40] sm:$0xff] }
 0x2da   :  { %3683 = vmatprep.subr.mxu0 %v3918_v3  ;;  %3776 = vmatprep.subr.mxu1 %v3918_v3 }
 0x2db   :  { %3684 = vmatpush3.msra.mxu0 %v2768_v42  ;;  %v1129_v43 = vpop.f32.mrf.mxu0  ;;  %3777 = vmatpush3.msra.mxu1 %v2391_v34  ;;  %v2387_v42 = vld [vmem:[%s5918_s7 + $0x38] sm:$0xff] }
 0x2dc   :  { %3685 = vmatprep.subr.mxu0 %v3918_v3  ;;  %v1133_v46 = vadd.f32 %v1129_v43, %v5647_v61  ;;  %3778 = vmatprep.subr.mxu1 %v3918_v3  ;;  %v2385_v43 = vld [vmem:[%s5918_s7 + $0x28] sm:$0xff] }
 0x2dd   :  { %3686 = vmatpush3.msra.mxu0 %v2767_v41  ;;  %v3277_v47 = vpop.f32.mrf.mxu0  ;;  %3779 = vmatpush3.msra.mxu1 %v2390_v40  ;;  %v2386_v41 = vld [vmem:[%s5918_s7 + $0x30] sm:$0xff] }
 0x2de   :  { %3687 = vmatprep.subr.mxu0 %v3918_v3  ;;  %v1221_v10 = vadd.f32 %v5661_v1, %v1133_v46  ;;  %v2795_v1 = vld [vmem:[%s5915_s5 + $0x880] sm:$0xff]  ;;  %3780 = vmatprep.subr.mxu1 %v3918_v3  ;;  %v2383_v46 = vld [vmem:[%s5918_s7 + $0x18] sm:$0xff]  ;;  %v2382_v47 = vld [vmem:[%s5918_s7 + $0x10] sm:$0xff] }
 0x2df   :  { %3688 = vmatpush3.msra.mxu0 %v2766_v5  ;;  %3781 = vmatpush3.msra.mxu1 %v2389_v16  ;;  %v2384_v5 = vld [vmem:[%s5918_s7 + $0x20] sm:$0xff] }
 0x2e0   :  { %3689 = vmatprep.subr.mxu0 %v3918_v3  ;;  %3782 = vmatprep.subr.mxu1 %v3918_v3 }
 0x2e1   :  { %3690 = vmatpush3.msra.mxu0 %v2765_v17  ;;  %v1393_v54 = vpop.f32.mrf.mxu1  ;;  %3783 = vmatpush3.msra.mxu1 %v2388_v21  ;;  %v2380_v17 = vld [vmem:[%s5918_s7] sm:$0xff] }
 0x2e2   :  { %3691 = vmatprep.subr.mxu0 %v3918_v3  ;;  %3784 = vmatprep.subr.mxu1 %v3918_v3 }
 0x2e3   :  { %3692 = vmatpush3.msra.mxu0 %v2764_v51  ;;  %v3382_v26 = vpop.f32.mrf.mxu1  ;;  %3785 = vmatpush3.msra.mxu1 %v2387_v42 }
 0x2e4   :  { %3693 = vmatprep.subr.mxu0 %v3918_v3  ;;  %3786 = vmatprep.subr.mxu1 %v3918_v3 }
 0x2e5   :  { %3694 = vmatpush3.msra.mxu0 %v2763_v44  ;;  %3787 = vmatpush3.msra.mxu1 %v2386_v41 }
 0x2e6   :  { %3696 = vmatmul.mubr.f32.vlgmr.msra.gmra.mxu0 %v782_v59  ;;  %3733 = vmatprep.subr.mxu0 %v3918_v3 }
 0x2e7   :  { %3734 = vmatpush3.msra.mxu0 %v2810_v23  ;;  %3765 = vmatprep.mubr.msk.f32.mxu0 %vm3919_vm4, %v3918_v3  ;;  %vm694_vm4 = vcmp.gt.f32.partialorder %v5771_v56, 0.0 }
 0x2e8   :  { %3735 = vmatprep.subr.mxu0 %v3918_v3  ;;  %v784_v38 = vsel %vm694_vm4, %v5771_v56, %v2538_v19  ;;  %3788 = vmatprep.subr.mxu1 %v3918_v3 }
 0x2e9   :  { %3736 = vmatpush3.msra.mxu0 %v2809_v62  ;;  %3789 = vmatpush3.msra.mxu1 %v2385_v43 }
 0x2ea   :  { %3737 = vmatprep.subr.mxu0 %v3918_v3  ;;  %3790 = vmatprep.subr.mxu1 %v3918_v3 }
 0x2eb   :  { %3738 = vmatpush3.msra.mxu0 %v2808_v45  ;;  %3791 = vmatpush3.msra.mxu1 %v2384_v5 }
 0x2ec   :  { %3739 = vmatprep.subr.mxu0 %v3918_v3  ;;  %3792 = vmatprep.subr.mxu1 %v3918_v3 }
 0x2ed   :  { %3740 = vmatpush3.msra.mxu0 %v2807_v53  ;;  %3793 = vmatpush3.msra.mxu1 %v2383_v46 }
 0x2ee   :  { %3741 = vmatprep.subr.mxu0 %v3918_v3  ;;  %3794 = vmatprep.subr.mxu1 %v3918_v3 }
 0x2ef   :  { %3742 = vmatpush3.msra.mxu0 %v2806_v63  ;;  %3795 = vmatpush3.msra.mxu1 %v2382_v47 }
 0x2f0   :  { %3743 = vmatprep.subr.mxu0 %v3918_v3  ;;  %3796 = vmatprep.subr.mxu1 %v3918_v3 }
 0x2f1   :  { %3744 = vmatpush3.msra.mxu0 %v2805_v0  ;;  %3797 = vmatpush3.msra.mxu1 %v2381_v27 }
 0x2f2   :  { %3745 = vmatprep.subr.mxu0 %v3918_v3  ;;  %3798 = vmatprep.subr.mxu1 %v3918_v3 }
 0x2f3   :  { %3746 = vmatpush3.msra.mxu0 %v2804_v4  ;;  %3799 = vmatpush3.msra.mxu1 %v2380_v17 }
 0x2f4   :  { %3747 = vmatprep.subr.mxu0 %v3918_v3 }
 0x2f5   :  { %3748 = vmatpush3.msra.mxu0 %v2803_v37 }
 0x2f6   :  { %3749 = vmatprep.subr.mxu0 %v3918_v3 }
 0x2f7   :  { %3750 = vmatpush3.msra.mxu0 %v2802_v57 }
 0x2f8   :  { %3751 = vmatprep.subr.mxu0 %v3918_v3 }
 0x2f9   :  { %3752 = vmatpush3.msra.mxu0 %v2801_v7 }
 0x2fa   :  { %3753 = vmatprep.subr.mxu0 %v3918_v3 }
 0x2fb   :  { %3754 = vmatpush3.msra.mxu0 %v2800_v8 }
 0x2fc   :  { %3755 = vmatprep.subr.mxu0 %v3918_v3 }
 0x2fd   :  { %3756 = vmatpush3.msra.mxu0 %v2799_v12  ;;  %v1305_v9 = vpop.f32.mrf.mxu0 }
 0x2fe   :  { %3757 = vmatprep.subr.mxu0 %v3918_v3  ;;  %v1309_v61 = vadd.f32 %v1305_v9, %v1221_v10 }
 0x2ff   :  { %3758 = vmatpush3.msra.mxu0 %v2798_v49  ;;  %v3347_v48 = vpop.f32.mrf.mxu0 }
 0x300   :  { %3759 = vmatprep.subr.mxu0 %v3918_v3  ;;  %v1397_v18 = vadd.f32 %v1393_v54, %v1309_v61 }
 0x301   :  { %3760 = vmatpush3.msra.mxu0 %v2797_v15  ;;  %v2813_v15 = vld [vmem:[%s5920_s8] ss:$0 sm:$0xff] }
 0x302   :  { %3761 = vmatprep.subr.mxu0 %v3918_v3 }
 0x303   :  { %3762 = vmatpush3.msra.mxu0 %v2796_v13  ;;  %v1569_v20 = vpop.f32.mrf.mxu1 }
 0x304   :  { %3763 = vmatprep.subr.mxu0 %v3918_v3  ;;  %v2811_v3 = vld [vmem:[%s5919_s6] ss:$0 sm:$0xff] }
 0x305   :  { %3764 = vmatpush3.msra.mxu0 %v2795_v1  ;;  %v3452_v55 = vpop.f32.mrf.mxu1 }
 0x306   :  { %3766 = vmatmul.mubr.f32.vlgmr.msra.gmra.mxu0 %v784_v38 }
 0x31f   :  { %v1481_v24 = vpop.f32.mrf.mxu0 }
 0x320   :  { %v1485_v25 = vadd.f32 %v1481_v24, %v1397_v18 }
 0x321   :  { %v3417_v28 = vpop.f32.mrf.mxu0 }
 0x322   :  { %v1573_v6 = vadd.f32 %v1569_v20, %v1485_v25 }
 0x325   :  { %v1745_v29 = vpop.f32.mrf.mxu1 }
 0x327   :  { %v3522_v58 = vpop.f32.mrf.mxu1 }
 0x341   :  { %v1657_v60 = vpop.f32.mrf.mxu0 }
 0x342   :  { %v1661_v35 = vadd.f32 %v1657_v60, %v1573_v6 }
 0x343   :  { %v3487_v32 = vpop.f32.mrf.mxu0 }
 0x344   :  { %v1749_v33 = vadd.f32 %v1745_v29, %v1661_v35 }
 0x347   :  { %v1921_v50 = vpop.f32.mrf.mxu1 }
 0x349   :  { %v3592_v39 = vpop.f32.mrf.mxu1 }
 0x363   :  { %v1833_v10 = vpop.f32.mrf.mxu0 }
 0x364   :  { %v1837_v51 = vadd.f32 %v1833_v10, %v1749_v33 }
 0x365   :  { %v3557_v52 = vpop.f32.mrf.mxu0 }
 0x366   :  { %v1925_v54 = vadd.f32 %v1921_v50, %v1837_v51 }
 0x369   :  { %v2097_v44 = vpop.f32.mrf.mxu1 }
 0x36b   :  { %v3662_v26 = vpop.f32.mrf.mxu1 }
 0x385   :  { %v2009_v23 = vpop.f32.mrf.mxu0 }
 0x386   :  { %v2013_v56 = vadd.f32 %v2009_v23, %v1925_v54 }
 0x387   :  { %v3627_v59 = vpop.f32.mrf.mxu0 }
 0x388   :  { %v2101_v62 = vadd.f32 %v2097_v44, %v2013_v56 }
 0x38a   :  { %v2273_v45 = vpop.f32.mrf.mxu1 }
 0x38c   :  { %v3732_v14 = vpop.f32.mrf.mxu1 }
 0x3a6   :  { %v2185_v53 = vpop.f32.mrf.mxu0 }
 0x3a7   :  { %v2189_v2 = vadd.f32 %v2185_v53, %v2101_v62 }
 0x3a8   :  { %v3697_v63 = vpop.f32.mrf.mxu0 }
 0x3a9   :  { %v2277_v0 = vadd.f32 %v2273_v45, %v2189_v2 }
 0x3c6   :  { %v2361_v4 = vpop.f32.mrf.mxu0 }
 0x3c7   :  { %v2365_v37 = vadd.f32 %v2361_v4, %v2277_v0 }
 0x3c8   :  { %v3767_v57 = vpop.f32.mrf.mxu0 }
 0x3c9   :  { %v2373_v7 = vadd.f32 %v2811_v3, %v2365_v37 }
 0x3cb   :  { %v2375_v8 = vmin.f32 %v2373_v7, 0.0  ;;  %vm2374_vm7 = vcmp.gt.f32.partialorder %v2373_v7, 0.0 }
 0x3cd   :  { %v2376_v12 = vmul.f32 1.442695, %v2375_v8 }
 0x3cf   :  { %3913 = vpow2.f32 %v2376_v12 }
 0x3dc   :  { %v3914_v49 = vpop.eup %3913 }
 0x3dd   :  { %v2812_v9 = vadd.f32 -1.0, %v3914_v49 }
 0x3df   :  { %v2379_v11 = vsel %vm2374_vm7, %v2373_v7, %v2812_v9 }
 0x3e0   :  { %3801 = vmatmul.mubr.f32.vlgmr.msra.gmra.mxu1 %v2379_v11 }
 0x4a0   :  { %v2469_v61 = vpop.f32.mrf.mxu1 }
 0x4a1   :  { %v2470_v48 = vadd.f32 %v2813_v15, %v2469_v61 }
 0x4a2   :  { %v3802_v13 = vpop.f32.mrf.mxu1 }
 0x4a3   :  { %v2474_v18 = vmin.f32 %v2470_v48, 0.0  ;;  %vm2473_vm8 = vcmp.gt.f32.partialorder %v2470_v48, 0.0 }
 0x4a5   :  { %v2475_v19 = vmul.f32 1.442695, %v2474_v18 }
 0x4a7   :  { %3915 = vpow2.f32 %v2475_v19 }
 0x4b4   :  { %v3916_v1 = vpop.eup %3915 }
 0x4b5   :  { %v2814_v20 = vadd.f32 -1.0, %v3916_v1 }
 0x4b7   :  { %v2478_v38 = vsel %vm2473_vm8, %v2470_v48, %v2814_v20 }
 0x4b8   :  { %2479 = vst [vmem:[%s5921_s9] sm:$0xff] %v2478_v38 }

</bundles_post_ra>
